<compile_context>
chip_gen: v5e
topology: v5e:2x2
jax: 0.10.0
libtpu: 0.0.40
codegen_flags: <defaults>
</compile_context>

<pallas_src>
import math
import functools
import numpy as np

import jax
import jax.numpy as jnp
from jax.experimental import pallas as pl
from jax.experimental.pallas import tpu as pltpu


# ----------------------------------------------------------------------------
# sincos positional embedding (faithful numpy port of the reference code)
# ----------------------------------------------------------------------------
def get_1d_sincos_pos_embed_from_grid(embed_dim, pos):
    assert embed_dim % 2 == 0
    omega = np.arange(embed_dim // 2, dtype=np.float32)
    omega /= embed_dim / 2.0
    omega = 1.0 / 10000 ** omega
    pos = pos.reshape(-1)
    out = np.einsum('m,d->md', pos, omega)
    return np.concatenate([np.sin(out), np.cos(out)], axis=1)


def get_2d_sincos_pos_embed_from_grid(embed_dim, grid):
    assert embed_dim % 2 == 0
    emb_h = get_1d_sincos_pos_embed_from_grid(embed_dim // 2, grid[0])
    emb_w = get_1d_sincos_pos_embed_from_grid(embed_dim // 2, grid[1])
    return np.concatenate([emb_h, emb_w], axis=1)


def get_2d_sincos_pos_embed(embed_dim, grid_size):
    grid_size = (grid_size, grid_size) if type(grid_size) != tuple else grid_size
    grid_h = np.arange(grid_size[0], dtype=np.float32)
    grid_w = np.arange(grid_size[1], dtype=np.float32)
    grid = np.meshgrid(grid_w, grid_h)
    grid = np.stack(grid, axis=0)
    grid = grid.reshape([2, 1, grid_size[0], grid_size[1]])
    return get_2d_sincos_pos_embed_from_grid(embed_dim, grid)


# ----------------------------------------------------------------------------
# Fused Pallas kernel
# ----------------------------------------------------------------------------
def _layernorm(x, w, b, eps=1e-5):
    # f32 statistics (matches nn.LayerNorm, eps=1e-5)
    mu = jnp.mean(x, axis=-1, keepdims=True)
    var = jnp.mean(jnp.square(x - mu), axis=-1, keepdims=True)
    return (x - mu) * jax.lax.rsqrt(var + eps) * w + b


def vit_fused_kernel(patches_ref, pw_ref, pb_ref, pos_ref,
                     ln1w_ref, ln1b_ref, qkvw_ref, ow_ref, ob_ref,
                     ln2w_ref, ln2b_ref, f1w_ref, f1b_ref, f2w_ref, f2b_ref,
                     fnw_ref, fnb_ref,
                     o_ref,
                     resid_ref,
                     *, heads, dim_head, bt):
    layer = pl.program_id(1)
    n_layers = pl.num_programs(1)
    M, D = resid_ref.shape            # M = bt * N (batch block flattened into tokens)
    N = M // bt
    inner = heads * dim_head

    # ---- depth step 0: patch embedding (Conv2d-as-matmul) + sincos pos embedding ----
    @pl.when(layer == 0)
    def _():
        emb = jnp.dot(patches_ref[0], pw_ref[...],         # (M, P) bf16 @ (P, D) bf16
                      preferred_element_type=jnp.float32)
        resid_ref[...] = emb + pb_ref[...] + pos_ref[...]   # pos pre-tiled to (M, D)

    x = resid_ref[...]                                      # (M, D) f32 residual stream

    # ---- PreNorm + multi-head self-attention ----
    h = _layernorm(x, ln1w_ref[0], ln1b_ref[0]).astype(jnp.bfloat16)      # (M, D)
    # one lane-dense matmul for all of q/k/v; softmax scale is pre-folded into the q columns
    qkv = jnp.dot(h, qkvw_ref[0], preferred_element_type=jnp.float32)     # (M, 3*inner)
    qf, kf, vf = jnp.split(qkv, 3, axis=-1)                               # each (M, inner)

    def to_heads(t):                       # (M, inner) -> (bt*heads, N, dh); dh stays lane-minor
        return (t.reshape(bt, N, heads, dim_head)
                 .transpose(0, 2, 1, 3)
                 .reshape(bt * heads, N, dim_head))

    qh = to_heads(qf).astype(jnp.bfloat16)
    kh = to_heads(kf).astype(jnp.bfloat16)
    vh = to_heads(vf).astype(jnp.bfloat16)

    # scores: contraction on dh of both operands (no explicit k transpose)
    s = jnp.einsum('hnd,hmd->hnm', qh, kh,
                   preferred_element_type=jnp.float32)                    # (bt*heads, N, N) f32
    s = s - jnp.max(s, axis=-1, keepdims=True)
    # NOTE: exp/tanh kept in f32 (generation-agnostic; bf16 EUP is a v6e/v7x-only micro-opt).
    p = jnp.exp(s)
    p = p * pl.reciprocal(jnp.sum(p, axis=-1, keepdims=True), approx=True)

    o = jnp.einsum('hnm,hmd->hnd', p.astype(jnp.bfloat16), vh,
                   preferred_element_type=jnp.float32)                    # (bt*heads, N, dh)
    # merge heads back to a lane-dense (M, inner) and do ONE output-projection matmul
    o = (o.reshape(bt, heads, N, dim_head)
          .transpose(0, 2, 1, 3)
          .reshape(M, inner)).astype(jnp.bfloat16)
    attn = jnp.dot(o, ow_ref[0], preferred_element_type=jnp.float32) + ob_ref[0]
    x = x + attn

    # ---- PreNorm + FeedForward (Linear -> Tanh -> Linear) ----
    h2 = _layernorm(x, ln2w_ref[0], ln2b_ref[0]).astype(jnp.bfloat16)
    f = jnp.tanh(jnp.dot(h2, f1w_ref[0], preferred_element_type=jnp.float32) + f1b_ref[0])
    ff = jnp.dot(f.astype(jnp.bfloat16), f2w_ref[0],
                 preferred_element_type=jnp.float32) + f2b_ref[0]
    x = x + ff

    resid_ref[...] = x

    # ---- final LayerNorm, written once on the last depth step ----
    @pl.when(layer == n_layers - 1)
    def _():
        o_ref[0] = _layernorm(x, fnw_ref[...], fnb_ref[...])


# ----------------------------------------------------------------------------
# Wrapper: one pallas_call for the whole encoder
# ----------------------------------------------------------------------------
def _pick_batch_block(B, N, P, D, inner, mlp_dim, heads, vmem_limit, max_bt=8):
    """Largest bt (dividing B, <= max_bt) whose working set fits the VMEM budget."""
    # double-buffered per-layer weight slabs (bf16) + shared constants
    weight_bytes = 2 * 2 * (D * 3 * inner + inner * D + D * mlp_dim + mlp_dim * D)
    weight_bytes += 2 * (P * D + N * D * 4)
    # per-image activation working set (residual f32, patch block bf16 x2, qkv / scores /
    # head outputs / MLP hidden f32, output block x2)
    per_img = (N * D * 4 + 2 * N * P * 2 + N * 3 * inner * 4 + heads * N * N * 4
               + 2 * N * inner * 4 + N * mlp_dim * 4 + 2 * N * D * 4)
    budget = max(vmem_limit - weight_bytes, per_img)
    bt = max(1, min(max_bt, B, budget // per_img))
    while B % bt:
        bt -= 1
    return int(bt)


def vit_encoder(img, packed, *, patch, heads, dim_head, max_batch_block=8):
    # img: (B, C, H, W) NCHW, same as PyTorch
    B, C, H, W = img.shape
    gh, gw = H // patch, W // patch
    N = gh * gw
    P = C * patch * patch
    D = packed["patch_b"].shape[-1]
    depth = packed["qkv_w"].shape[0]
    inner = heads * dim_head
    mlp_dim = packed["ff1_w"].shape[-1]

    # explicit VMEM limit, sized from the device (review: default scoped VMEM is too small)
    try:
        vmem_cap = pltpu.get_tpu_info().vmem_capacity_bytes
    except Exception:
        vmem_cap = 64 * 1024 * 1024
    vmem_limit = int(min(100 * 1024 * 1024, vmem_cap * 7 // 8))

    bt = _pick_batch_block(B, N, P, D, inner, mlp_dim, heads, vmem_limit,
                           max_bt=max_batch_block)
    nb = B // bt
    M = bt * N

    # Patchify glue: Conv2d(k=patch, s=patch) == matmul over flattened (c, ph, pw) patches,
    # row-major (gh, gw) token order == Rearrange('b c h w -> b (h w) c').  bf16 halves the
    # resident patch-block DMA (kernel accumulates in f32).
    patches = img.reshape(B, C, gh, patch, gw, patch)
    patches = patches.transpose(0, 2, 4, 1, 3, 5).reshape(nb, M, P).astype(jnp.bfloat16)

    # pos embedding pre-tiled for the bt images in one batch block
    pos = packed["pos"]                                               # (N, D) f32
    pos_bt = jnp.broadcast_to(pos[None], (bt, N, D)).reshape(M, D)

    def per_layer(nd):          # depth-stacked weights: block index follows the depth axis
        return lambda b, l: (l,) + (0,) * (nd - 1)

    def const(nd):              # shared / constant operands
        return lambda b, l: (0,) * nd

    kern = functools.partial(vit_fused_kernel, heads=heads, dim_head=dim_head, bt=bt)
    out = pl.pallas_call(
        kern,
        out_shape=jax.ShapeDtypeStruct((nb, M, D), jnp.float32),
        grid=(nb, depth),
        in_specs=[
            pl.BlockSpec((1, M, P), lambda b, l: (b, 0, 0)),              # patches (bf16)
            pl.BlockSpec((P, D), const(2)),                               # patch_w (bf16)
            pl.BlockSpec((1, D), const(2)),                               # patch_b
            pl.BlockSpec((M, D), const(2)),                               # pos embedding (tiled)
            pl.BlockSpec((1, 1, D), per_layer(3)),                        # ln1_w
            pl.BlockSpec((1, 1, D), per_layer(3)),                        # ln1_b
            pl.BlockSpec((1, D, 3 * inner), per_layer(3)),                # qkv_w (bf16, lane-dense)
            pl.BlockSpec((1, inner, D), per_layer(3)),                    # out_w (bf16, lane-dense)
            pl.BlockSpec((1, 1, D), per_layer(3)),                        # out_b
            pl.BlockSpec((1, 1, D), per_layer(3)),                        # ln2_w
            pl.BlockSpec((1, 1, D), per_layer(3)),                        # ln2_b
            pl.BlockSpec((1, D, mlp_dim), per_layer(3)),                  # ff1_w (bf16)
            pl.BlockSpec((1, 1, mlp_dim), per_layer(3)),                  # ff1_b
            pl.BlockSpec((1, mlp_dim, D), per_layer(3)),                  # ff2_w (bf16)
            pl.BlockSpec((1, 1, D), per_layer(3)),                        # ff2_b
            pl.BlockSpec((1, D), const(2)),                               # final ln w
            pl.BlockSpec((1, D), const(2)),                               # final ln b
        ],
        out_specs=pl.BlockSpec((1, M, D), lambda b, l: (b, 0, 0)),        # resident across depth
        scratch_shapes=[pltpu.VMEM((M, D), jnp.float32)],                 # residual stream
        compiler_params=pltpu.CompilerParams(
            dimension_semantics=("parallel", "arbitrary"),
            vmem_limit_bytes=vmem_limit),
    )(patches,
      packed["patch_w"], packed["patch_b"], pos_bt,
      packed["ln1_w"], packed["ln1_b"], packed["qkv_w"], packed["out_w"], packed["out_b"],
      packed["ln2_w"], packed["ln2_b"], packed["ff1_w"], packed["ff1_b"],
      packed["ff2_w"], packed["ff2_b"], packed["final_ln_w"], packed["final_ln_b"])
    return out.reshape(B, N, D)


# ----------------------------------------------------------------------------
# Parameter init (deterministic, mirrors torch __init__ shapes) + packing
# ----------------------------------------------------------------------------
def xavier_uniform(key, shape):
    fan_in, fan_out = shape[0], shape[1]
    limit = math.sqrt(6.0 / (fan_in + fan_out))
    return jax.random.uniform(key, shape, jnp.float32, -limit, limit)


def init_params(key, *, channels, patch, dim, depth, heads, dim_head, mlp_dim):
    patch_dim = channels * patch * patch
    inner = heads * dim_head
    keys = jax.random.split(key, 2 + depth * 4)

    params = {
        # Conv2d(channels, dim, k=patch, s=patch) flattened to a (patch_dim, dim) matmul.
        "patch_w": xavier_uniform(keys[0], (patch_dim, dim)),
        "patch_b": (jax.random.uniform(keys[1], (1, dim), jnp.float32,
                                       -1.0, 1.0) / math.sqrt(patch_dim)),
        "final_ln_w": jnp.ones((1, dim), jnp.float32),
        "final_ln_b": jnp.zeros((1, dim), jnp.float32),
        "layers": [],
    }
    for l in range(depth):
        k0, k1, k2, k3 = keys[2 + 4 * l: 2 + 4 * (l + 1)]
        params["layers"].append({
            "ln1_w": jnp.ones((1, dim), jnp.float32),
            "ln1_b": jnp.zeros((1, dim), jnp.float32),
            "qkv_w": xavier_uniform(k0, (dim, 3 * inner)),          # bias=False
            "out_w": xavier_uniform(k1, (inner, dim)),
            "out_b": jnp.zeros((1, dim), jnp.float32),
            "ln2_w": jnp.ones((1, dim), jnp.float32),
            "ln2_b": jnp.zeros((1, dim), jnp.float32),
            "ff1_w": xavier_uniform(k2, (dim, mlp_dim)),
            "ff1_b": jnp.zeros((1, mlp_dim), jnp.float32),
            "ff2_w": xavier_uniform(k3, (mlp_dim, dim)),
            "ff2_b": jnp.zeros((1, dim), jnp.float32),
        })
    return params


def pack_params(params, pos_embed, *, heads, dim_head):
    """Stack per-layer weights along a depth axis, keep all matmul weights lane-dense
    ((D, 3*inner), (inner, D), (D, mlp), (mlp, D)), fold the softmax scale into the q
    columns, and cast matmul weights to bf16 (biases / LN params stay f32)."""
    layers = params["layers"]
    scale = dim_head ** (-0.5)

    def stack(name):
        return jnp.stack([lp[name] for lp in layers], axis=0)

    qkv = stack("qkv_w")                                     # (depth, D, 3*inner), q|k|v columns
    q_w, k_w, v_w = jnp.split(qkv, 3, axis=-1)
    qkv_w = jnp.concatenate([q_w * scale, k_w, v_w], axis=-1)   # fold attention scale into q
    out_w = stack("out_w")                                   # (depth, inner, D)

    bf = lambda a: a.astype(jnp.bfloat16)
    return {
        "patch_w": bf(params["patch_w"]),
        "patch_b": params["patch_b"],
        "pos": jnp.asarray(pos_embed, jnp.float32),
        "ln1_w": stack("ln1_w"), "ln1_b": stack("ln1_b"),
        "qkv_w": bf(qkv_w),
        "out_w": bf(out_w), "out_b": stack("out_b"),
        "ln2_w": stack("ln2_w"), "ln2_b": stack("ln2_b"),
        "ff1_w": bf(stack("ff1_w")), "ff1_b": stack("ff1_b"),
        "ff2_w": bf(stack("ff2_w")), "ff2_b": stack("ff2_b"),
        "final_ln_w": params["final_ln_w"], "final_ln_b": params["final_ln_b"],
    }


# ----------------------------------------------------------------------------
if __name__ == "__main__":
    # Small, forward-consistent config: 16x16 image, 4x4 patches -> 16 tokens.
    B, C, H, W = 2, 4, 16, 16
    patch = 4
    dim = 32
    depth = 2
    heads = 4
    dim_head = 8
    mlp_dim = 64

    key = jax.random.PRNGKey(0)
    k_img, k_par = jax.random.split(key)

    img = jax.random.normal(k_img, (B, C, H, W), jnp.float32)

    params = init_params(k_par, channels=C, patch=patch, dim=dim, depth=depth,
                         heads=heads, dim_head=dim_head, mlp_dim=mlp_dim)
    pos_embed = get_2d_sincos_pos_embed(dim, (H // patch, W // patch))   # (N, dim)
    packed = pack_params(params, pos_embed, heads=heads, dim_head=dim_head)

    out = vit_encoder(img, packed, patch=patch, heads=heads, dim_head=dim_head)
    out = jax.block_until_ready(out)

    assert out.shape == (B, (H // patch) * (W // patch), dim)
    assert bool(jnp.all(jnp.isfinite(out)))
    print("KERNEL_OK")
</pallas_src>

<mosaic_0001>
module attributes {stable_mosaic.version = 11 : i64} {
  func.func @vit_fused_kernel(%arg0: i32, %arg1: i32, %arg2: memref<1x32x64xbf16, #tpu.memory_space<vmem>>, %arg3: memref<64x32xbf16, #tpu.memory_space<vmem>>, %arg4: memref<1x32xf32, #tpu.memory_space<vmem>>, %arg5: memref<32x32xf32, #tpu.memory_space<vmem>>, %arg6: memref<1x1x32xf32, #tpu.memory_space<vmem>>, %arg7: memref<1x1x32xf32, #tpu.memory_space<vmem>>, %arg8: memref<1x32x96xbf16, #tpu.memory_space<vmem>>, %arg9: memref<1x32x32xbf16, #tpu.memory_space<vmem>>, %arg10: memref<1x1x32xf32, #tpu.memory_space<vmem>>, %arg11: memref<1x1x32xf32, #tpu.memory_space<vmem>>, %arg12: memref<1x1x32xf32, #tpu.memory_space<vmem>>, %arg13: memref<1x32x64xbf16, #tpu.memory_space<vmem>>, %arg14: memref<1x1x64xf32, #tpu.memory_space<vmem>>, %arg15: memref<1x64x32xbf16, #tpu.memory_space<vmem>>, %arg16: memref<1x1x32xf32, #tpu.memory_space<vmem>>, %arg17: memref<1x32xf32, #tpu.memory_space<vmem>>, %arg18: memref<1x32xf32, #tpu.memory_space<vmem>>, %arg19: memref<1x32x32xf32, #tpu.memory_space<vmem>>, %arg20: memref<32x32xf32, #tpu.memory_space<vmem>>) attributes {dimension_semantics = [#tpu.dimension_semantics<parallel>, #tpu.dimension_semantics<arbitrary>], iteration_bounds = array<i64: 1, 2>, scalar_prefetch = 0 : i64, scratch_operands = 1 : i64, tpu.core_type = #tpu.core_type<tc>, window_params = [{transform_indices = @transform_0, window_bounds = array<i64: 1, 32, 64>}, {pipeline_mode = #tpu.pipeline_mode<synchronous>, transform_indices = @transform_1, window_bounds = array<i64: 64, 32>}, {pipeline_mode = #tpu.pipeline_mode<synchronous>, transform_indices = @transform_2, window_bounds = array<i64: 1, 32>}, {pipeline_mode = #tpu.pipeline_mode<synchronous>, transform_indices = @transform_3, window_bounds = array<i64: 32, 32>}, {transform_indices = @transform_4, window_bounds = array<i64: 1, 1, 32>}, {transform_indices = @transform_5, window_bounds = array<i64: 1, 1, 32>}, {transform_indices = @transform_6, window_bounds = array<i64: 1, 32, 96>}, {transform_indices = @transform_7, window_bounds = array<i64: 1, 32, 32>}, {transform_indices = @transform_8, window_bounds = array<i64: 1, 1, 32>}, {transform_indices = @transform_9, window_bounds = array<i64: 1, 1, 32>}, {transform_indices = @transform_10, window_bounds = array<i64: 1, 1, 32>}, {transform_indices = @transform_11, window_bounds = array<i64: 1, 32, 64>}, {transform_indices = @transform_12, window_bounds = array<i64: 1, 1, 64>}, {transform_indices = @transform_13, window_bounds = array<i64: 1, 64, 32>}, {transform_indices = @transform_14, window_bounds = array<i64: 1, 1, 32>}, {pipeline_mode = #tpu.pipeline_mode<synchronous>, transform_indices = @transform_15, window_bounds = array<i64: 1, 32>}, {pipeline_mode = #tpu.pipeline_mode<synchronous>, transform_indices = @transform_16, window_bounds = array<i64: 1, 32>}, {transform_indices = @transform_17, window_bounds = array<i64: 1, 32, 32>}]} {
    %c0_i32 = arith.constant 0 : i32
    %0 = arith.cmpi eq, %arg1, %c0_i32 : i32
    %1 = arith.extui %0 : i1 to i32
    %c0_i32_0 = arith.constant 0 : i32
    %2 = arith.cmpi ne, %1, %c0_i32_0 : i32
    scf.if %2 {
      %c0_55 = arith.constant 0 : index
      %c0_56 = arith.constant 0 : index
      %c0_57 = arith.constant 0 : index
      %122 = vector.load %arg2[%c0_55, %c0_56, %c0_57] : memref<1x32x64xbf16, #tpu.memory_space<vmem>>, vector<1x32x64xbf16>
      %123 = vector.shape_cast %122 : vector<1x32x64xbf16> to vector<32x64xbf16>
      %c0_58 = arith.constant 0 : index
      %c0_59 = arith.constant 0 : index
      %124 = vector.load %arg3[%c0_58, %c0_59] : memref<64x32xbf16, #tpu.memory_space<vmem>>, vector<64x32xbf16>
      %cst_60 = arith.constant dense<0.000000e+00> : vector<32x32xf32>
      %125 = tpu.matmul %123, %124, %cst_60 {dimension_numbers = #tpu.dot_dimension_numbers<[1], [0], [0], [1], [0, 0, 1, 1], [], []>} : vector<32x64xbf16>, vector<64x32xbf16>, vector<32x32xf32> -> vector<32x32xf32>
      %c0_61 = arith.constant 0 : index
      %c0_62 = arith.constant 0 : index
      %126 = vector.load %arg4[%c0_61, %c0_62] : memref<1x32xf32, #tpu.memory_space<vmem>>, vector<1x32xf32>
      %127 = vector.broadcast %126 : vector<1x32xf32> to vector<32x32xf32>
      %128 = arith.addf %125, %127 : vector<32x32xf32>
      %c0_63 = arith.constant 0 : index
      %c0_64 = arith.constant 0 : index
      %129 = vector.load %arg5[%c0_63, %c0_64] : memref<32x32xf32, #tpu.memory_space<vmem>>, vector<32x32xf32>
      %130 = arith.addf %128, %129 : vector<32x32xf32>
      %c0_65 = arith.constant 0 : index
      %c0_66 = arith.constant 0 : index
      %131 = vector.load %arg20[%c0_65, %c0_66] : memref<32x32xf32, #tpu.memory_space<vmem>>, vector<32x32xf32>
      tpu.vector_store %arg20[%c0_65, %c0_66], %130 {strides = array<i32>} : memref<32x32xf32, #tpu.memory_space<vmem>>, vector<32x32xf32>,
    } else {
    }
    %c0 = arith.constant 0 : index
    %c0_1 = arith.constant 0 : index
    %3 = vector.load %arg20[%c0, %c0_1] : memref<32x32xf32, #tpu.memory_space<vmem>>, vector<32x32xf32>
    %c0_2 = arith.constant 0 : index
    %c0_3 = arith.constant 0 : index
    %c0_4 = arith.constant 0 : index
    %4 = vector.load %arg6[%c0_2, %c0_3, %c0_4] : memref<1x1x32xf32, #tpu.memory_space<vmem>>, vector<1x1x32xf32>
    %5 = vector.shape_cast %4 : vector<1x1x32xf32> to vector<1x32xf32>
    %c0_5 = arith.constant 0 : index
    %c0_6 = arith.constant 0 : index
    %c0_7 = arith.constant 0 : index
    %6 = vector.load %arg7[%c0_5, %c0_6, %c0_7] : memref<1x1x32xf32, #tpu.memory_space<vmem>>, vector<1x1x32xf32>
    %7 = vector.shape_cast %6 : vector<1x1x32xf32> to vector<1x32xf32>
    %cst = arith.constant dense<0.000000e+00> : vector<32xf32>
    %8 = vector.multi_reduction <add>, %3, %cst [1] : vector<32x32xf32> to vector<32xf32>
    %9 = vector.shape_cast %8 : vector<32xf32> to vector<32x1xf32>
    %cst_8 = arith.constant 3.200000e+01 : f32
    %10 = vector.broadcast %cst_8 : f32 to vector<32x1xf32>
    %11 = arith.divf %9, %10 : vector<32x1xf32>
    %12 = vector.broadcast %11 : vector<32x1xf32> to vector<32x32xf32>
    %13 = arith.subf %3, %12 : vector<32x32xf32>
    %14 = arith.mulf %13, %13 : vector<32x32xf32>
    %cst_9 = arith.constant dense<0.000000e+00> : vector<32xf32>
    %15 = vector.multi_reduction <add>, %14, %cst_9 [1] : vector<32x32xf32> to vector<32xf32>
    %16 = vector.shape_cast %15 : vector<32xf32> to vector<32x1xf32>
    %cst_10 = arith.constant 3.200000e+01 : f32
    %17 = vector.broadcast %cst_10 : f32 to vector<32x1xf32>
    %18 = arith.divf %16, %17 : vector<32x1xf32>
    %19 = vector.broadcast %11 : vector<32x1xf32> to vector<32x32xf32>
    %20 = arith.subf %3, %19 : vector<32x32xf32>
    %cst_11 = arith.constant 9.99999974E-6 : f32
    %21 = vector.broadcast %cst_11 : f32 to vector<32x1xf32>
    %22 = arith.addf %18, %21 : vector<32x1xf32>
    %23 = math.rsqrt %22 : vector<32x1xf32>
    %24 = vector.broadcast %23 : vector<32x1xf32> to vector<32x32xf32>
    %25 = arith.mulf %20, %24 : vector<32x32xf32>
    %26 = vector.broadcast %5 : vector<1x32xf32> to vector<32x32xf32>
    %27 = arith.mulf %25, %26 : vector<32x32xf32>
    %28 = vector.broadcast %7 : vector<1x32xf32> to vector<32x32xf32>
    %29 = arith.addf %27, %28 : vector<32x32xf32>
    %30 = arith.truncf %29 : vector<32x32xf32> to vector<32x32xbf16>
    %c0_12 = arith.constant 0 : index
    %c0_13 = arith.constant 0 : index
    %c0_14 = arith.constant 0 : index
    %31 = vector.load %arg8[%c0_12, %c0_13, %c0_14] : memref<1x32x96xbf16, #tpu.memory_space<vmem>>, vector<1x32x96xbf16>
    %32 = vector.shape_cast %31 : vector<1x32x96xbf16> to vector<32x96xbf16>
    %cst_15 = arith.constant dense<0.000000e+00> : vector<32x96xf32>
    %33 = tpu.matmul %30, %32, %cst_15 {dimension_numbers = #tpu.dot_dimension_numbers<[1], [0], [0], [1], [0, 0, 1, 1], [], []>} : vector<32x32xbf16>, vector<32x96xbf16>, vector<32x96xf32> -> vector<32x96xf32>
    %34 = vector.extract_strided_slice %33 {offsets = [0, 0], sizes = [32, 32], strides = [1, 1]} : vector<32x96xf32> to vector<32x32xf32>
    %35 = vector.extract_strided_slice %33 {offsets = [0, 32], sizes = [32, 32], strides = [1, 1]} : vector<32x96xf32> to vector<32x32xf32>
    %36 = vector.extract_strided_slice %33 {offsets = [0, 64], sizes = [32, 32], strides = [1, 1]} : vector<32x96xf32> to vector<32x32xf32>
    %37 = vector.shape_cast %34 : vector<32x32xf32> to vector<2x16x4x8xf32>
    %38 = tpu.transpose %37, [0, 2, 1, 3] : vector<2x16x4x8xf32> -> vector<2x4x16x8xf32>
    %39 = vector.shape_cast %38 : vector<2x4x16x8xf32> to vector<8x16x8xf32>
    %40 = arith.truncf %39 : vector<8x16x8xf32> to vector<8x16x8xbf16>
    %41 = vector.shape_cast %35 : vector<32x32xf32> to vector<2x16x4x8xf32>
    %42 = tpu.transpose %41, [0, 2, 1, 3] : vector<2x16x4x8xf32> -> vector<2x4x16x8xf32>
    %43 = vector.shape_cast %42 : vector<2x4x16x8xf32> to vector<8x16x8xf32>
    %44 = arith.truncf %43 : vector<8x16x8xf32> to vector<8x16x8xbf16>
    %45 = vector.shape_cast %36 : vector<32x32xf32> to vector<2x16x4x8xf32>
    %46 = tpu.transpose %45, [0, 2, 1, 3] : vector<2x16x4x8xf32> -> vector<2x4x16x8xf32>
    %47 = vector.shape_cast %46 : vector<2x4x16x8xf32> to vector<8x16x8xf32>
    %48 = arith.truncf %47 : vector<8x16x8xf32> to vector<8x16x8xbf16>
    "tpu.trace_start"() <{level = 10 : i32, message = "hnd,hmd->hnm"}> : () -> ()
    %cst_16 = arith.constant dense<0.000000e+00> : vector<8x16x16xf32>
    %49 = tpu.matmul %40, %44, %cst_16 {dimension_numbers = #tpu.dot_dimension_numbers<[2], [2], [1], [1], [0, 0, 0, 1, 1, 1], [0], [0]>} : vector<8x16x8xbf16>, vector<8x16x8xbf16>, vector<8x16x16xf32> -> vector<8x16x16xf32>
    "tpu.trace_stop"() : () -> ()
    %cst_17 = arith.constant dense<0xFF800000> : vector<8x16xf32>
    %50 = vector.multi_reduction <maximumf>, %49, %cst_17 [2] : vector<8x16x16xf32> to vector<8x16xf32>
    %51 = vector.shape_cast %50 : vector<8x16xf32> to vector<8x16x1xf32>
    %52 = vector.broadcast %51 : vector<8x16x1xf32> to vector<8x16x16xf32>
    %53 = arith.subf %49, %52 : vector<8x16x16xf32>
    %54 = math.exp %53 : vector<8x16x16xf32>
    %cst_18 = arith.constant dense<0.000000e+00> : vector<8x16xf32>
    %55 = vector.multi_reduction <add>, %54, %cst_18 [2] : vector<8x16x16xf32> to vector<8x16xf32>
    %56 = vector.shape_cast %55 : vector<8x16xf32> to vector<8x16x1xf32>
    %57 = tpu.reciprocal %56 {approx = true} : vector<8x16x1xf32> -> vector<8x16x1xf32>
    %58 = vector.broadcast %57 : vector<8x16x1xf32> to vector<8x16x16xf32>
    %59 = arith.mulf %54, %58 : vector<8x16x16xf32>
    %60 = arith.truncf %59 : vector<8x16x16xf32> to vector<8x16x16xbf16>
    "tpu.trace_start"() <{level = 10 : i32, message = "hnm,hmd->hnd"}> : () -> ()
    %cst_19 = arith.constant dense<0.000000e+00> : vector<8x16x8xf32>
    %61 = tpu.matmul %60, %48, %cst_19 {dimension_numbers = #tpu.dot_dimension_numbers<[2], [1], [1], [2], [0, 0, 0, 1, 1, 2], [0], [0]>} : vector<8x16x16xbf16>, vector<8x16x8xbf16>, vector<8x16x8xf32> -> vector<8x16x8xf32>
    "tpu.trace_stop"() : () -> ()
    %62 = vector.shape_cast %61 : vector<8x16x8xf32> to vector<2x4x16x8xf32>
    %63 = tpu.transpose %62, [0, 2, 1, 3] : vector<2x4x16x8xf32> -> vector<2x16x4x8xf32>
    %64 = vector.shape_cast %63 : vector<2x16x4x8xf32> to vector<32x32xf32>
    %65 = arith.truncf %64 : vector<32x32xf32> to vector<32x32xbf16>
    %c0_20 = arith.constant 0 : index
    %c0_21 = arith.constant 0 : index
    %c0_22 = arith.constant 0 : index
    %66 = vector.load %arg9[%c0_20, %c0_21, %c0_22] : memref<1x32x32xbf16, #tpu.memory_space<vmem>>, vector<1x32x32xbf16>
    %67 = vector.shape_cast %66 : vector<1x32x32xbf16> to vector<32x32xbf16>
    %cst_23 = arith.constant dense<0.000000e+00> : vector<32x32xf32>
    %68 = tpu.matmul %65, %67, %cst_23 {dimension_numbers = #tpu.dot_dimension_numbers<[1], [0], [0], [1], [0, 0, 1, 1], [], []>} : vector<32x32xbf16>, vector<32x32xbf16>, vector<32x32xf32> -> vector<32x32xf32>
    %c0_24 = arith.constant 0 : index
    %c0_25 = arith.constant 0 : index
    %c0_26 = arith.constant 0 : index
    %69 = vector.load %arg10[%c0_24, %c0_25, %c0_26] : memref<1x1x32xf32, #tpu.memory_space<vmem>>, vector<1x1x32xf32>
    %70 = vector.shape_cast %69 : vector<1x1x32xf32> to vector<1x32xf32>
    %71 = vector.broadcast %70 : vector<1x32xf32> to vector<32x32xf32>
    %72 = arith.addf %68, %71 : vector<32x32xf32>
    %73 = arith.addf %3, %72 : vector<32x32xf32>
    %c0_27 = arith.constant 0 : index
    %c0_28 = arith.constant 0 : index
    %c0_29 = arith.constant 0 : index
    %74 = vector.load %arg11[%c0_27, %c0_28, %c0_29] : memref<1x1x32xf32, #tpu.memory_space<vmem>>, vector<1x1x32xf32>
    %75 = vector.shape_cast %74 : vector<1x1x32xf32> to vector<1x32xf32>
    %c0_30 = arith.constant 0 : index
    %c0_31 = arith.constant 0 : index
    %c0_32 = arith.constant 0 : index
    %76 = vector.load %arg12[%c0_30, %c0_31, %c0_32] : memref<1x1x32xf32, #tpu.memory_space<vmem>>, vector<1x1x32xf32>
    %77 = vector.shape_cast %76 : vector<1x1x32xf32> to vector<1x32xf32>
    %cst_33 = arith.constant dense<0.000000e+00> : vector<32xf32>
    %78 = vector.multi_reduction <add>, %73, %cst_33 [1] : vector<32x32xf32> to vector<32xf32>
    %79 = vector.shape_cast %78 : vector<32xf32> to vector<32x1xf32>
    %cst_34 = arith.constant 3.200000e+01 : f32
    %80 = vector.broadcast %cst_34 : f32 to vector<32x1xf32>
    %81 = arith.divf %79, %80 : vector<32x1xf32>
    %82 = vector.broadcast %81 : vector<32x1xf32> to vector<32x32xf32>
    %83 = arith.subf %73, %82 : vector<32x32xf32>
    %84 = arith.mulf %83, %83 : vector<32x32xf32>
    %cst_35 = arith.constant dense<0.000000e+00> : vector<32xf32>
    %85 = vector.multi_reduction <add>, %84, %cst_35 [1] : vector<32x32xf32> to vector<32xf32>
    %86 = vector.shape_cast %85 : vector<32xf32> to vector<32x1xf32>
    %cst_36 = arith.constant 3.200000e+01 : f32
    %87 = vector.broadcast %cst_36 : f32 to vector<32x1xf32>
    %88 = arith.divf %86, %87 : vector<32x1xf32>
    %89 = vector.broadcast %81 : vector<32x1xf32> to vector<32x32xf32>
    %90 = arith.subf %73, %89 : vector<32x32xf32>
    %cst_37 = arith.constant 9.99999974E-6 : f32
    %91 = vector.broadcast %cst_37 : f32 to vector<32x1xf32>
    %92 = arith.addf %88, %91 : vector<32x1xf32>
    %93 = math.rsqrt %92 : vector<32x1xf32>
    %94 = vector.broadcast %93 : vector<32x1xf32> to vector<32x32xf32>
    %95 = arith.mulf %90, %94 : vector<32x32xf32>
    %96 = vector.broadcast %75 : vector<1x32xf32> to vector<32x32xf32>
    %97 = arith.mulf %95, %96 : vector<32x32xf32>
    %98 = vector.broadcast %77 : vector<1x32xf32> to vector<32x32xf32>
    %99 = arith.addf %97, %98 : vector<32x32xf32>
    %100 = arith.truncf %99 : vector<32x32xf32> to vector<32x32xbf16>
    %c0_38 = arith.constant 0 : index
    %c0_39 = arith.constant 0 : index
    %c0_40 = arith.constant 0 : index
    %101 = vector.load %arg13[%c0_38, %c0_39, %c0_40] : memref<1x32x64xbf16, #tpu.memory_space<vmem>>, vector<1x32x64xbf16>
    %102 = vector.shape_cast %101 : vector<1x32x64xbf16> to vector<32x64xbf16>
    %cst_41 = arith.constant dense<0.000000e+00> : vector<32x64xf32>
    %103 = tpu.matmul %100, %102, %cst_41 {dimension_numbers = #tpu.dot_dimension_numbers<[1], [0], [0], [1], [0, 0, 1, 1], [], []>} : vector<32x32xbf16>, vector<32x64xbf16>, vector<32x64xf32> -> vector<32x64xf32>
    %c0_42 = arith.constant 0 : index
    %c0_43 = arith.constant 0 : index
    %c0_44 = arith.constant 0 : index
    %104 = vector.load %arg14[%c0_42, %c0_43, %c0_44] : memref<1x1x64xf32, #tpu.memory_space<vmem>>, vector<1x1x64xf32>
    %105 = vector.shape_cast %104 : vector<1x1x64xf32> to vector<1x64xf32>
    %106 = vector.broadcast %105 : vector<1x64xf32> to vector<32x64xf32>
    %107 = arith.addf %103, %106 : vector<32x64xf32>
    %108 = math.tanh %107 : vector<32x64xf32>
    %109 = arith.truncf %108 : vector<32x64xf32> to vector<32x64xbf16>
    %c0_45 = arith.constant 0 : index
    %c0_46 = arith.constant 0 : index
    %c0_47 = arith.constant 0 : index
    %110 = vector.load %arg15[%c0_45, %c0_46, %c0_47] : memref<1x64x32xbf16, #tpu.memory_space<vmem>>, vector<1x64x32xbf16>
    %111 = vector.shape_cast %110 : vector<1x64x32xbf16> to vector<64x32xbf16>
    %cst_48 = arith.constant dense<0.000000e+00> : vector<32x32xf32>
    %112 = tpu.matmul %109, %111, %cst_48 {dimension_numbers = #tpu.dot_dimension_numbers<[1], [0], [0], [1], [0, 0, 1, 1], [], []>} : vector<32x64xbf16>, vector<64x32xbf16>, vector<32x32xf32> -> vector<32x32xf32>
    %c0_49 = arith.constant 0 : index
    %c0_50 = arith.constant 0 : index
    %c0_51 = arith.constant 0 : index
    %113 = vector.load %arg16[%c0_49, %c0_50, %c0_51] : memref<1x1x32xf32, #tpu.memory_space<vmem>>, vector<1x1x32xf32>
    %114 = vector.shape_cast %113 : vector<1x1x32xf32> to vector<1x32xf32>
    %115 = vector.broadcast %114 : vector<1x32xf32> to vector<32x32xf32>
    %116 = arith.addf %112, %115 : vector<32x32xf32>
    %117 = arith.addf %73, %116 : vector<32x32xf32>
    %c0_52 = arith.constant 0 : index
    %c0_53 = arith.constant 0 : index
    %118 = vector.load %arg20[%c0_52, %c0_53] : memref<32x32xf32, #tpu.memory_space<vmem>>, vector<32x32xf32>
    tpu.vector_store %arg20[%c0_52, %c0_53], %117 {strides = array<i32>} : memref<32x32xf32, #tpu.memory_space<vmem>>, vector<32x32xf32>,
    %c1_i32 = arith.constant 1 : i32
    %119 = arith.cmpi eq, %arg1, %c1_i32 : i32
    %120 = arith.extui %119 : i1 to i32
    %c0_i32_54 = arith.constant 0 : i32
    %121 = arith.cmpi ne, %120, %c0_i32_54 : i32
    scf.if %121 {
      %c0_55 = arith.constant 0 : index
      %c0_56 = arith.constant 0 : index
      %122 = vector.load %arg17[%c0_55, %c0_56] : memref<1x32xf32, #tpu.memory_space<vmem>>, vector<1x32xf32>
      %c0_57 = arith.constant 0 : index
      %c0_58 = arith.constant 0 : index
      %123 = vector.load %arg18[%c0_57, %c0_58] : memref<1x32xf32, #tpu.memory_space<vmem>>, vector<1x32xf32>
      %cst_59 = arith.constant dense<0.000000e+00> : vector<32xf32>
      %124 = vector.multi_reduction <add>, %117, %cst_59 [1] : vector<32x32xf32> to vector<32xf32>
      %125 = vector.shape_cast %124 : vector<32xf32> to vector<32x1xf32>
      %cst_60 = arith.constant 3.200000e+01 : f32
      %126 = vector.broadcast %cst_60 : f32 to vector<32x1xf32>
      %127 = arith.divf %125, %126 : vector<32x1xf32>
      %128 = vector.broadcast %127 : vector<32x1xf32> to vector<32x32xf32>
      %129 = arith.subf %117, %128 : vector<32x32xf32>
      %130 = arith.mulf %129, %129 : vector<32x32xf32>
      %cst_61 = arith.constant dense<0.000000e+00> : vector<32xf32>
      %131 = vector.multi_reduction <add>, %130, %cst_61 [1] : vector<32x32xf32> to vector<32xf32>
      %132 = vector.shape_cast %131 : vector<32xf32> to vector<32x1xf32>
      %cst_62 = arith.constant 3.200000e+01 : f32
      %133 = vector.broadcast %cst_62 : f32 to vector<32x1xf32>
      %134 = arith.divf %132, %133 : vector<32x1xf32>
      %135 = vector.broadcast %127 : vector<32x1xf32> to vector<32x32xf32>
      %136 = arith.subf %117, %135 : vector<32x32xf32>
      %cst_63 = arith.constant 9.99999974E-6 : f32
      %137 = vector.broadcast %cst_63 : f32 to vector<32x1xf32>
      %138 = arith.addf %134, %137 : vector<32x1xf32>
      %139 = math.rsqrt %138 : vector<32x1xf32>
      %140 = vector.broadcast %139 : vector<32x1xf32> to vector<32x32xf32>
      %141 = arith.mulf %136, %140 : vector<32x32xf32>
      %142 = vector.broadcast %122 : vector<1x32xf32> to vector<32x32xf32>
      %143 = arith.mulf %141, %142 : vector<32x32xf32>
      %144 = vector.broadcast %123 : vector<1x32xf32> to vector<32x32xf32>
      %145 = arith.addf %143, %144 : vector<32x32xf32>
      %c0_64 = arith.constant 0 : index
      %c0_65 = arith.constant 0 : index
      %c0_66 = arith.constant 0 : index
      %146 = vector.load %arg19[%c0_64, %c0_65, %c0_66] : memref<1x32x32xf32, #tpu.memory_space<vmem>>, vector<1x32x32xf32>
      %147 = vector.shape_cast %146 : vector<1x32x32xf32> to vector<32x32xf32>
      %148 = vector.shape_cast %145 : vector<32x32xf32> to vector<1x32x32xf32>
      tpu.vector_store %arg19[%c0_64, %c0_65, %c0_66], %148 {strides = array<i32>} : memref<1x32x32xf32, #tpu.memory_space<vmem>>, vector<1x32x32xf32>,
    } else {
    }
    return
  }
  func.func @transform_0(%arg0: i32, %arg1: i32) -> (i32, i32, i32) {
    %c0_i32 = arith.constant 0 : i32
    %c0_i32_0 = arith.constant 0 : i32
    %c0_i32_1 = arith.constant 0 : i32
    return %arg0, %c0_i32, %c0_i32_0 : i32, i32, i32
  }
  func.func @transform_1(%arg0: i32, %arg1: i32) -> (i32, i32) {
    %c0_i32 = arith.constant 0 : i32
    %c0_i32_0 = arith.constant 0 : i32
    %c0_i32_1 = arith.constant 0 : i32
    return %c0_i32, %c0_i32_0 : i32, i32
  }
  func.func @transform_2(%arg0: i32, %arg1: i32) -> (i32, i32) {
    %c0_i32 = arith.constant 0 : i32
    %c0_i32_0 = arith.constant 0 : i32
    %c0_i32_1 = arith.constant 0 : i32
    return %c0_i32, %c0_i32_0 : i32, i32
  }
  func.func @transform_3(%arg0: i32, %arg1: i32) -> (i32, i32) {
    %c0_i32 = arith.constant 0 : i32
    %c0_i32_0 = arith.constant 0 : i32
    %c0_i32_1 = arith.constant 0 : i32
    return %c0_i32, %c0_i32_0 : i32, i32
  }
  func.func @transform_4(%arg0: i32, %arg1: i32) -> (i32, i32, i32) {
    %c0_i32 = arith.constant 0 : i32
    %c0_i32_0 = arith.constant 0 : i32
    %c0_i32_1 = arith.constant 0 : i32
    return %arg1, %c0_i32, %c0_i32_0 : i32, i32, i32
  }
  func.func @transform_5(%arg0: i32, %arg1: i32) -> (i32, i32, i32) {
    %c0_i32 = arith.constant 0 : i32
    %c0_i32_0 = arith.constant 0 : i32
    %c0_i32_1 = arith.constant 0 : i32
    return %arg1, %c0_i32, %c0_i32_0 : i32, i32, i32
  }
  func.func @transform_6(%arg0: i32, %arg1: i32) -> (i32, i32, i32) {
    %c0_i32 = arith.constant 0 : i32
    %c0_i32_0 = arith.constant 0 : i32
    %c0_i32_1 = arith.constant 0 : i32
    return %arg1, %c0_i32, %c0_i32_0 : i32, i32, i32
  }
  func.func @transform_7(%arg0: i32, %arg1: i32) -> (i32, i32, i32) {
    %c0_i32 = arith.constant 0 : i32
    %c0_i32_0 = arith.constant 0 : i32
    %c0_i32_1 = arith.constant 0 : i32
    return %arg1, %c0_i32, %c0_i32_0 : i32, i32, i32
  }
  func.func @transform_8(%arg0: i32, %arg1: i32) -> (i32, i32, i32) {
    %c0_i32 = arith.constant 0 : i32
    %c0_i32_0 = arith.constant 0 : i32
    %c0_i32_1 = arith.constant 0 : i32
    return %arg1, %c0_i32, %c0_i32_0 : i32, i32, i32
  }
  func.func @transform_9(%arg0: i32, %arg1: i32) -> (i32, i32, i32) {
    %c0_i32 = arith.constant 0 : i32
    %c0_i32_0 = arith.constant 0 : i32
    %c0_i32_1 = arith.constant 0 : i32
    return %arg1, %c0_i32, %c0_i32_0 : i32, i32, i32
  }
  func.func @transform_10(%arg0: i32, %arg1: i32) -> (i32, i32, i32) {
    %c0_i32 = arith.constant 0 : i32
    %c0_i32_0 = arith.constant 0 : i32
    %c0_i32_1 = arith.constant 0 : i32
    return %arg1, %c0_i32, %c0_i32_0 : i32, i32, i32
  }
  func.func @transform_11(%arg0: i32, %arg1: i32) -> (i32, i32, i32) {
    %c0_i32 = arith.constant 0 : i32
    %c0_i32_0 = arith.constant 0 : i32
    %c0_i32_1 = arith.constant 0 : i32
    return %arg1, %c0_i32, %c0_i32_0 : i32, i32, i32
  }
  func.func @transform_12(%arg0: i32, %arg1: i32) -> (i32, i32, i32) {
    %c0_i32 = arith.constant 0 : i32
    %c0_i32_0 = arith.constant 0 : i32
    %c0_i32_1 = arith.constant 0 : i32
    return %arg1, %c0_i32, %c0_i32_0 : i32, i32, i32
  }
  func.func @transform_13(%arg0: i32, %arg1: i32) -> (i32, i32, i32) {
    %c0_i32 = arith.constant 0 : i32
    %c0_i32_0 = arith.constant 0 : i32
    %c0_i32_1 = arith.constant 0 : i32
    return %arg1, %c0_i32, %c0_i32_0 : i32, i32, i32
  }
  func.func @transform_14(%arg0: i32, %arg1: i32) -> (i32, i32, i32) {
    %c0_i32 = arith.constant 0 : i32
    %c0_i32_0 = arith.constant 0 : i32
    %c0_i32_1 = arith.constant 0 : i32
    return %arg1, %c0_i32, %c0_i32_0 : i32, i32, i32
  }
  func.func @transform_15(%arg0: i32, %arg1: i32) -> (i32, i32) {
    %c0_i32 = arith.constant 0 : i32
    %c0_i32_0 = arith.constant 0 : i32
    %c0_i32_1 = arith.constant 0 : i32
    return %c0_i32, %c0_i32_0 : i32, i32
  }
  func.func @transform_16(%arg0: i32, %arg1: i32) -> (i32, i32) {
    %c0_i32 = arith.constant 0 : i32
    %c0_i32_0 = arith.constant 0 : i32
    %c0_i32_1 = arith.constant 0 : i32
    return %c0_i32, %c0_i32_0 : i32, i32
  }
  func.func @transform_17(%arg0: i32, %arg1: i32) -> (i32, i32, i32) {
    %c0_i32 = arith.constant 0 : i32
    %c0_i32_0 = arith.constant 0 : i32
    %c0_i32_1 = arith.constant 0 : i32
    return %arg0, %c0_i32, %c0_i32_0 : i32, i32, i32
  }
}

</mosaic_0001>

<bundles_post_ra>
// kernel: tpu_custom_call.1
= control target key start
LH: loop header
LB: loop body
LE: loop exit
PB: predicated region body
PF: predicated region fallthrough
CT: control target
= control target key end

     0   :  { %s6839_s0 = inlined_call_operand.vmem [shape: bf16[1,32,64], index: 0, kind: input, shape index: {}]   ;;  %s6840_s1 = inlined_call_operand.vmem [shape: bf16[64,32], index: 1, kind: input, shape index: {}]   ;;  %s6841_s2 = inlined_call_operand.hbm [shape: f32[1,32], index: 2, kind: input, shape index: {}]   ;;  %s6842_s3 = inlined_call_operand.vmem [shape: f32[32,32], index: 3, kind: input, shape index: {}]   ;;  %s6843_s4 = inlined_call_operand.vmem [shape: f32[2,1,32], index: 4, kind: input, shape index: {}]   ;;  %s6844_s5 = inlined_call_operand.vmem [shape: f32[2,1,32], index: 5, kind: input, shape index: {}]   ;;  %s6845_s6 = inlined_call_operand.vmem [shape: bf16[2,32,96], index: 6, kind: input, shape index: {}]   ;;  %s6846_s7 = inlined_call_operand.vmem [shape: bf16[2,32,32], index: 7, kind: input, shape index: {}]   ;;  %s6847_s8 = inlined_call_operand.vmem [shape: f32[2,1,32], index: 8, kind: input, shape index: {}]   ;;  %s6848_s9 = inlined_call_operand.vmem [shape: f32[2,1,32], index: 9, kind: input, shape index: {}]   ;;  %s6849_s10 = inlined_call_operand.vmem [shape: f32[2,1,32], index: 10, kind: input, shape index: {}]   ;;  %s6850_s11 = inlined_call_operand.hbm [shape: bf16[2,32,64], index: 11, kind: input, shape index: {}]   ;;  %s6851_s12 = inlined_call_operand.vmem [shape: f32[2,1,64], index: 12, kind: input, shape index: {}]   ;;  %s6852_s13 = inlined_call_operand.vmem [shape: bf16[2,64,32], index: 13, kind: input, shape index: {}]   ;;  %s6853_s14 = inlined_call_operand.hbm [shape: f32[2,1,32], index: 14, kind: input, shape index: {}]   ;;  %s6854_s15 = inlined_call_operand.vmem [shape: f32[1,32], index: 15, kind: input, shape index: {}]   ;;  %s6855_s16 = inlined_call_operand.vmem [shape: f32[1,32], index: 16, kind: input, shape index: {}]   ;;  %s6856_s17 = inlined_call_operand.hbm [shape: f32[1,32,32], index: 17, kind: output, shape index: {}]  }
   0x1   :  { %6881 = sst [smem:[#allocation27_spill]] %s6839_s0 }
   0x2   :  { %6882 = sst [smem:[#allocation28_spill]] %s6840_s1 }
   0x3   :  { %6883 = sst [smem:[#allocation29_spill]] %s6841_s2 }
   0x4   :  { %6884 = sst [smem:[#allocation30_spill]] %s6842_s3 }
   0x5   :  { %6885 = sst [smem:[#allocation31_spill]] %s6845_s6 }
   0x6   :  { %6886 = sst [smem:[#allocation32_spill]] %s6850_s11 }
   0x7   :  { %6887 = sst [smem:[#allocation33_spill]] %s6852_s13 }
   0x8   :  { %6888 = sst [smem:[#allocation34_spill]] %s6853_s14 }
   0x9   :  { %6889 = sst [smem:[#allocation35_spill]] %s6854_s15 }
   0xa   :  { %6890 = sst [smem:[#allocation36_spill]] %s6855_s16 }
   0xb   :  { %6891 = sst [smem:[#allocation37_spill]] %s6856_s17 }
   0xc   :  { %22 = vsyncpa [#allocation4], 0 }
   0xd   :  { %23 = vsyncpa [#allocation7], 0 }
   0xe   :  { %25 = vsyncpa [#allocation7 + $0x1], 0 }
   0xf   :  { %26 = vsyncpa [#allocation5], 0  ;;  %s5067_s24 = smov 0   ;;  %s5069_s25 = smov 0  }
  0x10   :  { %s5071_s26 = smov 0   ;;  %s5073_s27 = smov 0  }
  0x11   :  { %s5075_s28 = smov 0   ;;  %s5077_s29 = smov 0  }
  0x12 LB: > { %6892 = sst [smem:[#allocation13_spill]] %s4943_s25  ;;  %s41_s0 = sadd.s32 1, %s4955_s28  ;;  %s4959_s29 = sphi %s5077_s29, %s32_s29   ;;  %s4955_s28 = sphi %s5075_s28, %s6973_s28   ;;  %s4951_s27 = sphi %s5073_s27, %s6972_s27   ;;  %s4947_s26 = sphi %s5071_s26, %s6971_s26   ;;  %s4943_s25 = sphi %s5069_s25, %s6970_s25   ;;  %s4939_s24 = sphi %s5067_s24, %s6969_s24  }
  0x13   : > { %6893 = sst [smem:[#allocation14_spill]] %s4947_s26  ;;  %s322_s30 = sadd.s32 1, %s4947_s26 }
  0x14   : > { %6894 = sst [smem:[#allocation15_spill]] %s4955_s28  ;;  %p42_p0 = scmp.ge.s32.totalorder %s41_s0, 2 }
  0x15   : > { %6895 = sst [smem:[#allocation16_spill]] %s4959_s29  ;;  %p329_p1 = scmp.ne.s32.totalorder %s4947_s26, %s4943_s25 }
  0x16   : > { %p330_p2 = scmp.eq.s32.totalorder %s4959_s29, 0  ;;  %s6975_s0 = smov (%p42_p0, %s41_s0), 0 }
  0x17   : > { %6896 = sst [smem:[#allocation17_spill]] %s6975_s0  ;;  %p4463_p4 = scmp.lt.s32.totalorder %s4959_s29, 2 }
  0x18   : > { %p5104_p3 = por %p330_p2, %p329_p1  ;;  %s319_s19 = ssub.s32 %s4955_s28, %s6975_s0 }
  0x19   : > { %s583_s1 = sand.u32 1, %s4959_s29   ;;  %p320_p5 = scmp.eq.s32.totalorder %s319_s19, 0 }
  0x1a   : > { %s6861_s20 = sand.u32 1, %s4947_s26   ;;  %s4413_s21 = sshll.u32 %s4955_s28, 4 }
  0x1b   : > { %s5115_s22 = scalar_select %p320_p5, %s4947_s26, %s322_s30  }
  0x1c   : > { %s4305_s23 = sshll.u32 %s6861_s20, 4  ;;  %s6899_s11 = sld [smem:[#allocation32_spill]] }
  0x1d   : > { %6898 = sst [smem:[#allocation18_spill]] %s5115_s22  ;;  %s587_s0 = scalar_lea.vmem [#allocation6], %s4305_s23 }
  0x1e   : > { %s595_s13 = sshll.u32 %s587_s0, 4  ;;  %p5126_p6 = pnand %p4463_p4, %p5104_p3  ;;  %s596_s13 = int_to_ptr.vmem [resolvable:$true] %s595_s13 }
  0x1f   : > { %s584_s30 = scalar_lea.sflag [#allocation7], %s583_s1  ;;  %s4961_s22 = smov 64  }
  0x20   : > { %s4962_s20 = smov 4   ;;  %s5133_s16 = sadd.s32 4294967295, %s4959_s29  }
  0x21   : > { %p335_p7 = scmp.ne.s32.totalorder %s4943_s25, %s4939_s24  ;;  %p336_p8 = scmp.eq.s32.totalorder %s5133_s16, 0 }
  0x22   : > { %s592_s15 = scalar_lea.hbm %s6899_s11, %s4413_s21  ;;  %p4301_p9 = scmp.ge.s32.totalorder %s4959_s29, 1 }
  0x23   : > { %s593_s3 = sshll.u32 %s592_s15, 4  ;;  %p492_p10 = scmp.lt.s32.totalorder %s4959_s29, 3  ;;  %s594_s3 = int_to_ptr.hbm [resolvable:$true] %s593_s3 }
  0x24   : > { %4458 = dma.hbm_to_vmem [thread:$0]  (!%p5126_p6), %s594_s3, 256, %s596_s13, %s584_s30, %s4961_s22, %s4961_s22, %s4962_s20  }
  0x25   : > { %p5142_p11 = por %p336_p8, %p335_p7  ;;  %p5146_p12 = pnand %p4301_p9, %p492_p10 }
  0x26   : > { %s6903_s2 = sld [smem:[#allocation29_spill]]  ;;  %s4963_s24 = smov [#allocation3]  }
  0x27   : > { %p4451_p13 = pneg %p5146_p12  ;;  %s517_s18 = sshll.u32 %s4963_s24, 4  ;;  %s518_s18 = int_to_ptr.vmem [resolvable:$true] %s517_s18 }
  0x28   : > { %s6904_s14 = sld [smem:[#allocation34_spill]]  ;;  %s6905_s23 = sand.u32 1, %s4947_s26  }
  0x29   : > { %p4452_p0 = pnand %p4451_p13, %p336_p8  ;;  %s622_s11 = scalar_lea.vmem [#allocation8], %s6905_s23 }
  0x2a   : > { %s629_s29 = sshll.u32 %s622_s11, 4  ;;  %s630_s29 = int_to_ptr.vmem [resolvable:$true] %s629_s29 }
  0x2c   : > { %s515_s0 = sshll.u32 %s6903_s2, 4  ;;  %638 = sbr.rel (%p5146_p12) target bundleno = 2702 (0xa8e), region = 88  ;;  %s516_s0 = int_to_ptr.hbm [resolvable:$true] %s515_s0 }
  0x2d   : > { %4454 = dma.hbm_to_vmem [thread:$0]  (!%p4452_p0), %s516_s0, 16, %s518_s18, [#allocation4]  }
  0x2e   : > { %s625_s21 = scalar_lea.hbm %s6904_s14, %s4955_s28 }
  0x2f   : > { %s627_s22 = sshll.u32 %s625_s21, 4  ;;  %s628_s22 = int_to_ptr.hbm [resolvable:$true] %s627_s22 }
  0x30   : > { %4461 = dma.hbm_to_vmem [thread:$0]  (!%p5126_p6), %s628_s22, 16, %s630_s29, %s584_s30  }
  0x31   : > { %4926 = dma.done.wait (%p336_p8), [#allocation4], 16  }
  0x32   : > { %4928 = vsyncadd (%p336_p8), [#allocation4], 4294967280  ;;  %s645_s3 = sand.u32 1, %s5133_s16   ;;  %s647_s13 = sand.u32 1, %s4943_s25  }
  0x33   : > { %s5173_s11 = sshll.u32 %s647_s13, 4  ;;  %s646_s0 = scalar_lea.sflag [#allocation7], %s645_s3 }
  0x34   : > { %4930 = dma.done.wait (%p5142_p11), %s646_s0, 272  }
  0x35   : > { %4932 = vsyncadd (%p5142_p11), %s646_s0, 4294967024  ;;  %p752_p1 = scmp.lt.s32.totalorder %s4951_s27, 1  ;;  %s6906_s6 = sld [smem:[#allocation31_spill]] }
  0x36   : > { %s6907_s26 = sld [smem:[#allocation33_spill]]  ;;  %s5225_s19 = scalar_lea.vmem [#allocation8], %s647_s13 }
  0x37   : > { %s5182_s29 = scalar_select %p752_p1, %s4951_s27, 1 }
  0x38   : > { %p4317_p2 = scmp.ne.s32.totalorder %s4951_s27, 0 }
  0x39   : > { %s4414_s20 = sshll.u32 %s5182_s29, 4  ;;  %s773_s18 = scalar_lea.vmem %s6848_s9, %s5182_s29 }
  0x3a   : > { %s5205_s2 = scalar_lea.vmem %s6846_s7, %s4414_s20  ;;  %s776_s28 = scalar_lea.vmem %s6849_s10, %s5182_s29 }
  0x3b   : > { %s5200_s30 = scalar_lea.vmem %s6906_s6, %s4414_s20  ;;  %s779_s23 = scalar_lea.vmem %s6851_s12, %s5182_s29 }
  0x3c   : > { %s4416_s3 = sshll.u32 %s5182_s29, 5  ;;  %789 = sbr.rel (%p4317_p2) target bundleno = 223 (0xdf), region = 104 }
  0x3d   : > { %s5223_s25 = scalar_lea.vmem %s6907_s26, %s4416_s3  ;;  %s6908_s20 = sld [smem:[#allocation28_spill]] (!%p4317_p2) }
  0x3e   : > { %s6909_s3 = sld [smem:[#allocation27_spill]] (!%p4317_p2) }
  0x3f   : > { %s6910_s17 = sld [smem:[#allocation30_spill]] (!%p4317_p2) }
  0x41   : > { %vm840_vm0 = vcmask 523264   ;;  %v4531_v6 = vld [vmem:[#allocation3] ss:$0 sm:$0xff]  ;;  %vm874_vm1 = vcmask 261120  }
  0x43   : > { %v4422_v0 = vld [vmem:[%s6908_s20 + $0x18] sm:$0xff]  ;;  %v4421_v1 = vld [vmem:[%s6908_s20 + $0x10] sm:$0xff]  ;;  %v4420_v2 = vld [vmem:[%s6908_s20 + $0x8] sm:$0xff] }
  0x44   : > { %851 = vmatpush.bf16.msra.mxu0 %v4422_v0  ;;  %4433 = vmatpush.bf16.msra.mxu1 %v4422_v0  ;;  %v4419_v3 = vld [vmem:[%s6908_s20] sm:$0xff]  ;;  %v4418_v5 = vld [vmem:[%s6909_s3 + $0x8] sm:$0xff] }
  0x45   : > { %v4417_v4 = vld [vmem:[%s6909_s3] sm:$0xff]  ;;  %v868_v10 = vld [vmem:[%s6910_s17 + $0x10] sm:$0xff]  ;;  %v867_v16 = vld [vmem:[%s6910_s17 + $0x8] sm:$0xff] }
  0x46   : > { %v866_v8 = vld [vmem:[%s6910_s17] sm:$0xff]  ;;  %v869_v18 = vld [vmem:[%s6910_s17 + $0x18] sm:$0xff] }
  0x48   : > { %852 = vmatpush.bf16.msra.mxu0 %v4421_v1  ;;  %4434 = vmatpush.bf16.msra.mxu1 %v4421_v1 }
  0x4c   : > { %853 = vmatpush.bf16.msra.mxu0 %v4420_v2  ;;  %4435 = vmatpush.bf16.msra.mxu1 %v4420_v2 }
  0x50   : > { %854 = vmatpush.bf16.msra.mxu0 %v4419_v3  ;;  %4436 = vmatpush.bf16.msra.mxu1 %v4419_v3 }
  0x53   : > { %4342 = vmatmul.msk.bf16.vlgmr.msra.gmra.mxu0 %vm840_vm0, %v4417_v4  ;;  %4343 = vmatmul.msk.bf16.vlgmr.msra.gmra.mxu1 %vm840_vm0, %v4418_v5 }
  0xd0   : > { %v856_v7 = vpop.f32.mrf.mxu0  ;;  %v861_v9 = vpop.f32.mrf.mxu1 }
  0xd1   : > { %v857_v11 = vadd.f32 %v4531_v6, %v856_v7  ;;  %v862_v12 = vadd.f32 %v4531_v6, %v861_v9 }
  0xd3   : > { %v870_v13 = vadd.f32 %v866_v8, %v857_v11  ;;  %v872_v14 = vadd.f32 %v868_v10, %v862_v12 }
  0xd5   : > { %875 = vst.msk [vmem:[#allocation2] sm:$0xff] %vm874_vm1, %v870_v13 }
  0xd6   : > { %877 = vst.msk [vmem:[#allocation2 + $0x10] sm:$0xff] %vm874_vm1, %v872_v14 }
  0xd8   : > { %v858_v15 = vpop.f32.mrf.mxu0  ;;  %v863_v17 = vpop.f32.mrf.mxu1 }
  0xd9   : > { %v859_v19 = vadd.f32 %v4531_v6, %v858_v15  ;;  %v864_v20 = vadd.f32 %v4531_v6, %v863_v17 }
  0xdb   : > { %v871_v21 = vadd.f32 %v867_v16, %v859_v19  ;;  %v873_v22 = vadd.f32 %v869_v18, %v864_v20 }
  0xdd   : > { %876 = vst.msk [vmem:[#allocation2 + $0x8] sm:$0xff] %vm874_vm1, %v871_v21 }
  0xde   : > { %878 = vst.msk [vmem:[#allocation2 + $0x18] sm:$0xff] %vm874_vm1, %v873_v22 }
  0xdf PF: > { %v881_v23 = vld [vmem:[#allocation2 + $0x10] sm:$0xff]  ;;  %vm885_vm2 = vcmask 261120   ;;  %v879_v24 = vld [vmem:[#allocation2] sm:$0xff]  ;;  %v4964_v31 = vmov 32.0   ;;  %v4424_v58 = vld [vmem:[%s5200_s30 + $0x8] sm:$0xff]  ;;  %s6912_s14 = scalar_lea.vmem %s6843_s4, %s5182_s29  ;;  %s6913_s6 = scalar_lea.vmem %s6844_s5, %s5182_s29  ;;  %vm1079_vm0 = vcmask 1047556  }
  0xe0   : > { %v892_v25 = vsel %vm885_vm2, %v881_v23, 0.0  ;;  %v886_v26 = vsel %vm885_vm2, %v879_v24, 0.0  ;;  %4679 = vrcp.f32 %v4964_v31  ;;  %1025 = vmatpush.bf16.msra.mxu0 %v4424_v58  ;;  %4437 = vmatpush.bf16.msra.mxu1 %v4424_v58  ;;  %v4423_v63 = vld [vmem:[%s5200_s30] sm:$0xff]  ;;  %s4965_s26 = smov 104   ;;  %s4966_s13 = smov 112   ;;  %vm2553_vm1 = vcmask 64512  }
  0xe1   : > { %893 = vadd.xlane.f32.xlu1 %v892_v25  ;;  %887 = vadd.xlane.f32.xlu0 %v886_v26  ;;  %s4967_s15 = smov 120   ;;  %s4968_s21 = smov 96  }
  0xe2   : > { %s4971_s22 = smov 64   ;;  %s4972_s30 = smov 16  }
  0xe3   : > { %s4973_s0 = smov 24   ;;  %s6960_s1 = scalar_lea.vmem %s6847_s8, %s5182_s29 }
  0xe4   : > { %v880_v28 = vld [vmem:[#allocation2 + $0x8] sm:$0xff]  ;;  %1026 = vmatpush.bf16.msra.mxu0 %v4423_v63  ;;  %4438 = vmatpush.bf16.msra.mxu1 %v4423_v63  ;;  %p4408_p3 = scmp.ne.s32.totalorder %s4951_s27, 1 }
  0xe5   : > { %v882_v27 = vld [vmem:[#allocation2 + $0x18] sm:$0xff]  ;;  %v889_v30 = vsel %vm885_vm2, %v880_v28, 0.0  ;;  %s6965_s29 = sld [smem:[#allocation35_spill]] (!%p4408_p3) }
  0xe6   : > { %v895_v29 = vsel %vm885_vm2, %v882_v27, 0.0  ;;  %v4680_v32 = vpop.eup %4679 }
  0xe7   : > { %v899_v33 = vmul.f32 32.0, %v4680_v32  ;;  %vm903_vm3 = vweird.f32 %v4680_v32 }
  0xe9   : > { %896 = vadd.xlane.f32.xlu1 %v895_v29  ;;  %890 = vadd.xlane.f32.xlu0 %v889_v30  ;;  %v900_v34 = vsub.f32 1.0, %v899_v33  ;;  %v4672_v33 = vld [vmem:[%s6912_s14] ss:$0 sm:$0xff]  ;;  %s4974_s14 = smov 8  }
  0xeb   : > { %v901_v35 = vmul.f32 %v4680_v32, %v900_v34 }
  0xed   : > { %v902_v36 = vadd.f32 %v4680_v32, %v901_v35 }
  0xef   : > { %v5262_v37 = vsel %vm903_vm3, %v4680_v32, %v902_v36  ;;  %vm2784_vm3 = vcmask 130048  }
  0xf0   : > { %6911 = vst [vmem:[#allocation19_spill] sm:$0xff] %v5262_v37 }
 0x154   : > { %v894_v38 = vpop.xlane.xlu1 %893  ;;  %v888_v39 = vpop.xlane.xlu0 %887 }
 0x155   : > { %v907_v40 = vmul.f32 %v5262_v37, %v894_v38  ;;  %v905_v41 = vmul.f32 %v5262_v37, %v888_v39 }
 0x157   : > { %v5266_v42 = vsub.f32 %v881_v23, %v907_v40  ;;  %v5268_v43 = vsub.f32 %v879_v24, %v905_v41  ;;  %v4673_v41 = vld [vmem:[%s6913_s6] ss:$0 sm:$0xff]  ;;  %s6962_s6 = scalar_lea.vmem [#allocation6], %s5173_s11 }
 0x159   : > { %v915_v44 = vmul.f32 %v5266_v42, %v5266_v42  ;;  %v913_v45 = vmul.f32 %v5268_v43, %v5268_v43 }
 0x15b   : > { %v923_v46 = vsel %vm885_vm2, %v915_v44, 0.0  ;;  %v917_v47 = vsel %vm885_vm2, %v913_v45, 0.0 }
 0x15c   : > { %v897_v48 = vpop.xlane.xlu1 %896  ;;  %924 = vadd.xlane.f32.xlu0 %v923_v46  ;;  %918 = vadd.xlane.f32.xlu2 %v917_v47  ;;  %v891_v49 = vpop.xlane.xlu0 %890 }
 0x15d   : > { %v908_v50 = vmul.f32 %v5262_v37, %v897_v48  ;;  %v906_v51 = vmul.f32 %v5262_v37, %v891_v49 }
 0x15f   : > { %v5278_v52 = vsub.f32 %v882_v27, %v908_v50  ;;  %v5280_v53 = vsub.f32 %v880_v28, %v906_v51 }
 0x161   : > { %v916_v54 = vmul.f32 %v5278_v52, %v5278_v52  ;;  %v914_v55 = vmul.f32 %v5280_v53, %v5280_v53 }
 0x163   : > { %v926_v56 = vsel %vm885_vm2, %v916_v54, 0.0  ;;  %v920_v57 = vsel %vm885_vm2, %v914_v55, 0.0 }
 0x164   : > { %927 = vadd.xlane.f32.xlu1 %v926_v56  ;;  %921 = vadd.xlane.f32.xlu2 %v920_v57 }
 0x1cf   : > { %v919_v59 = vpop.xlane.xlu2 %918  ;;  %v925_v60 = vpop.xlane.xlu0 %924 }
 0x1d0   : > { %v929_v61 = vmul.f32 %v919_v59, %v5262_v37  ;;  %v931_v62 = vmul.f32 %v925_v60, %v5262_v37 }
 0x1d2   : > { %v933_v0 = vadd.f32 1e-05, %v929_v61  ;;  %v935_v1 = vadd.f32 1e-05, %v931_v62 }
 0x1d4   : > { %4681 = vrsqrt.f32 %v933_v0  ;;  %vm963_vm4 = vweird.f32 %v935_v1  ;;  %vm943_vm7 = vweird.f32 %v933_v0 }
 0x1d5   : > { %4683 = vrsqrt.f32 %v935_v1 }
 0x1d7   : > { %v928_v2 = vpop.xlane.xlu1 %927  ;;  %v922_v3 = vpop.xlane.xlu2 %921 }
 0x1d8   : > { %v932_v4 = vmul.f32 %v928_v2, %v5262_v37  ;;  %v930_v5 = vmul.f32 %v922_v3, %v5262_v37 }
 0x1da   : > { %v4682_v6 = vpop.eup %4681  ;;  %v936_v7 = vadd.f32 1e-05, %v932_v4  ;;  %v934_v8 = vadd.f32 1e-05, %v930_v5 }
 0x1db   : > { %v4684_v9 = vpop.eup %4683  ;;  %v938_v10 = vmul.f32 %v4682_v6, %v933_v0  ;;  %vm944_vm6 = vweird.f32 %v4682_v6 }
 0x1dc   : > { %v958_v11 = vmul.f32 %v4684_v9, %v935_v1  ;;  %4685 = vrsqrt.f32 %v936_v7  ;;  %vm964_vm5 = vweird.f32 %v4684_v9  ;;  %vm945_vm9 = vmor %vm943_vm7, %vm944_vm6  ;;  %vm973_vm10 = vweird.f32 %v936_v7 }
 0x1dd   : > { %v939_v12 = vmul.f32 %v4682_v6, %v938_v10  ;;  %4687 = vrsqrt.f32 %v934_v8  ;;  %vm965_vm8 = vmor %vm963_vm4, %vm964_vm5  ;;  %vm953_vm14 = vweird.f32 %v934_v8  ;;  %v4969_v1 = vmov 1983009808  }
 0x1de   : > { %v959_v13 = vmul.f32 %v4684_v9, %v958_v11  ;;  %v1084_v2 = vunpack.c.l.s4 %v4969_v1  ;;  %vm3697_vm4 = vcmask 195584  }
 0x1df   : > { %v940_v14 = vmul.f32 0.5, %v939_v12 }
 0x1e0   : > { %v960_v15 = vmul.f32 0.5, %v959_v13 }
 0x1e1   : > { %v941_v16 = vsub.f32 1.5, %v940_v14  ;;  %v5347_v14 = vunpack.c.0.s8 %v1084_v2 }
 0x1e2   : > { %v4686_v17 = vpop.eup %4685  ;;  %v961_v18 = vsub.f32 1.5, %v960_v15 }
 0x1e3   : > { %v4688_v19 = vpop.eup %4687  ;;  %v968_v20 = vmul.f32 %v4686_v17, %v936_v7  ;;  %v942_v21 = vmul.f32 %v4682_v6, %v941_v16  ;;  %vm974_vm11 = vweird.f32 %v4686_v17 }
 0x1e4   : > { %v962_v22 = vmul.f32 %v4684_v9, %v961_v18  ;;  %v948_v23 = vmul.f32 %v4688_v19, %v934_v8  ;;  %vm954_vm12 = vweird.f32 %v4688_v19  ;;  %vm975_vm13 = vmor %vm973_vm10, %vm974_vm11  ;;  %v4970_v8 = vmov 1934713408  }
 0x1e5   : > { %v969_v24 = vmul.f32 %v4686_v17, %v968_v20  ;;  %v946_v28 = vsel %vm945_vm9, %v4682_v6, %v942_v21  ;;  %vm955_vm15 = vmor %vm953_vm14, %vm954_vm12 }
 0x1e6   : > { %v949_v25 = vmul.f32 %v4688_v19, %v948_v23  ;;  %v966_v26 = vsel %vm965_vm8, %v4684_v9, %v962_v22  ;;  %v977_v34 = vmul.f32 %v946_v28, %v5268_v43  ;;  %v1108_v9 = vunpack.c.l.s4 %v4970_v8 }
 0x1e7   : > { %v970_v27 = vmul.f32 0.5, %v969_v24  ;;  %v979_v31 = vmul.f32 %v966_v26, %v5266_v42 }
 0x1e8   : > { %v950_v29 = vmul.f32 0.5, %v949_v25  ;;  %v984_v45 = vmul.f32 %v4672_v33, %v977_v34 }
 0x1e9   : > { %v971_v30 = vsub.f32 1.5, %v970_v27  ;;  %v986_v42 = vmul.f32 %v4672_v33, %v979_v31 }
 0x1ea   : > { %v951_v32 = vsub.f32 1.5, %v950_v29  ;;  %v991_v49 = vadd.f32 %v4673_v41, %v984_v45 }
 0x1eb   : > { %v972_v35 = vmul.f32 %v4686_v17, %v971_v30  ;;  %v993_v47 = vadd.f32 %v4673_v41, %v986_v42 }
 0x1ec   : > { %v952_v36 = vmul.f32 %v4688_v19, %v951_v32 }
 0x1ed   : > { %v976_v38 = vsel %vm975_vm13, %v4686_v17, %v972_v35 }
 0x1ee   : > { %v980_v39 = vmul.f32 %v976_v38, %v5278_v52  ;;  %v956_v40 = vsel %vm955_vm15, %v4688_v19, %v952_v36  ;;  %v5356_v19 = vunpack.c.0.s8 %v1108_v9 }
 0x1ef   : > { %v978_v44 = vmul.f32 %v956_v40, %v5280_v53 }
 0x1f0   : > { %v987_v46 = vmul.f32 %v4672_v33, %v980_v39 }
 0x1f1   : > { %v985_v43 = vmul.f32 %v4672_v33, %v978_v44 }
 0x1f2   : > { %v994_v48 = vadd.f32 %v4673_v41, %v987_v46 }
 0x1f3   : > { %v992_v50 = vadd.f32 %v4673_v41, %v985_v43 }
 0x1f4   : > { %v996_v51 = vpack.c.bf16 %v994_v48, %v993_v47 }
 0x1f5   : > { %v995_v54 = vpack.c.bf16 %v992_v50, %v991_v49 }
 0x1f6   : > { %4353 = vmatmul.msk.bf16.vlgmr.msra.gmra.mxu1 %vm885_vm2, %v996_v51 }
 0x1f7   : > { %4352 = vmatmul.msk.bf16.vlgmr.msra.gmra.mxu0 %vm885_vm2, %v995_v54 }
 0x273   : > { %v5312_v55 = vpop.f32.mrf.mxu1 }
 0x274   : > { %v5310_v52 = vpop.f32.mrf.mxu0 }
 0x275   : > { %v1081_v18 = vrot.slane %v5310_v52, 4 }
 0x27b   : > { %v5323_v57 = vpop.f32.mrf.mxu1 }
 0x27c   : > { %v5314_v56 = vpop.f32.mrf.mxu0  ;;  %v5327_v58 = vpack.i.bf16 %v5323_v57, %v5312_v55 }
 0x27d   : > { %v5318_v53 = vpack.i.bf16 %v5314_v56, %v5310_v52  ;;  %v1137_v20 = vrot.slane %v5314_v56, 4 }
 0x27e   : > { %6914 = vst [vmem:[#allocation20_spill] sm:$0xff] %v5327_v58 }
 0x27f   : > { %4543 = vrot.lane.b32.xlu1 %v5318_v53, %s4965_s26  ;;  %4538 = vrot.lane.b32.xlu0 %v5318_v53, %s4966_s13 }
 0x280   : > { %4533 = vrot.lane.b32.xlu2 %v5318_v53, %s4967_s15 }
 0x287   : > { %4563 = vrot.lane.b32.xlu1 %v5318_v53, %s4968_s21  ;;  %4553 = vrot.lane.b32.xlu0 %v5327_v58, %s4966_s13 }
 0x288   : > { %4548 = vrot.lane.b32.xlu2 %v5327_v58, %s4967_s15 }
 0x290   : > { %4558 = vrot.lane.b32.xlu2 %v5327_v58, %s4965_s26  ;;  %s6963_s26 = smov %s6962_s6 }
 0x2da   : > { %v4534_v59 = vpop.permute.xlu2 %4533 }
 0x2db   : > { %v4536_v60 = vunpack.i.h.bf16 %v4534_v59  ;;  %v4535_v61 = vunpack.i.l.bf16 %v4534_v59  ;;  %4568 = vrot.lane.b32.xlu0 %v4534_v59, %s4968_s21 }
 0x2dd   : > { %v1149_v22 = vrot.slane %v4536_v60, 4  ;;  %v1093_v23 = vrot.slane %v4535_v61, 4 }
 0x2e2   : > { %v5335_v62 = vpop.permute.xlu2 %4548 }
 0x2e3   : > { %6915 = vst [vmem:[#allocation21_spill] sm:$0xff] %v5335_v62  ;;  %v4551_v63 = vunpack.i.h.bf16 %v5335_v62  ;;  %v4550_v0 = vunpack.i.l.bf16 %v5335_v62  ;;  %4583 = vrot.lane.b32.xlu0 %v5327_v58, %s4968_s21 }
 0x2e5   : > { %v1261_v4 = vrot.slane %v4551_v63, 4  ;;  %v1205_v5 = vrot.slane %v4550_v0, 4 }
 0x2ea   : > { %v5341_v3 = vpop.permute.xlu2 %4558 }
 0x2eb   : > { %6916 = vst [vmem:[#allocation22_spill] sm:$0xff] %v5341_v3  ;;  %v4561_v6 = vunpack.i.h.bf16 %v5341_v3  ;;  %v4560_v7 = vunpack.i.l.bf16 %v5341_v3  ;;  %4598 = vrot.lane.b32.xlu0 %v5341_v3, %s4968_s21 }
 0x2ed   : > { %v1259_v10 = vrot.slane %v4561_v6, 4  ;;  %v1203_v11 = vrot.slane %v4560_v7, 4  ;;  %v1206_v12 = vsel %vm1079_vm0, %v4560_v7, %v1205_v5  ;;  %v1262_v13 = vsel %vm1079_vm0, %v4561_v6, %v1261_v4 }
 0x2ee   : > { %v5364_v26 = vperm.slane %v1206_v12, %v5347_v14 }
 0x2ef   : > { %v1204_v15 = vsel %vm1079_vm0, %v1203_v11, %v4550_v0  ;;  %v1260_v16 = vsel %vm1079_vm0, %v1259_v10, %v4551_v63 }
 0x2f0   : > { %v1266_v4 = vperm.slane %v1260_v16, %v5347_v14  ;;  %v1249_v16 = vrot.slane %v5323_v57, 4 }
 0x2f1   : > { %v5353_v17 = vpop.permute.xlu1 %4543  ;;  %v5359_v21 = vpop.permute.xlu0 %4538 }
 0x2f2   : > { %v4546_v24 = vunpack.i.h.bf16 %v5353_v17  ;;  %v4545_v25 = vunpack.i.l.bf16 %v5353_v17  ;;  %v4541_v27 = vunpack.i.h.bf16 %v5359_v21  ;;  %v4540_v28 = vunpack.i.l.bf16 %v5359_v21  ;;  %4578 = vrot.lane.b32.xlu1 %v5353_v17, %s4968_s21  ;;  %4573 = vrot.lane.b32.xlu2 %v5359_v21, %s4968_s21 }
 0x2f3   : > { %4608 = vrot.lane.b32.xlu0 %v4534_v59, %s4971_s22  ;;  %v5393_v59 = vperm.slane %v1204_v15, %v5347_v14  ;;  %v1193_v15 = vrot.slane %v5312_v55, 4 }
 0x2f4   : > { %v1147_v29 = vrot.slane %v4546_v24, 4  ;;  %v1091_v30 = vrot.slane %v4545_v25, 4  ;;  %v1094_v31 = vsel %vm1079_vm0, %v4545_v25, %v1093_v23  ;;  %v1150_v32 = vsel %vm1079_vm0, %v4546_v24, %v1149_v22 }
 0x2f5   : > { %v1102_v33 = vperm.slane %v1094_v31, %v5347_v14  ;;  %v1158_v34 = vperm.slane %v1150_v32, %v5347_v14  ;;  %v1135_v35 = vrot.slane %v4541_v27, 4  ;;  %v1138_v36 = vsel %vm1079_vm0, %v4541_v27, %v1137_v20 }
 0x2f6   : > { %v1092_v38 = vsel %vm1079_vm0, %v1091_v30, %v4535_v61  ;;  %v1148_v39 = vsel %vm1079_vm0, %v1147_v29, %v4536_v60  ;;  %v1146_v40 = vperm.slane %v1138_v36, %v5347_v14  ;;  %v1078_v41 = vrot.slane %v4540_v28, 4 }
 0x2f7   : > { %v1098_v42 = vperm.slane %v1092_v38, %v5347_v14  ;;  %v1115_v44 = vrot.slane %v1102_v33, 4  ;;  %v1154_v45 = vperm.slane %v1148_v39, %v5347_v14  ;;  %v1171_v46 = vrot.slane %v1158_v34, 4 }
 0x2f8   : > { %v1136_v43 = vsel %vm1079_vm0, %v1135_v35, %v5314_v56  ;;  %v1173_v47 = vrot.slane %v1146_v40, 4  ;;  %v1080_v48 = vsel %vm1079_vm0, %v1078_v41, %v5310_v52  ;;  %v1082_v49 = vsel %vm1079_vm0, %v4540_v28, %v1081_v18 }
 0x2f9   : > { %v1103_v50 = vrot.slane %v1098_v42, 4  ;;  %v1159_v51 = vrot.slane %v1154_v45, 4  ;;  %v1142_v54 = vperm.slane %v1136_v43, %v5347_v14  ;;  %v1172_v60 = vsel %vm1079_vm0, %v1171_v46, %v1146_v40  ;;  %v5408_v18 = vpop.permute.xlu0 %4553 }
 0x2fa   : > { %v1270_v61 = vperm.slane %v1262_v13, %v5347_v14  ;;  %v1174_v63 = vsel %vm1079_vm0, %v1158_v34, %v1173_v47  ;;  %v1086_v56 = vperm.slane %v1080_v48, %v5347_v14  ;;  %v1090_v0 = vperm.slane %v1082_v49, %v5347_v14  ;;  %6917 = vst [vmem:[#allocation23_spill] sm:$0xff] %v5408_v18 }
 0x2fb   : > { %v1160_v52 = vsel %vm1079_vm0, %v1159_v51, %v1142_v54  ;;  %v1161_v1 = vrot.slane %v1142_v54, 4  ;;  %v1182_v2 = vperm.slane %v1174_v63, %v5356_v19  ;;  %v1178_v8 = vperm.slane %v1172_v60, %v5356_v19  ;;  %4618 = vrot.lane.b32.xlu0 %v5353_v17, %s4971_s22  ;;  %4593 = vrot.lane.b32.xlu1 %v5408_v18, %s4968_s21 }
 0x2fc   : > { %v1104_v5 = vsel %vm1079_vm0, %v1103_v50, %v1086_v56  ;;  %v1105_v6 = vrot.slane %v1086_v56, 4  ;;  %v1116_v10 = vsel %vm1079_vm0, %v1115_v44, %v1090_v0  ;;  %v1117_v12 = vrot.slane %v1090_v0, 4  ;;  %4588 = vrot.lane.b32.xlu2 %v5335_v62, %s4968_s21 }
 0x2fd   : > { %v1162_v7 = vsel %vm1079_vm0, %v1154_v45, %v1161_v1  ;;  %v1189_v9 = vrot.slane %v1182_v2, 4  ;;  %v1227_v20 = vrot.slane %v5364_v26, 4  ;;  %v1215_v23 = vrot.slane %v5393_v59, 4 }
 0x2fe   : > { %v1106_v11 = vsel %vm1079_vm0, %v1098_v42, %v1105_v6  ;;  %v1118_v22 = vsel %vm1079_vm0, %v1102_v33, %v1117_v12  ;;  %v1271_v24 = vrot.slane %v1266_v4, 4  ;;  %v1283_v25 = vrot.slane %v1270_v61, 4 }
 0x2ff   : > { %v5404_v13 = vsel %vm1079_vm0, %v1189_v9, %v1178_v8  ;;  %v1126_v27 = vperm.slane %v1118_v22, %v5356_v19  ;;  %v1122_v28 = vperm.slane %v1116_v10, %v5356_v19  ;;  %v4556_v29 = vunpack.i.h.bf16 %v5408_v18 }
 0x300   : > { %v4555_v30 = vunpack.i.l.bf16 %v5408_v18  ;;  %v5420_v31 = vperm.slane %v1160_v52, %v5356_v19  ;;  %v1170_v32 = vperm.slane %v1162_v7, %v5356_v19  ;;  %v1187_v33 = vrot.slane %v1178_v8, 4 }
 0x301   : > { %v1133_v34 = vrot.slane %v1126_v27, 4  ;;  %v5424_v35 = vsel %vm1079_vm0, 0.0, %v1189_v9  ;;  %v1247_v36 = vrot.slane %v4556_v29, 4  ;;  %v1250_v38 = vsel %vm1079_vm0, %v4556_v29, %v1249_v16 }
 0x302   : > { %v1191_v39 = vrot.slane %v4555_v30, 4  ;;  %v1114_v40 = vperm.slane %v1106_v11, %v5356_v19  ;;  %v1258_v42 = vperm.slane %v1250_v38, %v5347_v14  ;;  %v1194_v44 = vsel %vm1079_vm0, %v4555_v30, %v1193_v15 }
 0x303   : > { %v5431_v41 = vsel %vm1079_vm0, %v1133_v34, %v1122_v28  ;;  %v1131_v45 = vrot.slane %v1122_v28, 4  ;;  %v1248_v46 = vsel %vm1079_vm0, %v1247_v36, %v5323_v57  ;;  %v1202_v47 = vperm.slane %v1194_v44, %v5347_v14  ;;  %4603 = vrot.lane.b32.xlu1 %v5318_v53, %s4971_s22 }
 0x304   : > { %v1192_v43 = vsel %vm1079_vm0, %v1191_v39, %v5312_v55  ;;  %v1254_v17 = vperm.slane %v1248_v46, %v5347_v14  ;;  %v1284_v48 = vsel %vm1079_vm0, %v1283_v25, %v1258_v42  ;;  %v1285_v49 = vrot.slane %v1258_v42, 4  ;;  %4613 = vrot.lane.b32.xlu2 %v5359_v21, %s4971_s22 }
 0x305   : > { %v1198_v50 = vperm.slane %v1192_v43, %v5347_v14  ;;  %v1290_v51 = vperm.slane %v1284_v48, %v5356_v19  ;;  %v1228_v54 = vsel %vm1079_vm0, %v1227_v20, %v1202_v47  ;;  %v1229_v60 = vrot.slane %v1202_v47, 4 }
 0x306   : > { %v1272_v63 = vsel %vm1079_vm0, %v1271_v24, %v1254_v17  ;;  %v1273_v57 = vrot.slane %v1254_v17, 4  ;;  %v1286_v56 = vsel %vm1079_vm0, %v1270_v61, %v1285_v49  ;;  %v5449_v0 = vsel %vm1079_vm0, 0.0, %v1187_v33 }
 0x307   : > { %v1216_v55 = vsel %vm1079_vm0, %v1215_v23, %v1198_v50  ;;  %v1110_v52 = vperm.slane %v1104_v5, %v5356_v19  ;;  %v1294_v1 = vperm.slane %v1286_v56, %v5356_v19  ;;  %v1217_v2 = vrot.slane %v1198_v50, 4 }
 0x308   : > { %v1185_v6 = vrot.slane %v1170_v32, 4  ;;  %v1274_v7 = vsel %vm1079_vm0, %v1266_v4, %v1273_v57  ;;  %v1230_v61 = vsel %vm1079_vm0, %v5364_v26, %v1229_v60  ;;  %v1234_v8 = vperm.slane %v1228_v54, %v5356_v19 }
 0x309   : > { %v1373_v9 = vrot.slane %v5424_v35, 4  ;;  %v1134_v5 = vsel %vm1079_vm0, 0.0, %v1133_v34  ;;  %v1299_v10 = vrot.slane %v1290_v51, 4  ;;  %v1301_v11 = vrot.slane %v1294_v1, 4 }
 0x30a   : > { %v1129_v12 = vrot.slane %v1114_v40, 4  ;;  %v1132_v15 = vsel %vm1079_vm0, 0.0, %v1131_v45  ;;  %v1218_v16 = vsel %vm1079_vm0, %v5393_v59, %v1217_v2  ;;  %v1238_v20 = vperm.slane %v1230_v61, %v5356_v19 }
 0x30b   : > { %v1282_v4 = vperm.slane %v1274_v7, %v5356_v19  ;;  %v1302_v26 = vsel %vm1079_vm0, 0.0, %v1301_v11  ;;  %v5470_v22 = vsel %vm1079_vm0, %v1301_v11, %v1290_v51  ;;  %v1243_v23 = vrot.slane %v1234_v8, 4 }
 0x30c   : > { %v1319_v24 = vrot.slane %v1134_v5, 4  ;;  %v1481_v25 = vrot.slane %v1302_v26, 4  ;;  %v1245_v27 = vrot.slane %v1238_v20, 4  ;;  %v5473_v28 = vperm.slane %v1272_v63, %v5356_v19 }
 0x30d   : > { %v1300_v29 = vsel %vm1079_vm0, 0.0, %v1299_v10  ;;  %v1127_v30 = vrot.slane %v1110_v52, 4  ;;  %v1183_v59 = vrot.slane %v5420_v31, 4  ;;  %v5481_v33 = vperm.slane %v1216_v55, %v5356_v19 }
 0x30e   : > { %v5478_v32 = vsel %vm1079_vm0, %v1481_v25, %v1300_v29  ;;  %v1246_v34 = vsel %vm1079_vm0, 0.0, %v1245_v27  ;;  %v5485_v35 = vsel %vm1079_vm0, %v1245_v27, %v1234_v8  ;;  %v5487_v36 = vrot.slane %v1282_v4, 4 }
 0x30f   : > { %v1226_v38 = vperm.slane %v1218_v16, %v5356_v19  ;;  %v1244_v39 = vsel %vm1079_vm0, 0.0, %v1243_v23  ;;  %v1427_v40 = vrot.slane %v1246_v34, 4  ;;  %v1128_v42 = vsel %vm1079_vm0, 0.0, %v1127_v30 }
 0x310   : > { %v1130_v44 = vsel %vm1079_vm0, 0.0, %v1129_v12  ;;  %v1184_v45 = vsel %vm1079_vm0, 0.0, %v1183_v59  ;;  %v1186_v46 = vsel %vm1079_vm0, 0.0, %v1185_v6  ;;  %v1303_v47 = vsel %vm1079_vm0, %v1129_v12, %v1110_v52 }
 0x311   : > { %v5500_v43 = vsel %vm1079_vm0, %v1427_v40, %v1244_v39  ;;  %v1308_v17 = vrot.slane %v1130_v44, 4  ;;  %v1318_v53 = vperm.slane %v5431_v41, %v5347_v14  ;;  %v1307_v48 = vperm.slane %v1303_v47, %v5347_v14 }
 0x312   : > { %v1320_v21 = vsel %vm1079_vm0, %v1319_v24, %v1132_v15  ;;  %v1357_v49 = vsel %vm1079_vm0, %v1185_v6, %v5420_v31  ;;  %v1362_v50 = vrot.slane %v1186_v46, 4  ;;  %v1372_v55 = vperm.slane %v5404_v13, %v5347_v14 }
 0x313   : > { %v1309_v51 = vsel %vm1079_vm0, %v1308_v17, %v1128_v42  ;;  %v1324_v54 = vperm.slane %v1320_v21, %v5347_v14  ;;  %v1339_v60 = vrot.slane %v1318_v53, 4  ;;  %v1361_v63 = vperm.slane %v1357_v49, %v5347_v14 }
 0x314   : > { %v1313_v57 = vperm.slane %v1309_v51, %v5347_v14  ;;  %v1327_v56 = vrot.slane %v1307_v48, 4  ;;  %v1363_v41 = vsel %vm1079_vm0, %v1362_v50, %v1184_v45  ;;  %v1374_v2 = vsel %vm1079_vm0, %v1373_v9, %v5449_v0 }
 0x315   : > { %v1337_v52 = vrot.slane %v1324_v54, 4  ;;  %v1340_v1 = vsel %vm1079_vm0, %v1324_v54, %v1339_v60  ;;  %v1367_v31 = vperm.slane %v1363_v41, %v5347_v14  ;;  %v1378_v8 = vperm.slane %v1374_v2, %v5347_v14 }
 0x316   : > { %v1325_v6 = vrot.slane %v1313_v57, 4  ;;  %v1328_v7 = vsel %vm1079_vm0, %v1313_v57, %v1327_v56  ;;  %v5522_v61 = vperm.slane %v1340_v1, %v5356_v19  ;;  %v1381_v10 = vrot.slane %v1361_v63, 4 }
 0x317   : > { %v5526_v5 = vperm.slane %v1328_v7, %v5356_v19  ;;  %v1379_v13 = vrot.slane %v1367_v31, 4  ;;  %v1393_v11 = vrot.slane %v1372_v55, 4  ;;  %v1391_v15 = vrot.slane %v1378_v8, 4 }
 0x318   : > { %v1353_v12 = vrot.slane %v5522_v61, 4  ;;  %v1326_v16 = vsel %vm1079_vm0, %v1325_v6, %v1307_v48  ;;  %v1338_v0 = vsel %vm1079_vm0, %v1337_v52, %v1318_v53  ;;  %v1241_v9 = vrot.slane %v1226_v38, 4 }
 0x319   : > { %v1382_v20 = vsel %vm1079_vm0, %v1367_v31, %v1381_v10  ;;  %v1394_v4 = vsel %vm1079_vm0, %v1378_v8, %v1393_v11  ;;  %v1332_v26 = vperm.slane %v1326_v16, %v5356_v19  ;;  %v1344_v27 = vperm.slane %v1338_v0, %v5356_v19 }
 0x31a   : > { %v1354_v23 = vsel %vm1079_vm0, %v1353_v12, %v5526_v5  ;;  %v5537_v24 = vperm.slane %v1382_v20, %v5356_v19  ;;  %v5540_v25 = vperm.slane %v1394_v4, %v5356_v19  ;;  %v1380_v30 = vsel %vm1079_vm0, %v1379_v13, %v1361_v63 }
 0x31b   : > { %v1523_v29 = vpack.c.bf16 %v1354_v23, %v1354_v23  ;;  %v1392_v59 = vsel %vm1079_vm0, %v1391_v15, %v1372_v55  ;;  %v1295_v34 = vrot.slane %v5473_v28, 4  ;;  %v1349_v39 = vrot.slane %v1344_v27, 4 }
 0x31c   : > { %v1407_v38 = vrot.slane %v5540_v25, 4  ;;  %v1298_v40 = vsel %vm1079_vm0, 0.0, %v5487_v36  ;;  %v1386_v42 = vperm.slane %v1380_v30, %v5356_v19  ;;  %v1398_v44 = vperm.slane %v1392_v59, %v5356_v19 }
 0x31d   : > { %v1239_v45 = vrot.slane %v5481_v33, 4  ;;  %v1242_v46 = vsel %vm1079_vm0, 0.0, %v1241_v9  ;;  %v1350_v17 = vsel %vm1079_vm0, %v1349_v39, %v1332_v26  ;;  %v5556_v48 = vunpack.c.l.b16 %v1523_v29 }
 0x31e   : > { %v1408_v47 = vsel %vm1079_vm0, %v1407_v38, %v5537_v24  ;;  %v1403_v21 = vrot.slane %v1398_v44, 4  ;;  %v1519_v49 = vpack.c.bf16 %v1350_v17, %v1350_v17  ;;  %v1470_v50 = vrot.slane %v1298_v40, 4 }
 0x31f   : > { %v1524_v53 = vpack.c.bf16 %v1408_v47, %v1408_v47  ;;  %v5560_v51 = vperm.slane %v5470_v22, %v5347_v14  ;;  %v1426_v54 = vperm.slane %v5485_v35, %v5347_v14  ;;  %v1416_v60 = vrot.slane %v1242_v46, 4 }
 0x320   : > { %v1404_v57 = vsel %vm1079_vm0, %v1403_v21, %v1386_v42  ;;  %v5567_v56 = vunpack.c.l.b16 %v1519_v49  ;;  %v1351_v55 = vrot.slane %v1332_v26, 4  ;;  %v1405_v52 = vrot.slane %v1386_v42, 4 }
 0x321   : > { %v5564_v63 = vunpack.c.l.b16 %v1524_v53  ;;  %v1520_v41 = vpack.c.bf16 %v1404_v57, %v1404_v57  ;;  %v1240_v1 = vsel %vm1079_vm0, 0.0, %v1239_v45  ;;  %v1296_v22 = vsel %vm1079_vm0, 0.0, %v1295_v34 }
 0x322   : > { %v1411_v35 = vsel %vm1079_vm0, %v1241_v9, %v5481_v33  ;;  %v1465_v2 = vsel %vm1079_vm0, %v5487_v36, %v5473_v28  ;;  %v1352_v7 = vsel %vm1079_vm0, %v1344_v27, %v1351_v55  ;;  %v1406_v8 = vsel %vm1079_vm0, %v1398_v44, %v1405_v52 }
 0x323   : > { %v5578_v6 = vunpack.c.l.b16 %v1520_v41  ;;  %v1415_v13 = vperm.slane %v1411_v35, %v5347_v14  ;;  %v1521_v10 = vpack.c.bf16 %v1352_v7, %v1352_v7  ;;  %v1522_v11 = vpack.c.bf16 %v1406_v8, %v1406_v8 }
 0x324   : > { %v1432_v12 = vperm.slane %v5500_v43, %v5347_v14  ;;  %v1447_v15 = vrot.slane %v1426_v54, 4  ;;  %v1417_v16 = vsel %vm1079_vm0, %v1416_v60, %v1240_v1  ;;  %v1469_v36 = vperm.slane %v1465_v2, %v5347_v14 }
 0x325   : > { %v1435_v28 = vrot.slane %v1415_v13, 4  ;;  %v5589_v0 = vunpack.c.l.b16 %v1521_v10  ;;  %v5591_v9 = vunpack.c.l.b16 %v1522_v11  ;;  %v1421_v20 = vperm.slane %v1417_v16, %v5347_v14 }
 0x326   : > { %v1448_v4 = vsel %vm1079_vm0, %v1432_v12, %v1447_v15  ;;  %v1471_v43 = vsel %vm1079_vm0, %v1470_v50, %v1296_v22  ;;  %v1486_v23 = vperm.slane %v5478_v32, %v5347_v14  ;;  %v1489_v27 = vrot.slane %v1469_v36, 4 }
 0x327   : > { %v1456_v26 = vperm.slane %v1448_v4, %v5356_v19  ;;  %v1436_v30 = vsel %vm1079_vm0, %v1421_v20, %v1435_v28  ;;  %v1475_v59 = vperm.slane %v1471_v43, %v5347_v14  ;;  %v1501_v34 = vrot.slane %v5560_v51, 4 }
 0x328   : > { %v1355_v38 = vrot.slane %v5526_v5, 4  ;;  %v1409_v39 = vrot.slane %v5537_v24, 4  ;;  %v1444_v40 = vperm.slane %v1436_v30, %v5356_v19  ;;  %v1445_v49 = vrot.slane %v1432_v12, 4 }
 0x329   : > { %v1461_v42 = vrot.slane %v1456_v26, 4  ;;  %v1490_v44 = vsel %vm1079_vm0, %v1475_v59, %v1489_v27  ;;  %v1502_v32 = vsel %vm1079_vm0, %v1486_v23, %v1501_v34  ;;  %v1499_v50 = vrot.slane %v1486_v23, 4 }
 0x32a   : > { %v1498_v46 = vperm.slane %v1490_v44, %v5356_v19  ;;  %v1510_v47 = vperm.slane %v1502_v32, %v5356_v19  ;;  %v1356_v5 = vsel %vm1079_vm0, %v5522_v61, %v1355_v38  ;;  %v1410_v24 = vsel %vm1079_vm0, %v5540_v25, %v1409_v39 }
 0x32b   : > { %v1462_v45 = vsel %vm1079_vm0, %v1461_v42, %v1444_v40  ;;  %v1463_v21 = vrot.slane %v1444_v40, 4  ;;  %v1525_v60 = vpack.c.bf16 %v1356_v5, %v1356_v5  ;;  %v1526_v52 = vpack.c.bf16 %v1410_v24, %v1410_v24 }
 0x32c   : > { %v1531_v17 = vpack.c.bf16 %v1462_v45, %v1462_v45  ;;  %v1515_v53 = vrot.slane %v1510_v47, 4  ;;  %v1517_v41 = vrot.slane %v1498_v46, 4  ;;  %v1433_v22 = vrot.slane %v1421_v20, 4 }
 0x32d   : > { %v1446_v35 = vsel %vm1079_vm0, %v1445_v49, %v1426_v54  ;;  %v1487_v2 = vrot.slane %v1475_v59, 4  ;;  %v1500_v25 = vsel %vm1079_vm0, %v1499_v50, %v5560_v51  ;;  %v5623_v7 = vunpack.c.l.b16 %v1525_v60 }
 0x32e   : > { %v1516_v57 = vsel %vm1079_vm0, %v1515_v53, %v1498_v46  ;;  %v5617_v55 = vunpack.c.l.b16 %v1531_v17  ;;  %v1452_v61 = vperm.slane %v1446_v35, %v5356_v19  ;;  %v5625_v8 = vunpack.c.l.b16 %v1526_v52 }
 0x32f   : > { %v1532_v1 = vpack.c.bf16 %v1516_v57, %v1516_v57  ;;  %v1434_v11 = vsel %vm1079_vm0, %v1433_v22, %v1415_v13  ;;  %v1488_v12 = vsel %vm1079_vm0, %v1487_v2, %v1469_v36  ;;  %v1506_v15 = vperm.slane %v1500_v25, %v5356_v19  ;;  %v4564_v57 = vpop.permute.xlu1 %4563 }
 0x330   : > { %v1440_v54 = vperm.slane %v1434_v11, %v5356_v19  ;;  %v1494_v16 = vperm.slane %v1488_v12, %v5356_v19  ;;  %v1457_v20 = vrot.slane %v1452_v61, 4  ;;  %v1464_v27 = vsel %vm1079_vm0, %v1456_v26, %v1463_v21 }
 0x331   : > { %v5627_v10 = vunpack.c.l.b16 %v1532_v1  ;;  %v1511_v4 = vrot.slane %v1506_v15, 4  ;;  %v1518_v30 = vsel %vm1079_vm0, %v1510_v47, %v1517_v41  ;;  %v1533_v44 = vpack.c.bf16 %v1464_v27, %v1464_v27 }
 0x332   : > { %v1459_v43 = vrot.slane %v1440_v54, 4  ;;  %v1513_v23 = vrot.slane %v1494_v16, 4  ;;  %v1458_v13 = vsel %vm1079_vm0, %v1457_v20, %v1440_v54  ;;  %v1534_v32 = vpack.c.bf16 %v1518_v30, %v1518_v30 }
 0x333   : > { %v1512_v36 = vsel %vm1079_vm0, %v1511_v4, %v1494_v16  ;;  %v1527_v38 = vpack.c.bf16 %v1458_v13, %v1458_v13  ;;  %v5652_v26 = vunpack.c.l.b16 %v1533_v44  ;;  %v4566_v41 = vunpack.i.h.bf16 %v4564_v57 }
 0x334   : > { %v1460_v59 = vsel %vm1079_vm0, %v1452_v61, %v1459_v43  ;;  %v1514_v34 = vsel %vm1079_vm0, %v1506_v15, %v1513_v23  ;;  %v1528_v39 = vpack.c.bf16 %v1512_v36, %v1512_v36  ;;  %v5654_v47 = vunpack.c.l.b16 %v1534_v32 }
 0x335   : > { %v1529_v40 = vpack.c.bf16 %v1460_v59, %v1460_v59  ;;  %v1530_v42 = vpack.c.bf16 %v1514_v34, %v1514_v34  ;;  %v5644_v45 = vunpack.c.l.b16 %v1527_v38  ;;  %6919 = vst [vmem:[#allocation25_spill] sm:$0xff] %v5652_v26  ;;  %v4565_v22 = vunpack.i.l.bf16 %v4564_v57 }
 0x336   : > { %v5646_v46 = vunpack.c.l.b16 %v1528_v39  ;;  %6920 = vst [vmem:[#allocation26_spill] sm:$0xff] %v5654_v47  ;;  %v1641_v25 = vrot.slane %v4566_v41, 4 }
 0x337   : > { %6918 = vst [vmem:[#allocation24_spill] sm:$0xff] %v5644_v45  ;;  %v5648_v17 = vunpack.c.l.b16 %v1529_v40  ;;  %v5650_v53 = vunpack.c.l.b16 %v1530_v42  ;;  %v1585_v54 = vrot.slane %v4565_v22, 4 }
 0x34c   : > { %v4574_v60 = vpop.permute.xlu2 %4573 }
 0x34d   : > { %v5662_v49 = vpop.permute.xlu0 %4568  ;;  %v4576_v52 = vunpack.i.h.bf16 %v4574_v60  ;;  %v4575_v1 = vunpack.i.l.bf16 %v4574_v60 }
 0x34e   : > { %v4571_v13 = vunpack.i.h.bf16 %v5662_v49  ;;  %v4570_v34 = vunpack.i.l.bf16 %v5662_v49 }
 0x34f   : > { %v1639_v11 = vrot.slane %v4576_v52, 4  ;;  %v1583_v12 = vrot.slane %v4575_v1, 4  ;;  %v1642_v20 = vsel %vm1079_vm0, %v4576_v52, %v1641_v25  ;;  %v1586_v30 = vsel %vm1079_vm0, %v4575_v1, %v1585_v54 }
 0x350   : > { %v5673_v38 = vperm.slane %v1642_v20, %v5347_v14  ;;  %v1594_v49 = vperm.slane %v1586_v30, %v5347_v14  ;;  %v1653_v1 = vrot.slane %v4571_v13, 4 }
 0x351   : > { %v1640_v36 = vsel %vm1079_vm0, %v1639_v11, %v4566_v41  ;;  %v1584_v27 = vsel %vm1079_vm0, %v1583_v12, %v4565_v22  ;;  %v1597_v11 = vrot.slane %v4570_v34, 4 }
 0x352   : > { %v1646_v57 = vperm.slane %v1640_v36, %v5347_v14  ;;  %v1590_v41 = vperm.slane %v1584_v27, %v5347_v14  ;;  %v1677_v12 = vrot.slane %v5673_v38, 4 }
 0x354   : > { %v1609_v20 = vrot.slane %v1590_v41, 4 }
 0x355   : > { %v5664_v50 = vpop.permute.xlu0 %4583 }
 0x356   : > { %v4589_v15 = vpop.permute.xlu2 %4588  ;;  %v6869_v39 = vunpack.i.h.bf16 %v5664_v50  ;;  %v6867_v40 = vunpack.i.l.bf16 %v5664_v50 }
 0x357   : > { %v4590_v16 = vunpack.i.l.bf16 %v4589_v15  ;;  %v4591_v4 = vunpack.i.h.bf16 %v4589_v15 }
 0x358   : > { %v5698_v15 = vrot.slane %v6869_v39, 4 }
 0x359   : > { %v1709_v59 = vrot.slane %v4590_v16, 4  ;;  %v1765_v42 = vrot.slane %v4591_v4, 4 }
 0x35d   : > { %v4599_v35 = vpop.permute.xlu0 %4598 }
 0x35e   : > { %v4601_v2 = vunpack.i.h.bf16 %v4599_v35  ;;  %v4600_v61 = vunpack.i.l.bf16 %v4599_v35  ;;  %v5704_v54 = vpop.permute.xlu2 %4613 }
 0x35f   : > { %v6868_v28 = vunpack.i.l.bf16 %v5704_v54 }
 0x360   : > { %v1763_v43 = vrot.slane %v4601_v2, 4  ;;  %v1707_v23 = vrot.slane %v4600_v61, 4  ;;  %v1710_v32 = vsel %vm1079_vm0, %v4600_v61, %v1709_v59  ;;  %v1766_v52 = vsel %vm1079_vm0, %v4601_v2, %v1765_v42 }
 0x361   : > { %v5688_v35 = vperm.slane %v1710_v32, %v5347_v14  ;;  %v5702_v2 = vrot.slane %v6867_v40, 4 }
 0x362   : > { %v1708_v44 = vsel %vm1079_vm0, %v1707_v23, %v4590_v16  ;;  %v1764_v60 = vsel %vm1079_vm0, %v1763_v43, %v4591_v4  ;;  %v1665_v16 = vrot.slane %v1646_v57, 4  ;;  %v1621_v4 = vrot.slane %v1594_v49, 4 }
 0x363   : > { %v5685_v22 = vperm.slane %v1708_v44, %v5347_v14  ;;  %v5691_v25 = vperm.slane %v1764_v60, %v5347_v14  ;;  %v5707_v43 = vperm.slane %v1766_v52, %v5347_v14  ;;  %v6866_v60 = vunpack.i.h.bf16 %v5704_v54 }
 0x364   : > { %v4579_v23 = vpop.permute.xlu1 %4578 }
 0x365   : > { %v5693_v61 = vpop.permute.xlu0 %4608  ;;  %v4581_v36 = vunpack.i.h.bf16 %v4579_v23  ;;  %v4580_v27 = vunpack.i.l.bf16 %v4579_v23 }
 0x366   : > { %v4611_v30 = vunpack.i.h.bf16 %v5693_v61  ;;  %v6870_v59 = vunpack.i.l.bf16 %v5693_v61 }
 0x367   : > { %v1651_v21 = vrot.slane %v4581_v36, 4  ;;  %v1595_v5 = vrot.slane %v4580_v27, 4  ;;  %v1598_v52 = vsel %vm1079_vm0, %v4580_v27, %v1597_v11  ;;  %v1654_v24 = vsel %vm1079_vm0, %v4581_v36, %v1653_v1 }
 0x368   : > { %v1606_v51 = vperm.slane %v1598_v52, %v5347_v14  ;;  %v1662_v29 = vperm.slane %v1654_v24, %v5347_v14  ;;  %v2157_v42 = vrot.slane %v4611_v30, 4  ;;  %v2101_v11 = vrot.slane %v6870_v59, 4 }
 0x369   : > { %v1596_v33 = vsel %vm1079_vm0, %v1595_v5, %v4570_v34  ;;  %v1652_v31 = vsel %vm1079_vm0, %v1651_v21, %v4571_v13  ;;  %v5732_v24 = vrot.slane %v6866_v60, 4 }
 0x36a   : > { %v1602_v1 = vperm.slane %v1596_v33, %v5347_v14  ;;  %v1619_v36 = vrot.slane %v1606_v51, 4  ;;  %v1622_v27 = vsel %vm1079_vm0, %v1606_v51, %v1621_v4  ;;  %v1658_v44 = vperm.slane %v1652_v31, %v5347_v14 }
 0x36b   : > { %v1630_v5 = vperm.slane %v1622_v27, %v5356_v19  ;;  %v1675_v21 = vrot.slane %v1662_v29, 4  ;;  %v1678_v13 = vsel %vm1079_vm0, %v1662_v29, %v1677_v12 }
 0x36c   : > { %v1607_v34 = vrot.slane %v1602_v1, 4  ;;  %v1610_v52 = vsel %vm1079_vm0, %v1602_v1, %v1609_v20  ;;  %v1620_v32 = vsel %vm1079_vm0, %v1619_v36, %v1594_v49  ;;  %v1663_v33 = vrot.slane %v1658_v44, 4 }
 0x36d   : > { %v1618_v23 = vperm.slane %v1610_v52, %v5356_v19  ;;  %v1626_v51 = vperm.slane %v1620_v32, %v5356_v19  ;;  %v1637_v31 = vrot.slane %v1630_v5, 4  ;;  %v1666_v4 = vsel %vm1079_vm0, %v1658_v44, %v1665_v16  ;;  %v4619_v1 = vpop.permute.xlu0 %4618 }
 0x36e   : > { %v1608_v60 = vsel %vm1079_vm0, %v1607_v34, %v1590_v41  ;;  %v1664_v27 = vsel %vm1079_vm0, %v1663_v33, %v1646_v57  ;;  %v1674_v40 = vperm.slane %v1666_v4, %v5356_v19  ;;  %v1676_v29 = vsel %vm1079_vm0, %v1675_v21, %v5673_v38  ;;  %v4594_v34 = vpop.permute.xlu1 %4593 }
 0x36f   : > { %v5747_v12 = vperm.slane %v1608_v60, %v5356_v19  ;;  %v5749_v49 = vrot.slane %v1618_v23, 4  ;;  %v1635_v20 = vrot.slane %v1626_v51, 4  ;;  %v5752_v32 = vsel %vm1079_vm0, 0.0, %v1637_v31 }
 0x370   : > { %v5755_v16 = vperm.slane %v1664_v27, %v5356_v19  ;;  %v1682_v41 = vperm.slane %v1676_v29, %v5356_v19  ;;  %v1686_v57 = vperm.slane %v1678_v13, %v5356_v19  ;;  %v5759_v44 = vrot.slane %v1674_v40, 4 }
 0x371   : > { %v5763_v38 = vrot.slane %v6868_v28, 4  ;;  %v5768_v23 = vsel %vm1079_vm0, 0.0, %v5749_v49  ;;  %v5771_v36 = vsel %vm1079_vm0, 0.0, %v1635_v20  ;;  %v5778_v13 = vsel %vm1079_vm0, %v1637_v31, %v1626_v51 }
 0x372   : > { %v5775_v5 = vsel %vm1079_vm0, 0.0, %v5759_v44  ;;  %v1691_v40 = vrot.slane %v1682_v41, 4  ;;  %v1693_v21 = vrot.slane %v1686_v57, 4  ;;  %v4621_v27 = vunpack.i.h.bf16 %v4619_v1 }
 0x373   : > { %v4620_v57 = vunpack.i.l.bf16 %v4619_v1  ;;  %v4596_v60 = vunpack.i.h.bf16 %v4594_v34  ;;  %v6924_v28 = vrot.slane %v5707_v43, 4 }
 0x374   : > { %v5784_v29 = vsel %vm1079_vm0, 0.0, %v1691_v40  ;;  %v5787_v20 = vsel %vm1079_vm0, 0.0, %v1693_v21  ;;  %v5791_v51 = vsel %vm1079_vm0, %v1693_v21, %v1682_v41  ;;  %v2155_v31 = vrot.slane %v4621_v27, 4 }
 0x375   : > { %v2158_v52 = vsel %vm1079_vm0, %v4621_v27, %v2157_v42  ;;  %v2099_v33 = vrot.slane %v4620_v57, 4  ;;  %v2102_v4 = vsel %vm1079_vm0, %v4620_v57, %v2101_v11  ;;  %v4595_v40 = vunpack.i.l.bf16 %v4594_v34 }
 0x376   : > { %v5796_v39 = vperm.slane %v2158_v52, %v5347_v14  ;;  %v5799_v59 = vperm.slane %v2102_v4, %v5347_v14  ;;  %v2156_v1 = vsel %vm1079_vm0, %v2155_v31, %v4611_v30  ;;  %v1751_v41 = vrot.slane %v4596_v60, 4 }
 0x377   : > { %v1754_v21 = vsel %vm1079_vm0, %v4596_v60, %v5698_v15  ;;  %v6921_v27 = vunpack.i.l.bf16 %v5693_v61  ;;  %v5811_v52 = vperm.slane %v2156_v1, %v5347_v14  ;;  %v6922_v57 = vunpack.i.h.bf16 %v5664_v50 }
 0x378   : > { %v1762_v34 = vperm.slane %v1754_v21, %v5347_v14  ;;  %v1695_v60 = vrot.slane %v4595_v40, 4  ;;  %v1698_v1 = vsel %vm1079_vm0, %v4595_v40, %v5702_v2 }
 0x379   : > { %v2100_v11 = vsel %vm1079_vm0, %v2099_v33, %v6921_v27  ;;  %v1752_v15 = vsel %vm1079_vm0, %v1751_v41, %v6922_v57  ;;  %v6923_v27 = vunpack.i.l.bf16 %v5664_v50  ;;  %v1706_v42 = vperm.slane %v1698_v1, %v5347_v14 }
 0x37a   : > { %v5815_v4 = vperm.slane %v2100_v11, %v5347_v14  ;;  %v1758_v61 = vperm.slane %v1752_v15, %v5347_v14  ;;  %v1789_v33 = vrot.slane %v1762_v34, 4  ;;  %v1788_v41 = vsel %vm1079_vm0, %v6924_v28, %v1762_v34 }
 0x37b   : > { %v1696_v11 = vsel %vm1079_vm0, %v1695_v60, %v6923_v27  ;;  %v6925_v15 = vrot.slane %v5691_v25, 4  ;;  %v6926_v50 = vrot.slane %v5688_v35, 4  ;;  %v1733_v60 = vrot.slane %v1706_v42, 4 }
 0x37c   : > { %v1777_v57 = vrot.slane %v1758_v61, 4  ;;  %v1702_v31 = vperm.slane %v1696_v11, %v5347_v14  ;;  %v1790_v2 = vsel %vm1079_vm0, %v5707_v43, %v1789_v33  ;;  %v1794_v28 = vperm.slane %v1788_v41, %v5356_v19 }
 0x37d   : > { %v1776_v30 = vsel %vm1079_vm0, %v6925_v15, %v1758_v61  ;;  %v1732_v40 = vsel %vm1079_vm0, %v6926_v50, %v1706_v42  ;;  %v6927_v34 = vrot.slane %v5685_v22, 4  ;;  %v1734_v42 = vsel %vm1079_vm0, %v5688_v35, %v1733_v60  ;;  %v4604_v15 = vpop.permute.xlu1 %4603 }
 0x37e   : > { %v5843_v1 = vperm.slane %v1776_v30, %v5356_v19  ;;  %v1721_v11 = vrot.slane %v1702_v31, 4  ;;  %v1738_v61 = vperm.slane %v1732_v40, %v5356_v19  ;;  %v1778_v43 = vsel %vm1079_vm0, %v5691_v25, %v1777_v57 }
 0x37f   : > { %v1720_v27 = vsel %vm1079_vm0, %v6927_v34, %v1702_v31  ;;  %v1786_v30 = vperm.slane %v1778_v43, %v5356_v19  ;;  %v1798_v41 = vperm.slane %v1790_v2, %v5356_v19  ;;  %v2111_v50 = vrot.slane %v5815_v4, 4 }
 0x380   : > { %v5853_v33 = vperm.slane %v1720_v27, %v5356_v19  ;;  %v1722_v31 = vsel %vm1079_vm0, %v5685_v22, %v1721_v11  ;;  %v1742_v40 = vperm.slane %v1734_v42, %v5356_v19  ;;  %v1747_v34 = vrot.slane %v1738_v61, 4 }
 0x381   : > { %v1730_v25 = vperm.slane %v1722_v31, %v5356_v19  ;;  %v5865_v27 = vrot.slane %v1786_v30, 4  ;;  %v1803_v35 = vrot.slane %v1794_v28, 4  ;;  %v1805_v2 = vrot.slane %v1798_v41, 4 }
 0x382   : > { %v1749_v43 = vrot.slane %v1742_v40, 4  ;;  %v4606_v21 = vunpack.i.h.bf16 %v4604_v15  ;;  %v5871_v62 = vsel %vm1079_vm0, 0.0, %v1747_v34  ;;  %v4605_v11 = vunpack.i.l.bf16 %v4604_v15 }
 0x383   : > { %v5868_v37 = vrot.slane %v1730_v25, 4  ;;  %v5875_v22 = vsel %vm1079_vm0, 0.0, %v5865_v27  ;;  %v5881_v30 = vsel %vm1079_vm0, 0.0, %v1803_v35  ;;  %v5884_v31 = vsel %vm1079_vm0, 0.0, %v1805_v2 }
 0x384   : > { %v5878_v42 = vsel %vm1079_vm0, 0.0, %v1749_v43  ;;  %v1926_v41 = vsel %vm1079_vm0, %v1749_v43, %v1738_v61  ;;  %v1980_v25 = vsel %vm1079_vm0, %v1805_v2, %v1794_v28  ;;  %v2145_v58 = vrot.slane %v4606_v21, 4 }
 0x385   : > { %v5889_v40 = vsel %vm1079_vm0, 0.0, %v5868_v37  ;;  %v5892_v34 = vperm.slane %v1926_v41, %v5347_v14  ;;  %v5899_v60 = vperm.slane %v1980_v25, %v5347_v14  ;;  %v2088_v43 = vsel %vm1079_vm0, %v5763_v38, %v4605_v11 }
 0x386   : > { %v2089_v3 = vrot.slane %v4605_v11, 4  ;;  %v2144_v41 = vsel %vm1079_vm0, %v5732_v24, %v4606_v21  ;;  %v2094_v15 = vperm.slane %v2088_v43, %v5347_v14  ;;  %v6928_v28 = vunpack.i.h.bf16 %v5704_v54 }
 0x387   : > { %v2150_v35 = vperm.slane %v2144_v41, %v5347_v14  ;;  %v6929_v25 = vrot.slane %v5747_v12, 4  ;;  %v6930_v61 = vunpack.i.l.bf16 %v5704_v54  ;;  %v6931_v24 = vrot.slane %v5755_v16, 4 }
 0x388   : > { %v2146_v2 = vsel %vm1079_vm0, %v6928_v28, %v2145_v58  ;;  %v1807_v58 = vsel %vm1079_vm0, %v5749_v49, %v5747_v12  ;;  %v2112_v41 = vsel %vm1079_vm0, %v2111_v50, %v2094_v15  ;;  %v2113_v28 = vrot.slane %v2094_v15, 4 }
 0x389   : > { %v1632_v57 = vsel %vm1079_vm0, 0.0, %v6929_v25  ;;  %v2090_v38 = vsel %vm1079_vm0, %v6930_v61, %v2089_v3  ;;  %v2154_v11 = vperm.slane %v2146_v2, %v5347_v14  ;;  %v5921_v21 = vsel %vm1079_vm0, 0.0, %v6931_v24 }
 0x38a   : > { %v2098_v43 = vperm.slane %v2090_v38, %v5347_v14  ;;  %v6932_v54 = vrot.slane %v5811_v52, 4  ;;  %v2118_v61 = vperm.slane %v2112_v41, %v5356_v19  ;;  %v2169_v2 = vrot.slane %v2150_v35, 4 }
 0x38b   : > { %v6933_v24 = vrot.slane %v5796_v39, 4  ;;  %v2114_v12 = vsel %vm1079_vm0, %v5815_v4, %v2113_v28  ;;  %v6934_v49 = vrot.slane %v5799_v59, 4  ;;  %v2181_v38 = vrot.slane %v2154_v11, 4 }
 0x38c   : > { %v2168_v3 = vsel %vm1079_vm0, %v6932_v54, %v2150_v35  ;;  %v2125_v15 = vrot.slane %v2098_v43, 4  ;;  %v2122_v54 = vperm.slane %v2114_v12, %v5356_v19  ;;  %v2135_v35 = vrot.slane %v2118_v61, 4 }
 0x38d   : > { %v2174_v25 = vperm.slane %v2168_v3, %v5356_v19  ;;  %v2180_v18 = vsel %vm1079_vm0, %v6933_v24, %v2154_v11  ;;  %v2124_v50 = vsel %vm1079_vm0, %v6934_v49, %v2098_v43  ;;  %v2170_v3 = vsel %vm1079_vm0, %v5811_v52, %v2169_v2 }
 0x38e   : > { %v2130_v41 = vperm.slane %v2124_v50, %v5356_v19  ;;  %v2126_v24 = vsel %vm1079_vm0, %v5799_v59, %v2125_v15  ;;  %v2178_v26 = vperm.slane %v2170_v3, %v5356_v19  ;;  %v2182_v4 = vsel %vm1079_vm0, %v5796_v39, %v2181_v38 }
 0x38f   : > { %v2186_v28 = vperm.slane %v2180_v18, %v5356_v19  ;;  %v2134_v11 = vperm.slane %v2126_v24, %v5356_v19  ;;  %v2137_v43 = vrot.slane %v2122_v54, 4  ;;  %v6935_v49 = vrot.slane %v5768_v23, 4 }
 0x390   : > { %v2139_v12 = vrot.slane %v2130_v41, 4  ;;  %v2190_v52 = vperm.slane %v2182_v4, %v5356_v19  ;;  %v2191_v2 = vrot.slane %v2174_v25, 4  ;;  %v2193_v47 = vrot.slane %v2178_v26, 4 }
 0x391   : > { %v1813_v50 = vsel %vm1079_vm0, %v6935_v49, %v1632_v57  ;;  %v2195_v59 = vrot.slane %v2186_v28, 4  ;;  %v2136_v15 = vsel %vm1079_vm0, 0.0, %v2135_v35  ;;  %v2138_v3 = vsel %vm1079_vm0, 0.0, %v2137_v43 }
 0x392   : > { %v2141_v39 = vrot.slane %v2134_v11, 4  ;;  %v2311_v18 = vsel %vm1079_vm0, %v2137_v43, %v2118_v61  ;;  %v2140_v38 = vsel %vm1079_vm0, 0.0, %v2139_v12  ;;  %v2192_v54 = vsel %vm1079_vm0, 0.0, %v2191_v2 }
 0x393   : > { %v2194_v23 = vsel %vm1079_vm0, 0.0, %v2193_v47  ;;  %v2197_v24 = vrot.slane %v2190_v52, 4  ;;  %v2196_v4 = vsel %vm1079_vm0, 0.0, %v2195_v59  ;;  %v5965_v26 = vperm.slane %v2311_v18, %v5347_v14 }
 0x394   : > { %v2142_v57 = vsel %vm1079_vm0, 0.0, %v2141_v39  ;;  %v2316_v35 = vrot.slane %v2138_v3, 4  ;;  %v2365_v61 = vsel %vm1079_vm0, %v2193_v47, %v2174_v25  ;;  %v2370_v43 = vrot.slane %v2194_v23, 4 }
 0x395   : > { %v2198_v49 = vsel %vm1079_vm0, 0.0, %v2197_v24  ;;  %v2327_v11 = vrot.slane %v2142_v57, 4  ;;  %v5971_v2 = vsel %vm1079_vm0, %v2141_v39, %v2130_v41  ;;  %v5974_v52 = vperm.slane %v2365_v61, %v5347_v14 }
 0x396   : > { %v2317_v12 = vsel %vm1079_vm0, %v2316_v35, %v2136_v15  ;;  %v2381_v45 = vrot.slane %v2198_v49, 4  ;;  %v2371_v18 = vsel %vm1079_vm0, %v2370_v43, %v2192_v54  ;;  %v1811_v57 = vperm.slane %v1807_v58, %v5347_v14 }
 0x397   : > { %v5977_v59 = vperm.slane %v2317_v12, %v5347_v14  ;;  %v2328_v3 = vsel %vm1079_vm0, %v2327_v11, %v2140_v38  ;;  %v5983_v47 = vperm.slane %v2371_v18, %v5347_v14  ;;  %v5986_v25 = vsel %vm1079_vm0, %v2197_v24, %v2186_v28 }
 0x398   : > { %v2382_v41 = vsel %vm1079_vm0, %v2381_v45, %v2196_v4  ;;  %v1817_v15 = vperm.slane %v1813_v50, %v5347_v14  ;;  %v5991_v39 = vperm.slane %v2328_v3, %v5347_v14  ;;  %v1822_v38 = vperm.slane %v5778_v13, %v5347_v14 }
 0x399   : > { %v2333_v23 = vrot.slane %v5977_v59, 4  ;;  %v6936_v58 = vrot.slane %v5752_v32, 4  ;;  %v6001_v28 = vperm.slane %v2382_v41, %v5347_v14  ;;  %v1831_v24 = vrot.slane %v1811_v57, 4 }
 0x39a   : > { %v1861_v50 = vsel %vm1079_vm0, %v5759_v44, %v5755_v16  ;;  %v1843_v4 = vrot.slane %v1822_v38, 4  ;;  %v6937_v13 = vrot.slane %v5775_v5, 4  ;;  %v2387_v49 = vrot.slane %v5983_v47, 4 }
 0x39b   : > { %v1824_v54 = vsel %vm1079_vm0, %v6936_v58, %v5771_v36  ;;  %v1865_v35 = vperm.slane %v1861_v50, %v5347_v14  ;;  %v1876_v36 = vperm.slane %v5791_v51, %v5347_v14  ;;  %v1832_v11 = vsel %vm1079_vm0, %v1817_v15, %v1831_v24 }
 0x39c   : > { %v1828_v45 = vperm.slane %v1824_v54, %v5347_v14  ;;  %v1867_v32 = vsel %vm1079_vm0, %v6937_v13, %v5921_v21  ;;  %v6938_v16 = vrot.slane %v5787_v20, 4  ;;  %v1840_v43 = vperm.slane %v1832_v11, %v5356_v19 }
 0x39d   : > { %v1871_v61 = vperm.slane %v1867_v32, %v5347_v14  ;;  %v1885_v12 = vrot.slane %v1865_v35, 4  ;;  %v1897_v3 = vrot.slane %v1876_v36, 4  ;;  %v1829_v18 = vrot.slane %v1817_v15, 4 }
 0x39e   : > { %v1878_v44 = vsel %vm1079_vm0, %v6938_v16, %v5784_v29  ;;  %v1844_v5 = vsel %vm1079_vm0, %v1828_v45, %v1843_v4  ;;  %v1841_v41 = vrot.slane %v1828_v45, 4  ;;  %v1859_v58 = vrot.slane %v1840_v43, 4 }
 0x39f   : > { %v1882_v21 = vperm.slane %v1878_v44, %v5347_v14  ;;  %v1852_v51 = vperm.slane %v1844_v5, %v5356_v19  ;;  %v1886_v54 = vsel %vm1079_vm0, %v1871_v61, %v1885_v12  ;;  %v1883_v24 = vrot.slane %v1871_v61, 4 }
 0x3a0   : > { %v1894_v29 = vperm.slane %v1886_v54, %v5356_v19  ;;  %v1830_v4 = vsel %vm1079_vm0, %v1829_v18, %v1811_v57  ;;  %v1842_v15 = vsel %vm1079_vm0, %v1841_v41, %v1822_v38 }
 0x3a1   : > { %v1895_v50 = vrot.slane %v1882_v21, 4  ;;  %v1857_v20 = vrot.slane %v1852_v51, 4  ;;  %v1898_v13 = vsel %vm1079_vm0, %v1882_v21, %v1897_v3  ;;  %v1836_v11 = vperm.slane %v1830_v4, %v5356_v19 }
 0x3a2   : > { %v1906_v32 = vperm.slane %v1898_v13, %v5356_v19  ;;  %v1884_v45 = vsel %vm1079_vm0, %v1883_v24, %v1865_v35  ;;  %v1913_v61 = vrot.slane %v1894_v29, 4  ;;  %v1848_v44 = vperm.slane %v1842_v15, %v5356_v19 }
 0x3a3   : > { %v1858_v16 = vsel %vm1079_vm0, %v1857_v20, %v1840_v43  ;;  %v1890_v5 = vperm.slane %v1884_v45, %v5356_v19  ;;  %v1896_v57 = vsel %vm1079_vm0, %v1895_v50, %v1876_v36  ;;  %v1860_v3 = vsel %vm1079_vm0, %v1852_v51, %v1859_v58 }
 0x3a4   : > { %v1911_v12 = vrot.slane %v1906_v32, 4  ;;  %v2027_v21 = vpack.c.bf16 %v1858_v16, %v1858_v16  ;;  %v1853_v18 = vrot.slane %v1848_v44, 4  ;;  %v1902_v54 = vperm.slane %v1896_v57, %v5356_v19 }
 0x3a5   : > { %v1914_v38 = vsel %vm1079_vm0, %v1906_v32, %v1913_v61  ;;  %v2029_v41 = vpack.c.bf16 %v1860_v3, %v1860_v3  ;;  %v1855_v20 = vrot.slane %v1836_v11, 4  ;;  %v1909_v58 = vrot.slane %v1890_v5, 4 }
 0x3a6   : > { %v1912_v35 = vsel %vm1079_vm0, %v1911_v12, %v1894_v29  ;;  %v2611_v43 = vunpack.c.l.b16 %v2027_v21  ;;  %v2030_v24 = vpack.c.bf16 %v1914_v38, %v1914_v38  ;;  %v1854_v4 = vsel %vm1079_vm0, %v1853_v18, %v1836_v11 }
 0x3a7   : > { %v2028_v13 = vpack.c.bf16 %v1912_v35, %v1912_v35  ;;  %v1907_v15 = vrot.slane %v1902_v54, 4  ;;  %v2641_v45 = vunpack.c.l.b16 %v2029_v41  ;;  %v2023_v16 = vpack.c.bf16 %v1854_v4, %v1854_v4 }
 0x3a8   : > { %v2642_v36 = vunpack.c.l.b16 %v2030_v24  ;;  %v1856_v51 = vsel %vm1079_vm0, %v1848_v44, %v1855_v20  ;;  %v6939_v61 = vrot.slane %v5853_v33, 4  ;;  %v1910_v11 = vsel %vm1079_vm0, %v1902_v54, %v1909_v58 }
 0x3a9   : > { %v2612_v50 = vunpack.c.l.b16 %v2028_v13  ;;  %v1908_v57 = vsel %vm1079_vm0, %v1907_v15, %v1890_v5  ;;  %v2025_v32 = vpack.c.bf16 %v1856_v51, %v1856_v51  ;;  %v2550_v21 = vunpack.c.l.b16 %v2023_v16 }
 0x3aa   : > { %v1744_v29 = vsel %vm1079_vm0, 0.0, %v6939_v61  ;;  %v2024_v12 = vpack.c.bf16 %v1908_v57, %v1908_v57  ;;  %v2643_v3 = vpack.c.b16 %v2642_v36, %v2641_v45  ;;  %v2026_v38 = vpack.c.bf16 %v1910_v11, %v1910_v11 }
 0x3ab   : > { %v2613_v18 = vpack.c.b16 %v2612_v50, %v2611_v43  ;;  %v2581_v41 = vunpack.c.l.b16 %v2025_v32  ;;  %v6940_v35 = vrot.slane %v5843_v1, 4  ;;  %v1915_v20 = vsel %vm1079_vm0, %v5868_v37, %v5853_v33 }
 0x3ac   : > { %v2551_v24 = vunpack.c.l.b16 %v2024_v12  ;;  %v2648_v5 = vsel %vm2553_vm1, %v2643_v3, 0  ;;  %v6941_v13 = vrot.slane %v5889_v40, 4  ;;  %v2582_v43 = vunpack.c.l.b16 %v2026_v38 }
 0x3ad   : > { %v1800_v44 = vsel %vm1079_vm0, 0.0, %v6940_v35  ;;  %v2618_v54 = vsel %vm2553_vm1, %v2613_v18, 0  ;;  %v1919_v15 = vperm.slane %v1915_v20, %v5347_v14  ;;  %v6942_v36 = vrot.slane %v5878_v42, 4 }
 0x3ae   : > { %v1921_v4 = vsel %vm1079_vm0, %v6941_v13, %v1744_v29  ;;  %2627 = vmatpush.bf16.xpose.msra.mxu3 %v2618_v54  ;;  %v2552_v16 = vpack.c.b16 %v2551_v24, %v2550_v21  ;;  %v1951_v37 = vrot.slane %v5892_v34, 4  ;;  %v1969_v33 = vsel %vm1079_vm0, %v5865_v27, %v5843_v1 }
 0x3af   : > { %v1925_v45 = vperm.slane %v1921_v4, %v5347_v14  ;;  %v1932_v51 = vsel %vm1079_vm0, %v6942_v36, %v5871_v62  ;;  %v2583_v40 = vpack.c.b16 %v2582_v43, %v2581_v41  ;;  %v1939_v50 = vrot.slane %v1919_v15, 4 }
 0x3b0   : > { %v1936_v58 = vperm.slane %v1932_v51, %v5347_v14  ;;  %v1973_v57 = vperm.slane %v1969_v33, %v5347_v14  ;;  %v2558_v32 = vsel %vm2553_vm1, %v2552_v16, 0  ;;  %v6943_v61 = vrot.slane %v5875_v22, 4 }
 0x3b1   : > { %v6944_v62 = vrot.slane %v5884_v31, 4  ;;  %v2005_v12 = vrot.slane %v5899_v60, 4  ;;  %2567 = vmatpush.bf16.xpose.msrb.mxu1 %v2558_v32  ;;  %v2588_v1 = vsel %vm2553_vm1, %v2583_v40, 0  ;;  %v1940_v27 = vsel %vm1079_vm0, %v1925_v45, %v1939_v50 }
 0x3b2   : > { %v1975_v42 = vsel %vm1079_vm0, %v6943_v61, %v1800_v44  ;;  %v1952_v21 = vsel %vm1079_vm0, %v1936_v58, %v1951_v37  ;;  %2597 = vmatpush.bf16.xpose.msra.mxu2 %v2588_v1  ;;  %v1948_v22 = vperm.slane %v1940_v27, %v5356_v19  ;;  %v1937_v18 = vrot.slane %v1925_v45, 4 }
 0x3b3   : > { %v1986_v29 = vsel %vm1079_vm0, %v6944_v62, %v5881_v30  ;;  %v1979_v3 = vperm.slane %v1975_v42, %v5347_v14  ;;  %v1960_v11 = vperm.slane %v1952_v21, %v5356_v19  ;;  %v1993_v30 = vrot.slane %v1973_v57, 4 }
 0x3b4   : > { %v1990_v31 = vperm.slane %v1986_v29, %v5347_v14  ;;  %v1949_v38 = vrot.slane %v1936_v58, 4  ;;  %v6089_v35 = vperm.slane %v5971_v2, %v5347_v14  ;;  %v1967_v24 = vrot.slane %v1948_v22, 4 }
 0x3b5   : > { %v1991_v41 = vrot.slane %v1979_v3, 4  ;;  %v1965_v44 = vrot.slane %v1960_v11, 4  ;;  %v1994_v20 = vsel %vm1079_vm0, %v1979_v3, %v1993_v30  ;;  %v6945_v13 = vpack.c.b16 %v5564_v63, %v5556_v48 }
 0x3b6   : > { %v2002_v4 = vperm.slane %v1994_v20, %v5356_v19  ;;  %v1938_v43 = vsel %vm1079_vm0, %v1937_v18, %v1919_v15  ;;  %v1950_v2 = vsel %vm1079_vm0, %v1949_v38, %v5892_v34  ;;  %v6946_v40 = vpack.c.b16 %v5578_v6, %v5567_v56 }
 0x3b7   : > { %4356 = vmatmul.msk.bf16.vlgmr.msra.gmra.mxu3 %vm2553_vm1, %v6945_v13  ;;  %v1966_v45 = vsel %vm1079_vm0, %v1965_v44, %v1948_v22  ;;  %v1944_v16 = vperm.slane %v1938_v43, %v5356_v19  ;;  %v1956_v36 = vperm.slane %v1950_v2, %v5356_v19  ;;  %v1992_v51 = vsel %vm1079_vm0, %v1991_v41, %v1973_v57 }
 0x3b8   : > { %v2021_v63 = vrot.slane %v2002_v4, 4  ;;  %v2035_v37 = vpack.c.bf16 %v1966_v45, %v1966_v45  ;;  %v1998_v33 = vperm.slane %v1992_v51, %v5356_v19  ;;  %4354 = vmatmul.msk.bf16.vlgmr.msrb.gmra.mxu1 %vm2553_vm1, %v6946_v40  ;;  %v2003_v34 = vrot.slane %v1990_v31, 4 }
 0x3b9   : > { %2657 = vmatpush.bf16.xpose.msra.mxu1 %v2648_v5  ;;  %v2006_v5 = vsel %vm1079_vm0, %v1990_v31, %v2005_v12  ;;  %v1961_v15 = vrot.slane %v1956_v36, 4  ;;  %v1968_v58 = vsel %vm1079_vm0, %v1960_v11, %v1967_v24  ;;  %v1963_v50 = vrot.slane %v1944_v16, 4 }
 0x3ba   : > { %v2014_v54 = vperm.slane %v2006_v5, %v5356_v19  ;;  %v2731_v61 = vunpack.c.l.b16 %v2035_v37  ;;  %v6947_v57 = vpack.c.b16 %v5591_v9, %v5589_v0  ;;  %v2037_v62 = vpack.c.bf16 %v1968_v58, %v1968_v58 }
 0x3bb   : > { %v1962_v56 = vsel %vm1079_vm0, %v1961_v15, %v1944_v16  ;;  %v2004_v6 = vsel %vm1079_vm0, %v2003_v34, %v5899_v60  ;;  %v1964_v3 = vsel %vm1079_vm0, %v1956_v36, %v1963_v50  ;;  %v2017_v9 = vrot.slane %v1998_v33, 4 }
 0x3bc   : > { %v2019_v48 = vrot.slane %v2014_v54, 4  ;;  %4355 = vmatmul.msk.bf16.vlgmr.msra.gmra.mxu2 %vm2553_vm1, %v6947_v57  ;;  %v2022_v42 = vsel %vm1079_vm0, %v2014_v54, %v2021_v63  ;;  %v2010_v1 = vperm.slane %v2004_v6, %v5356_v19  ;;  %v2031_v27 = vpack.c.bf16 %v1962_v56, %v1962_v56 }
 0x3bd   : > { %v2038_v12 = vpack.c.bf16 %v2022_v42, %v2022_v42  ;;  %v2761_v21 = vunpack.c.l.b16 %v2037_v62  ;;  %v2033_v11 = vpack.c.bf16 %v1964_v3, %v1964_v3  ;;  %v2334_v18 = vsel %vm1079_vm0, %v2333_v23, %v5965_v26 }
 0x3be   : > { %v2020_v32 = vsel %vm1079_vm0, %v2019_v48, %v2002_v4  ;;  %v2015_v31 = vrot.slane %v2010_v1, 4  ;;  %v2671_v30 = vunpack.c.l.b16 %v2031_v27  ;;  %v2345_v60 = vrot.slane %v5991_v39, 4 }
 0x3bf   : > { %v2036_v29 = vpack.c.bf16 %v2020_v32, %v2020_v32  ;;  %v2762_v0 = vunpack.c.l.b16 %v2038_v12  ;;  %v2018_v44 = vsel %vm1079_vm0, %v2010_v1, %v2017_v9  ;;  %v2701_v24 = vunpack.c.l.b16 %v2033_v11 }
 0x3c0   : > { %v2016_v20 = vsel %vm1079_vm0, %v2015_v31, %v1998_v33  ;;  %v2034_v5 = vpack.c.bf16 %v2018_v44, %v2018_v44  ;;  %v2340_v13 = vperm.slane %v2334_v18, %v5356_v19  ;;  %v2346_v4 = vsel %vm1079_vm0, %v2345_v60, %v6089_v35 }
 0x3c1   : > { %v2732_v22 = vunpack.c.l.b16 %v2036_v29  ;;  %v2763_v41 = vpack.c.b16 %v2762_v0, %v2761_v21  ;;  %v2032_v43 = vpack.c.bf16 %v2016_v20, %v2016_v20  ;;  %v2352_v2 = vperm.slane %v2346_v4, %v5356_v19 }
 0x3c2   : > { %v2702_v45 = vunpack.c.l.b16 %v2034_v5  ;;  %v2359_v16 = vrot.slane %v2340_v13, 4  ;;  %v2380_v36 = vperm.slane %v5986_v25, %v5347_v14  ;;  %v2388_v51 = vsel %vm1079_vm0, %v2387_v49, %v5974_v52 }
 0x3c3   : > { %v2733_v38 = vpack.c.b16 %v2732_v22, %v2731_v61  ;;  %v2768_v23 = vsel %vm2553_vm1, %v2763_v41, 0  ;;  %v2672_v48 = vunpack.c.l.b16 %v2032_v43  ;;  %v2394_v63 = vperm.slane %v2388_v51, %v5356_v19 }
 0x3c4   : > { %2777 = vmatpush.bf16.xpose.msrb.mxu1 %v2768_v23  ;;  %v2399_v37 = vrot.slane %v6001_v28, 4  ;;  %v2335_v33 = vrot.slane %v5965_v26, 4  ;;  %v2703_v40 = vpack.c.b16 %v2702_v45, %v2701_v24  ;;  %v2360_v15 = vsel %vm1079_vm0, %v2352_v2, %v2359_v16 }
 0x3c5   : > { %v2738_v54 = vsel %vm2553_vm1, %v2733_v38, 0  ;;  %v2347_v34 = vrot.slane %v6089_v35, 4  ;;  %v2389_v58 = vrot.slane %v5974_v52, 4  ;;  %v2673_v25 = vpack.c.b16 %v2672_v48, %v2671_v30  ;;  %v6953_v48 = vld [vmem:[#allocation26_spill] sm:$0xff] }
 0x3c6   : > { %2747 = vmatpush.bf16.xpose.msrb.mxu0 %v2738_v54  ;;  %v2400_v50 = vsel %vm1079_vm0, %v2399_v37, %v2380_v36  ;;  %v2413_v32 = vrot.slane %v2394_v63, 4  ;;  %v2529_v61 = vpack.c.bf16 %v2360_v15, %v2360_v15  ;;  %v2708_v49 = vsel %vm2553_vm1, %v2703_v40, 0  ;;  %v6951_v54 = vld [vmem:[#allocation24_spill] sm:$0xff] }
 0x3c7   : > { %v2406_v57 = vperm.slane %v2400_v50, %v5356_v19  ;;  %v2336_v42 = vsel %vm1079_vm0, %v5977_v59, %v2335_v33  ;;  %v2348_v26 = vsel %vm1079_vm0, %v5991_v39, %v2347_v34  ;;  %v2678_v62 = vsel %vm2553_vm1, %v2673_v25, 0  ;;  %2717 = vmatpush.bf16.xpose.msrb.mxu3 %v2708_v49 }
 0x3c8   : > { %v3012_v35 = vunpack.c.l.b16 %v2529_v61  ;;  %v2344_v52 = vperm.slane %v2336_v42, %v5356_v19  ;;  %v2356_v29 = vperm.slane %v2348_v26, %v5356_v19  ;;  %2687 = vmatpush.bf16.xpose.msrb.mxu2 %v2678_v62  ;;  %v2390_v6 = vsel %vm1079_vm0, %v5983_v47, %v2389_v58 }
 0x3c9   : > { %v2414_v56 = vsel %vm1079_vm0, %v2406_v57, %v2413_v32  ;;  %v2401_v12 = vrot.slane %v2380_v36, 4  ;;  %v2357_v1 = vrot.slane %v2352_v2, 4  ;;  %v6948_v59 = vpack.c.b16 %v5627_v10, %v5617_v55 }
 0x3ca   : > { %v2530_v39 = vpack.c.bf16 %v2414_v56, %v2414_v56  ;;  %v2361_v27 = vrot.slane %v2356_v29, 4  ;;  %v2398_v21 = vperm.slane %v2390_v6, %v5356_v19  ;;  %v2411_v3 = vrot.slane %v2406_v57, 4 }
 0x3cb   : > { %v6949_v22 = vpack.c.b16 %v5625_v8, %v5623_v7  ;;  %v2402_v47 = vsel %vm1079_vm0, %v6001_v28, %v2401_v12  ;;  %v2358_v0 = vsel %vm1079_vm0, %v2357_v1, %v2340_v13  ;;  %v2363_v9 = vrot.slane %v2344_v52, 4 }
 0x3cc   : > { %v3013_v11 = vunpack.c.l.b16 %v2530_v39  ;;  %v2362_v55 = vsel %vm1079_vm0, %v2361_v27, %v2344_v52  ;;  %v2410_v10 = vperm.slane %v2402_v47, %v5356_v19  ;;  %v2412_v31 = vsel %vm1079_vm0, %v2411_v3, %v2394_v63  ;;  %v6954_v63 = vld [vmem:[#allocation25_spill] sm:$0xff] }
 0x3cd   : > { %4360 = vmatmul.msk.bf16.vlgmr.msrb.gmra.mxu0 %vm2553_vm1, %v6948_v59  ;;  %4357 = vmatmul.msk.bf16.vlgmr.msra.gmra.mxu1 %vm2553_vm1, %v6949_v22  ;;  %v2531_v30 = vpack.c.bf16 %v2362_v55, %v2362_v55  ;;  %v2527_v18 = vpack.c.bf16 %v2358_v0, %v2358_v0  ;;  %v2528_v60 = vpack.c.bf16 %v2412_v31, %v2412_v31  ;;  %v2417_v41 = vrot.slane %v2398_v21, 4  ;;  %v6956_v55 = vld [vmem:[#allocation23_spill] sm:$0xff]  ;;  %v6958_v31 = vld [vmem:[#allocation20_spill] sm:$0xff] }
 0x3ce   : > { %v2364_v7 = vsel %vm1079_vm0, %v2356_v29, %v2363_v9  ;;  %v3014_v8 = vpack.c.b16 %v3013_v11, %v3012_v35  ;;  %v2415_v38 = vrot.slane %v2410_v10, 4  ;;  %v6950_v20 = vpack.c.b16 %v5650_v53, %v5648_v17 }
 0x3cf   : > { %v2533_v44 = vpack.c.bf16 %v2364_v7, %v2364_v7  ;;  %v2984_v28 = vunpack.c.l.b16 %v2527_v18  ;;  %v2985_v24 = vunpack.c.l.b16 %v2528_v60  ;;  %v3040_v13 = vunpack.c.l.b16 %v2531_v30  ;;  %v6959_v30 = vld [vmem:[#allocation21_spill] sm:$0xff] }
 0x3d0   : > { %4359 = vmatmul.msk.bf16.vlgmr.msrb.gmra.mxu3 %vm2553_vm1, %v6950_v20  ;;  %v2416_v5 = vsel %vm1079_vm0, %v2415_v38, %v2398_v21  ;;  %v2418_v4 = vsel %vm1079_vm0, %v2410_v10, %v2417_v41  ;;  %v6952_v43 = vpack.c.b16 %v5646_v46, %v6951_v54  ;;  %v6955_v37 = vpack.c.b16 %v6953_v48, %v6954_v63  ;;  %v6957_v10 = vld [vmem:[#allocation22_spill] sm:$0xff] }
 0x3d1   : > { %3026 = vmatpush.bf16.msra.mxu3 %v3014_v8  ;;  %v2532_v23 = vpack.c.bf16 %v2416_v5, %v2416_v5  ;;  %v2986_v2 = vpack.c.b16 %v2985_v24, %v2984_v28  ;;  %v2534_v45 = vpack.c.bf16 %v2418_v4, %v2418_v4  ;;  %v3068_v16 = vunpack.c.l.b16 %v2533_v44 }
 0x3d2   : > { %4358 = vmatmul.msk.bf16.vlgmr.msrb.gmra.mxu2 %vm2553_vm1, %v6952_v43 }
 0x3d3   : > { %v3041_v36 = vunpack.c.l.b16 %v2532_v23  ;;  %2998 = vmatpush.bf16.msra.mxu2 %v2986_v2  ;;  %v3069_v17 = vunpack.c.l.b16 %v2534_v45 }
 0x3d5   : > { %v3042_v53 = vpack.c.b16 %v3041_v36, %v3040_v13  ;;  %v3070_v51 = vpack.c.b16 %v3069_v17, %v3068_v16 }
 0x3d7   : > { %3054 = vmatpush.bf16.msra.mxu0 %v3042_v53  ;;  %3082 = vmatpush.bf16.msra.mxu1 %v3070_v51 }
 0x3dd   : > { %4361 = vmatmul.msk.bf16.vlgmr.msrb.gmra.mxu1 %vm2553_vm1, %v6955_v37 }
 0x435   : > { %v6191_v33 = vpop.f32.mrf.mxu1 }
 0x436   : > { %v2785_v62 = vsel %vm2784_vm3, %v6191_v33, -inf }
 0x43a   : > { %v2629_v46 = vpop.f32.mrf.mxu3 }
 0x43b   : > { %v2797_v40 = vsel %vm2784_vm3, %v2629_v46, -inf }
 0x43c   : > { %2798 = vmax.xlane.f32.xlu1 %v2797_v40 }
 0x43d   : > { %v6195_v58 = vpop.f32.mrf.mxu1 }
 0x43e   : > { %v2788_v12 = vsel %vm2784_vm3, %v6195_v58, -inf }
 0x43f   : > { %v2599_v15 = vpop.f32.mrf.mxu2 }
 0x440   : > { %v2791_v34 = vsel %vm2784_vm3, %v2599_v15, -inf }
 0x441   : > { %2792 = vmax.xlane.f32.xlu0 %v2791_v34 }
 0x442   : > { %v6197_v25 = vpop.f32.mrf.mxu3 }
 0x443   : > { %v2800_v32 = vsel %vm2784_vm3, %v6197_v25, -inf }
 0x447   : > { %v6205_v49 = vpop.f32.mrf.mxu2 }
 0x448   : > { %v2794_v6 = vsel %vm2784_vm3, %v6205_v49, -inf }
 0x449   : > { %2801 = vmax.xlane.f32.xlu0 %v2800_v32 }
 0x44a   : > { %v6199_v50 = vpop.f32.mrf.mxu0  ;;  %v6207_v57 = vpop.f32.mrf.mxu1 }
 0x44b   : > { %v2821_v61 = vsel %vm2784_vm3, %v6199_v50, -inf  ;;  %v2803_v27 = vsel %vm2784_vm3, %v6207_v57, -inf }
 0x44c   : > { %2822 = vmax.xlane.f32.xlu2 %v2821_v61 }
 0x452   : > { %v6209_v42 = vpop.f32.mrf.mxu0  ;;  %v6221_v56 = vpop.f32.mrf.mxu1 }
 0x453   : > { %v2824_v26 = vsel %vm2784_vm3, %v6209_v42, -inf  ;;  %v6215_v35 = vpop.f32.mrf.mxu3  ;;  %v2806_v0 = vsel %vm2784_vm3, %v6221_v56, -inf }
 0x454   : > { %2825 = vmax.xlane.f32.xlu1 %v2824_v26  ;;  %2786 = vmax.xlane.f32.xlu2 %v2785_v62  ;;  %v2815_v39 = vsel %vm2784_vm3, %v6215_v35, -inf }
 0x455   : > { %v6217_v52 = vpop.f32.mrf.mxu2 }
 0x456   : > { %v2809_v29 = vsel %vm2784_vm3, %v6217_v52, -inf }
 0x457   : > { %2810 = vmax.xlane.f32.xlu0 %v2809_v29 }
 0x45a   : > { %v6235_v21 = vpop.f32.mrf.mxu1 }
 0x45b   : > { %v6227_v1 = vpop.f32.mrf.mxu3  ;;  %v2827_v3 = vsel %vm2784_vm3, %v6235_v21, -inf }
 0x45c   : > { %2795 = vmax.xlane.f32.xlu2 %v2794_v6  ;;  %2789 = vmax.xlane.f32.xlu1 %v2788_v12  ;;  %v2818_v59 = vsel %vm2784_vm3, %v6227_v1, -inf }
 0x45d   : > { %v6239_v22 = vpop.f32.mrf.mxu2 }
 0x45e   : > { %v2812_v47 = vsel %vm2784_vm3, %v6239_v22, -inf }
 0x45f   : > { %2819 = vmax.xlane.f32.xlu0 %v2818_v59 }
 0x462   : > { %v6245_v9 = vpop.f32.mrf.mxu1 }
 0x463   : > { %v2830_v11 = vsel %vm2784_vm3, %v6245_v9, -inf }
 0x464   : > { %2816 = vmax.xlane.f32.xlu1 %v2815_v39  ;;  %2804 = vmax.xlane.f32.xlu2 %v2803_v27 }
 0x467   : > { %2828 = vmax.xlane.f32.xlu0 %v2827_v3 }
 0x46c   : > { %2813 = vmax.xlane.f32.xlu2 %v2812_v47  ;;  %2807 = vmax.xlane.f32.xlu1 %v2806_v0 }
 0x474   : > { %2831 = vmax.xlane.f32.xlu2 %v2830_v11 }
 0x47b   : > { %4633 = vrot.lane.b32.xlu0 %v6956_v55, %s4971_s22 }
 0x483   : > { %4638 = vrot.lane.b32.xlu0 %v6957_v10, %s4971_s22 }
 0x485   : > { %4623 = vrot.lane.b32.xlu1 %v6958_v31, %s4971_s22 }
 0x48c   : > { %4628 = vrot.lane.b32.xlu2 %v6959_v30, %s4971_s22  ;;  %s6966_s22 = sld [smem:[#allocation36_spill]] (!%p4408_p3) }
 0x4af   : > { %v2799_v18 = vpop.xlane.xlu1 %2798 }
 0x4b0   : > { %v2837_v60 = vsub.f32 %v2629_v46, %v2799_v18 }
 0x4b2   : > { %v2857_v7 = vmul.f32 1.442695, %v2837_v60 }
 0x4b4   : > { %v2793_v8 = vpop.xlane.xlu0 %2792  ;;  %4689 = vpow2.f32 %v2857_v7 }
 0x4b5   : > { %v2835_v38 = vsub.f32 %v2599_v15, %v2793_v8 }
 0x4b7   : > { %v2853_v41 = vmul.f32 1.442695, %v2835_v38 }
 0x4b9   : > { %4691 = vpow2.f32 %v2853_v41 }
 0x4ba   : > { %v6257_v44 = vpop.eup %4689 }
 0x4bb   : > { %v2893_v28 = vsel %vm2784_vm3, %v6257_v44, 0.0 }
 0x4bc   : > { %2894 = vadd.xlane.f32.xlu2 %v2893_v28  ;;  %v2802_v13 = vpop.xlane.xlu0 %2801 }
 0x4bd   : > { %v2838_v2 = vsub.f32 %v6197_v25, %v2802_v13 }
 0x4bf   : > { %v2823_v24 = vpop.xlane.xlu2 %2822  ;;  %v6261_v20 = vpop.eup %4691  ;;  %v2859_v16 = vmul.f32 1.442695, %v2838_v2 }
 0x4c0   : > { %v2887_v5 = vsel %vm2784_vm3, %v6261_v20, 0.0 }
 0x4c1   : > { %2888 = vadd.xlane.f32.xlu0 %v2887_v5 }
 0x4c7   : > { %v2826_v4 = vpop.xlane.xlu1 %2825  ;;  %v2787_v54 = vpop.xlane.xlu2 %2786 }
 0x4c8   : > { %v2833_v43 = vsub.f32 %v6191_v33, %v2787_v54 }
 0x4ca   : > { %v2849_v23 = vmul.f32 1.442695, %v2833_v43  ;;  %v2811_v45 = vpop.xlane.xlu0 %2810 }
 0x4cb   : > { %v2841_v61 = vsub.f32 %v6217_v52, %v2811_v45  ;;  %v2846_v52 = vsub.f32 %v6209_v42, %v2826_v4 }
 0x4cc   : > { %4693 = vpow2.f32 %v2849_v23 }
 0x4cd   : > { %4695 = vpow2.f32 %v2859_v16  ;;  %v2875_v10 = vmul.f32 1.442695, %v2846_v52 }
 0x4cf   : > { %v2796_v36 = vpop.xlane.xlu2 %2795  ;;  %v2790_v17 = vpop.xlane.xlu1 %2789 }
 0x4d0   : > { %v2834_v53 = vsub.f32 %v6195_v58, %v2790_v17  ;;  %v2836_v63 = vsub.f32 %v6205_v49, %v2796_v36  ;;  %v2845_v49 = vsub.f32 %v6199_v50, %v2823_v24 }
 0x4d2   : > { %v2851_v51 = vmul.f32 1.442695, %v2834_v53  ;;  %v6268_v48 = vpop.eup %4693  ;;  %v2855_v33 = vmul.f32 1.442695, %v2836_v63  ;;  %v2820_v15 = vpop.xlane.xlu0 %2819  ;;  %v2873_v12 = vmul.f32 1.442695, %v2845_v49 }
 0x4d3   : > { %v2881_v37 = vsel %vm2784_vm3, %v6268_v48, 0.0  ;;  %v6274_v25 = vpop.eup %4695  ;;  %v2844_v50 = vsub.f32 %v6227_v1, %v2820_v15 }
 0x4d4   : > { %4697 = vpow2.f32 %v2851_v51  ;;  %2882 = vadd.xlane.f32.xlu1 %v2881_v37  ;;  %v2896_v26 = vsel %vm2784_vm3, %v6274_v25, 0.0 }
 0x4d5   : > { %4699 = vpow2.f32 %v2855_v33  ;;  %v2871_v1 = vmul.f32 1.442695, %v2844_v50 }
 0x4d7   : > { %v2817_v46 = vpop.xlane.xlu1 %2816  ;;  %v2805_v40 = vpop.xlane.xlu2 %2804 }
 0x4d8   : > { %v2839_v34 = vsub.f32 %v6207_v57, %v2805_v40  ;;  %v2865_v57 = vmul.f32 1.442695, %v2841_v61  ;;  %v2843_v0 = vsub.f32 %v6215_v35, %v2817_v46 }
 0x4da   : > { %v2861_v58 = vmul.f32 1.442695, %v2839_v34  ;;  %v6276_v32 = vpop.eup %4697  ;;  %v2829_v3 = vpop.xlane.xlu0 %2828  ;;  %v2869_v31 = vmul.f32 1.442695, %v2843_v0 }
 0x4db   : > { %v2884_v62 = vsel %vm2784_vm3, %v6276_v32, 0.0  ;;  %v6285_v39 = vpop.eup %4699  ;;  %v2847_v42 = vsub.f32 %v6235_v21, %v2829_v3 }
 0x4dc   : > { %4701 = vpow2.f32 %v2861_v58  ;;  %2897 = vadd.xlane.f32.xlu1 %v2896_v26  ;;  %2885 = vadd.xlane.f32.xlu2 %v2884_v62  ;;  %v2890_v55 = vsel %vm2784_vm3, %v6285_v39, 0.0 }
 0x4dd   : > { %4703 = vpow2.f32 %v2865_v57 }
 0x4de   : > { %4705 = vpow2.f32 %v2873_v12 }
 0x4df   : > { %v2814_v29 = vpop.xlane.xlu2 %2813  ;;  %v2808_v6 = vpop.xlane.xlu1 %2807 }
 0x4e0   : > { %v2840_v59 = vsub.f32 %v6221_v56, %v2808_v6  ;;  %v2842_v11 = vsub.f32 %v6239_v22, %v2814_v29  ;;  %v2877_v22 = vmul.f32 1.442695, %v2847_v42 }
 0x4e2   : > { %v2863_v27 = vmul.f32 1.442695, %v2840_v59  ;;  %v6289_v47 = vpop.eup %4701  ;;  %v2867_v18 = vmul.f32 1.442695, %v2842_v11 }
 0x4e3   : > { %v2899_v56 = vsel %vm2784_vm3, %v6289_v47, 0.0  ;;  %v6298_v35 = vpop.eup %4703 }
 0x4e4   : > { %4707 = vpow2.f32 %v2863_v27  ;;  %2891 = vadd.xlane.f32.xlu1 %v2890_v55  ;;  %2900 = vadd.xlane.f32.xlu2 %v2899_v56  ;;  %v6300_v60 = vpop.eup %4705  ;;  %v2905_v21 = vsel %vm2784_vm3, %v6298_v35, 0.0 }
 0x4e5   : > { %4709 = vpow2.f32 %v2875_v10  ;;  %v2917_v41 = vsel %vm2784_vm3, %v6300_v60, 0.0 }
 0x4e6   : > { %4711 = vpow2.f32 %v2871_v1 }
 0x4e7   : > { %v2832_v30 = vpop.xlane.xlu2 %2831  ;;  %4713 = vpow2.f32 %v2869_v31 }
 0x4e8   : > { %4715 = vpow2.f32 %v2867_v18  ;;  %v2848_v8 = vsub.f32 %v6245_v9, %v2832_v30 }
 0x4e9   : > { %4717 = vpow2.f32 %v2877_v22 }
 0x4ea   : > { %v6302_v7 = vpop.eup %4707  ;;  %v2879_v13 = vmul.f32 1.442695, %v2848_v8 }
 0x4eb   : > { %v2902_v38 = vsel %vm2784_vm3, %v6302_v7, 0.0  ;;  %v6311_v24 = vpop.eup %4709 }
 0x4ec   : > { %2906 = vadd.xlane.f32.xlu1 %v2905_v21  ;;  %2903 = vadd.xlane.f32.xlu0 %v2902_v38  ;;  %v6313_v5 = vpop.eup %4711  ;;  %4719 = vpow2.f32 %v2879_v13  ;;  %v2920_v63 = vsel %vm2784_vm3, %v6311_v24, 0.0 }
 0x4ed   : > { %2918 = vadd.xlane.f32.xlu2 %v2917_v41  ;;  %v4634_v28 = vpop.permute.xlu0 %4633  ;;  %v6315_v4 = vpop.eup %4713  ;;  %v2914_v45 = vsel %vm2784_vm3, %v6313_v5, 0.0 }
 0x4ee   : > { %v6317_v54 = vpop.eup %4715  ;;  %v4636_v16 = vunpack.i.h.bf16 %v4634_v28  ;;  %v4635_v36 = vunpack.i.l.bf16 %v4634_v28  ;;  %v2911_v17 = vsel %vm2784_vm3, %v6315_v4, 0.0 }
 0x4ef   : > { %v4629_v9 = vpop.permute.xlu2 %4628  ;;  %v6319_v43 = vpop.eup %4717  ;;  %v2908_v53 = vsel %vm2784_vm3, %v6317_v54, 0.0 }
 0x4f0   : > { %v4631_v23 = vunpack.i.h.bf16 %v4629_v9  ;;  %v4630_v2 = vunpack.i.l.bf16 %v4629_v9  ;;  %v2923_v37 = vsel %vm2784_vm3, %v6319_v43, 0.0  ;;  %v2255_v58 = vrot.slane %v4636_v16, 4 }
 0x4f1   : > { %v2199_v61 = vrot.slane %v4635_v36, 4 }
 0x4f2   : > { %v2269_v33 = vrot.slane %v4631_v23, 4  ;;  %v2213_v46 = vrot.slane %v4630_v2, 4  ;;  %v6333_v12 = vpop.eup %4719 }
 0x4f3   : > { %v2926_v22 = vsel %vm2784_vm3, %v6333_v12, 0.0 }
 0x4f4   : > { %2915 = vadd.xlane.f32.xlu1 %v2914_v45  ;;  %2912 = vadd.xlane.f32.xlu0 %v2911_v17 }
 0x4f5   : > { %2909 = vadd.xlane.f32.xlu2 %v2908_v53  ;;  %v4639_v51 = vpop.permute.xlu0 %4638 }
 0x4f6   : > { %v4641_v15 = vunpack.i.h.bf16 %v4639_v51  ;;  %v4640_v34 = vunpack.i.l.bf16 %v4639_v51 }
 0x4f7   : > { %v4624_v40 = vpop.permute.xlu1 %4623 }
 0x4f8   : > { %v4626_v49 = vunpack.i.h.bf16 %v4624_v40  ;;  %v4625_v26 = vunpack.i.l.bf16 %v4624_v40  ;;  %v2267_v62 = vrot.slane %v4641_v15, 4  ;;  %v2211_v57 = vrot.slane %v4640_v34, 4 }
 0x4f9   : > { %v2214_v29 = vsel %vm1079_vm0, %v4640_v34, %v2213_v46  ;;  %v2270_v6 = vsel %vm1079_vm0, %v4641_v15, %v2269_v33 }
 0x4fa   : > { %v2257_v59 = vrot.slane %v4626_v49, 4  ;;  %v2200_v52 = vsel %vm1079_vm0, %v2199_v61, %v4625_v26  ;;  %v2201_v50 = vrot.slane %v4625_v26, 4  ;;  %v2256_v27 = vsel %vm1079_vm0, %v2255_v58, %v4626_v49 }
 0x4fb   : > { %v2206_v3 = vperm.slane %v2200_v52, %v5347_v14  ;;  %v2262_v0 = vperm.slane %v2256_v27, %v5347_v14  ;;  %v2212_v11 = vsel %vm1079_vm0, %v2211_v57, %v4630_v2  ;;  %v2222_v55 = vperm.slane %v2214_v29, %v5347_v14 }
 0x4fc   : > { %v2202_v56 = vsel %vm1079_vm0, %v4635_v36, %v2201_v50  ;;  %v2258_v10 = vsel %vm1079_vm0, %v4636_v16, %v2257_v59  ;;  %v2218_v42 = vperm.slane %v2212_v11, %v5347_v14  ;;  %v2268_v1 = vsel %vm1079_vm0, %v2267_v62, %v4631_v23  ;;  %2921 = vadd.xlane.f32.xlu0 %v2920_v63 }
 0x4fd   : > { %v2210_v31 = vperm.slane %v2202_v56, %v5347_v14  ;;  %v2225_v30 = vrot.slane %v2206_v3, 4  ;;  %v2266_v18 = vperm.slane %v2258_v10, %v5347_v14  ;;  %2924 = vadd.xlane.f32.xlu1 %v2923_v37  ;;  %v2281_v8 = vrot.slane %v2262_v0, 4  ;;  %2927 = vadd.xlane.f32.xlu2 %v2926_v22 }
 0x4fe   : > { %v2223_v21 = vrot.slane %v2218_v42, 4  ;;  %v2235_v38 = vrot.slane %v2222_v55, 4  ;;  %v2274_v41 = vperm.slane %v2268_v1, %v5347_v14  ;;  %v2278_v23 = vperm.slane %v2270_v6, %v5347_v14 }
 0x4ff   : > { %v2237_v28 = vrot.slane %v2210_v31, 4  ;;  %v2293_v13 = vrot.slane %v2266_v18, 4  ;;  %v2226_v9 = vsel %vm1079_vm0, %v2218_v42, %v2225_v30 }
 0x500   : > { %v2224_v2 = vsel %vm1079_vm0, %v2223_v21, %v2206_v3  ;;  %v2234_v45 = vperm.slane %v2226_v9, %v5356_v19  ;;  %v2236_v16 = vsel %vm1079_vm0, %v2235_v38, %v2210_v31  ;;  %v2279_v36 = vrot.slane %v2274_v41, 4 }
 0x501   : > { %v2230_v17 = vperm.slane %v2224_v2, %v5356_v19  ;;  %v2238_v53 = vsel %vm1079_vm0, %v2222_v55, %v2237_v28  ;;  %v2242_v51 = vperm.slane %v2236_v16, %v5356_v19  ;;  %v2282_v63 = vsel %vm1079_vm0, %v2274_v41, %v2281_v8 }
 0x502   : > { %v2246_v37 = vperm.slane %v2238_v53, %v5356_v19  ;;  %v2249_v33 = vrot.slane %v2234_v45, 4  ;;  %v2280_v46 = vsel %vm1079_vm0, %v2279_v36, %v2262_v0  ;;  %v2290_v40 = vperm.slane %v2282_v63, %v5356_v19 }
 0x503   : > { %v2247_v15 = vrot.slane %v2230_v17, 4  ;;  %v2251_v34 = vrot.slane %v2242_v51, 4  ;;  %v2286_v58 = vperm.slane %v2280_v46, %v5356_v19  ;;  %v2291_v61 = vrot.slane %v2278_v23, 4 }
 0x504   : > { %v2250_v49 = vsel %vm1079_vm0, 0.0, %v2249_v33  ;;  %v2253_v26 = vrot.slane %v2246_v37, 4  ;;  %v2294_v62 = vsel %vm1079_vm0, %v2278_v23, %v2293_v13  ;;  %v2305_v57 = vrot.slane %v2290_v40, 4 }
 0x505   : > { %v2248_v29 = vsel %vm1079_vm0, 0.0, %v2247_v15  ;;  %v2252_v6 = vsel %vm1079_vm0, 0.0, %v2251_v34  ;;  %v2292_v59 = vsel %vm1079_vm0, %v2291_v61, %v2266_v18  ;;  %v2302_v52 = vperm.slane %v2294_v62, %v5356_v19 }
 0x506   : > { %v2254_v50 = vsel %vm1079_vm0, 0.0, %v2253_v26  ;;  %v2298_v27 = vperm.slane %v2292_v59, %v5356_v19  ;;  %v2303_v3 = vrot.slane %v2286_v58, 4  ;;  %v2306_v0 = vsel %vm1079_vm0, 0.0, %v2305_v57 }
 0x507   : > { %v2309_v11 = vrot.slane %v2302_v52, 4  ;;  %v2419_v55 = vsel %vm1079_vm0, %v2249_v33, %v2230_v17  ;;  %v2424_v56 = vrot.slane %v2250_v49, 4  ;;  %v2430_v10 = vsel %vm1079_vm0, %v2253_v26, %v2242_v51 }
 0x508   : > { %v2304_v42 = vsel %vm1079_vm0, 0.0, %v2303_v3  ;;  %v2307_v1 = vrot.slane %v2298_v27, 4  ;;  %v2423_v31 = vperm.slane %v2419_v55, %v5347_v14  ;;  %v2434_v30 = vperm.slane %v2430_v10, %v5347_v14 }
 0x509   : > { %v2310_v18 = vsel %vm1079_vm0, 0.0, %v2309_v11  ;;  %v2435_v22 = vrot.slane %v2254_v50, 4  ;;  %v2473_v8 = vsel %vm1079_vm0, %v2305_v57, %v2286_v58  ;;  %v2478_v21 = vrot.slane %v2306_v0, 4 }
 0x50a   : > { %v2308_v38 = vsel %vm1079_vm0, 0.0, %v2307_v1  ;;  %v2455_v41 = vrot.slane %v2434_v30, 4  ;;  %v2477_v28 = vperm.slane %v2473_v8, %v5347_v14  ;;  %v2484_v13 = vsel %vm1079_vm0, %v2309_v11, %v2298_v27 }
 0x50b   : > { %v2436_v9 = vsel %vm1079_vm0, %v2435_v22, %v2252_v6  ;;  %v2488_v23 = vperm.slane %v2484_v13, %v5347_v14  ;;  %v2489_v2 = vrot.slane %v2310_v18, 4  ;;  %v2425_v45 = vsel %vm1079_vm0, %v2424_v56, %v2248_v29 }
 0x50c   : > { %v2440_v16 = vperm.slane %v2436_v9, %v5347_v14  ;;  %v2429_v36 = vperm.slane %v2425_v45, %v5347_v14  ;;  %v2443_v17 = vrot.slane %v2423_v31, 4  ;;  %v2479_v53 = vsel %vm1079_vm0, %v2478_v21, %v2304_v42 }
 0x50d   : > { %v2490_v51 = vsel %vm1079_vm0, %v2489_v2, %v2308_v38  ;;  %v2509_v63 = vrot.slane %v2488_v23, 4  ;;  %v2483_v37 = vperm.slane %v2479_v53, %v5347_v14  ;;  %v2497_v33 = vrot.slane %v2477_v28, 4 }
 0x50e   : > { %v2494_v46 = vperm.slane %v2490_v51, %v5347_v14  ;;  %v2444_v40 = vsel %vm1079_vm0, %v2429_v36, %v2443_v17  ;;  %v2456_v15 = vsel %vm1079_vm0, %v2440_v16, %v2455_v41  ;;  %v2441_v34 = vrot.slane %v2429_v36, 4 }
 0x50f   : > { %v2452_v58 = vperm.slane %v2444_v40, %v5356_v19  ;;  %v2464_v61 = vperm.slane %v2456_v15, %v5356_v19  ;;  %v2498_v49 = vsel %vm1079_vm0, %v2483_v37, %v2497_v33  ;;  %v2453_v26 = vrot.slane %v2440_v16, 4 }
 0x510   : > { %v2506_v62 = vperm.slane %v2498_v49, %v5356_v19  ;;  %v2510_v57 = vsel %vm1079_vm0, %v2494_v46, %v2509_v63  ;;  %v2442_v29 = vsel %vm1079_vm0, %v2441_v34, %v2423_v31  ;;  %v2495_v6 = vrot.slane %v2483_v37, 4 }
 0x511   : > { %v2469_v59 = vrot.slane %v2464_v61, 4  ;;  %v2518_v52 = vperm.slane %v2510_v57, %v5356_v19  ;;  %v2471_v50 = vrot.slane %v2452_v58, 4  ;;  %v2448_v27 = vperm.slane %v2442_v29, %v5356_v19 }
 0x512   : > { %v2525_v3 = vrot.slane %v2506_v62, 4  ;;  %v2454_v0 = vsel %vm1079_vm0, %v2453_v26, %v2434_v30  ;;  %v2496_v11 = vsel %vm1079_vm0, %v2495_v6, %v2477_v28  ;;  %v2507_v55 = vrot.slane %v2494_v46, 4 }
 0x513   : > { %v2470_v56 = vsel %vm1079_vm0, %v2469_v59, %v2452_v58  ;;  %v2523_v10 = vrot.slane %v2518_v52, 4  ;;  %v2472_v42 = vsel %vm1079_vm0, %v2464_v61, %v2471_v50  ;;  %v2460_v1 = vperm.slane %v2454_v0, %v5356_v19 }
 0x514   : > { %v2539_v31 = vpack.c.bf16 %v2470_v56, %v2470_v56  ;;  %v2526_v18 = vsel %vm1079_vm0, %v2518_v52, %v2525_v3  ;;  %v2541_v22 = vpack.c.bf16 %v2472_v42, %v2472_v42  ;;  %v2502_v8 = vperm.slane %v2496_v11, %v5356_v19 }
 0x515   : > { %v2524_v21 = vsel %vm1079_vm0, %v2523_v10, %v2506_v62  ;;  %v2542_v38 = vpack.c.bf16 %v2526_v18, %v2526_v18  ;;  %v2465_v30 = vrot.slane %v2460_v1, 4  ;;  %v2508_v41 = vsel %vm1079_vm0, %v2507_v55, %v2488_v23 }
 0x516   : > { %v2540_v28 = vpack.c.bf16 %v2524_v21, %v2524_v21  ;;  %v3152_v13 = vunpack.c.l.b16 %v2539_v31  ;;  %v3180_v9 = vunpack.c.l.b16 %v2541_v22  ;;  %v2514_v2 = vperm.slane %v2508_v41, %v5356_v19 }
 0x517   : > { %v3181_v45 = vunpack.c.l.b16 %v2542_v38  ;;  %v2466_v16 = vsel %vm1079_vm0, %v2465_v30, %v2448_v27  ;;  %v2467_v36 = vrot.slane %v2448_v27, 4  ;;  %v2521_v17 = vrot.slane %v2502_v8, 4 }
 0x518   : > { %v3153_v53 = vunpack.c.l.b16 %v2540_v28  ;;  %v2519_v51 = vrot.slane %v2514_v2, 4  ;;  %v2535_v63 = vpack.c.bf16 %v2466_v16, %v2466_v16 }
 0x519   : > { %v3182_v37 = vpack.c.b16 %v3181_v45, %v3180_v9  ;;  %v2468_v33 = vsel %vm1079_vm0, %v2460_v1, %v2467_v36  ;;  %v2522_v46 = vsel %vm1079_vm0, %v2514_v2, %v2521_v17 }
 0x51a   : > { %v3154_v40 = vpack.c.b16 %v3153_v53, %v3152_v13  ;;  %v2520_v23 = vsel %vm1079_vm0, %v2519_v51, %v2502_v8  ;;  %v2537_v15 = vpack.c.bf16 %v2468_v33, %v2468_v33  ;;  %v3096_v58 = vunpack.c.l.b16 %v2535_v63 }
 0x51b   : > { %3194 = vmatpush.bf16.msrb.mxu1 %v3182_v37  ;;  %v2536_v34 = vpack.c.bf16 %v2520_v23, %v2520_v23  ;;  %v2538_v61 = vpack.c.bf16 %v2522_v46, %v2522_v46 }
 0x51c   : > { %3166 = vmatpush.bf16.msrb.mxu0 %v3154_v40  ;;  %v3124_v49 = vunpack.c.l.b16 %v2537_v15 }
 0x51d   : > { %v3097_v26 = vunpack.c.l.b16 %v2536_v34  ;;  %v3125_v62 = vunpack.c.l.b16 %v2538_v61 }
 0x51f   : > { %v3098_v57 = vpack.c.b16 %v3097_v26, %v3096_v58  ;;  %v3126_v29 = vpack.c.b16 %v3125_v62, %v3124_v49 }
 0x521   : > { %3110 = vmatpush.bf16.msrb.mxu2 %v3098_v57  ;;  %3138 = vmatpush.bf16.msrb.mxu3 %v3126_v29 }
 0x52f   : > { %v2895_v6 = vpop.xlane.xlu2 %2894 }
 0x530   : > { %4721 = vrcp.f32 %v2895_v6 }
 0x534   : > { %v2889_v52 = vpop.xlane.xlu0 %2888 }
 0x536   : > { %v4722_v3 = vpop.eup %4721 }
 0x537   : > { %v2949_v11 = vmul.f32 %v4722_v3, %v6257_v44 }
 0x539   : > { %v2965_v42 = vpack.c.bf16 %v2949_v11, %v2949_v11 }
 0x53b   : > { %v3035_v41 = vunpack.c.l.b16 %v2965_v42 }
 0x547   : > { %v2883_v59 = vpop.xlane.xlu1 %2882 }
 0x548   : > { %4723 = vrcp.f32 %v2883_v59 }
 0x54e   : > { %v4724_v0 = vpop.eup %4723 }
 0x54f   : > { %v2898_v50 = vpop.xlane.xlu1 %2897  ;;  %v2886_v27 = vpop.xlane.xlu2 %2885  ;;  %v2945_v55 = vmul.f32 %v4724_v0, %v6268_v48 }
 0x550   : > { %4725 = vrcp.f32 %v2898_v50 }
 0x551   : > { %4727 = vrcp.f32 %v2886_v27  ;;  %v2961_v8 = vpack.c.bf16 %v2945_v55, %v2945_v55 }
 0x552   : > { %4729 = vrcp.f32 %v2889_v52 }
 0x553   : > { %v2979_v48 = vunpack.c.l.b16 %v2961_v8 }
 0x556   : > { %v4726_v56 = vpop.eup %4725 }
 0x557   : > { %v4728_v10 = vpop.eup %4727  ;;  %v2950_v1 = vmul.f32 %v4726_v56, %v6274_v25  ;;  %v2892_v31 = vpop.xlane.xlu1 %2891 }
 0x558   : > { %v2901_v18 = vpop.xlane.xlu2 %2900  ;;  %v4730_v22 = vpop.eup %4729  ;;  %v2946_v21 = vmul.f32 %v4728_v10, %v6276_v32  ;;  %4731 = vrcp.f32 %v2892_v31 }
 0x559   : > { %v2966_v38 = vpack.c.bf16 %v2950_v1, %v2950_v1  ;;  %v2947_v28 = vmul.f32 %v4730_v22, %v6261_v20  ;;  %4733 = vrcp.f32 %v2901_v18 }
 0x55a   : > { %v2962_v30 = vpack.c.bf16 %v2946_v21, %v2946_v21 }
 0x55b   : > { %v3036_v44 = vunpack.c.l.b16 %v2966_v38  ;;  %v2963_v25 = vpack.c.bf16 %v2947_v28, %v2947_v28 }
 0x55c   : > { %v2980_v13 = vunpack.c.l.b16 %v2962_v30 }
 0x55d   : > { %v3037_v9 = vpack.c.b16 %v3036_v44, %v3035_v41  ;;  %v3007_v20 = vunpack.c.l.b16 %v2963_v25 }
 0x55e   : > { %v4732_v2 = vpop.eup %4731  ;;  %v2981_v45 = vpack.c.b16 %v2980_v13, %v2979_v48 }
 0x55f   : > { %v2948_v16 = vmul.f32 %v4732_v2, %v6285_v39  ;;  %v2907_v36 = vpop.xlane.xlu1 %2906  ;;  %v2904_v17 = vpop.xlane.xlu0 %2903  ;;  %4364 = vmatmul.msk.bf16.vlgmr.msra.gmra.mxu0 %vm2784_vm3, %v3037_v9 }
 0x560   : > { %4362 = vmatmul.msk.bf16.vlgmr.msra.gmra.mxu2 %vm2784_vm3, %v2981_v45  ;;  %v2919_v32 = vpop.xlane.xlu2 %2918  ;;  %v4734_v53 = vpop.eup %4733  ;;  %4735 = vrcp.f32 %v2904_v17 }
 0x561   : > { %v2964_v51 = vpack.c.bf16 %v2948_v16, %v2948_v16  ;;  %v2951_v37 = vmul.f32 %v4734_v53, %v6289_v47  ;;  %4737 = vrcp.f32 %v2907_v36 }
 0x563   : > { %v3008_v63 = vunpack.c.l.b16 %v2964_v51  ;;  %v2967_v23 = vpack.c.bf16 %v2951_v37, %v2951_v37 }
 0x565   : > { %v3009_v33 = vpack.c.b16 %v3008_v63, %v3007_v20  ;;  %v3063_v49 = vunpack.c.l.b16 %v2967_v23 }
 0x566   : > { %v4736_v46 = vpop.eup %4735 }
 0x567   : > { %v2916_v40 = vpop.xlane.xlu1 %2915  ;;  %4363 = vmatmul.msk.bf16.vlgmr.msra.gmra.mxu3 %vm2784_vm3, %v3009_v33  ;;  %v2913_v39 = vpop.xlane.xlu0 %2912  ;;  %v2952_v15 = vmul.f32 %v4736_v46, %v6302_v7 }
 0x568   : > { %4739 = vrcp.f32 %v2916_v40  ;;  %v2910_v34 = vpop.xlane.xlu2 %2909  ;;  %v4738_v58 = vpop.eup %4737 }
 0x569   : > { %4741 = vrcp.f32 %v2913_v39  ;;  %v2968_v61 = vpack.c.bf16 %v2952_v15, %v2952_v15  ;;  %v2953_v47 = vmul.f32 %v4738_v58, %v6298_v35 }
 0x56a   : > { %4743 = vrcp.f32 %v2910_v34 }
 0x56b   : > { %4745 = vrcp.f32 %v2919_v32  ;;  %v3064_v26 = vunpack.c.l.b16 %v2968_v61  ;;  %v2969_v0 = vpack.c.bf16 %v2953_v47, %v2953_v47 }
 0x56d   : > { %v3065_v57 = vpack.c.b16 %v3064_v26, %v3063_v49  ;;  %v3091_v1 = vunpack.c.l.b16 %v2969_v0 }
 0x56e   : > { %v4740_v62 = vpop.eup %4739 }
 0x56f   : > { %v4742_v29 = vpop.eup %4741  ;;  %v2956_v6 = vmul.f32 %v4740_v62, %v6313_v5  ;;  %v2922_v52 = vpop.xlane.xlu0 %2921  ;;  %4365 = vmatmul.msk.bf16.vlgmr.msra.gmra.mxu1 %vm2784_vm3, %v3065_v57 }
 0x570   : > { %v2925_v59 = vpop.xlane.xlu1 %2924  ;;  %v4744_v50 = vpop.eup %4743  ;;  %v2955_v7 = vmul.f32 %v4742_v29, %v6315_v4 }
 0x571   : > { %4747 = vrcp.f32 %v2925_v59  ;;  %v2928_v27 = vpop.xlane.xlu2 %2927  ;;  %v4746_v3 = vpop.eup %4745  ;;  %v2972_v11 = vpack.c.bf16 %v2956_v6, %v2956_v6  ;;  %v2954_v55 = vmul.f32 %v4744_v50, %v6317_v54 }
 0x572   : > { %4749 = vrcp.f32 %v2922_v52  ;;  %v2971_v35 = vpack.c.bf16 %v2955_v7, %v2955_v7  ;;  %v2957_v5 = vmul.f32 %v4746_v3, %v6300_v60 }
 0x573   : > { %4751 = vrcp.f32 %v2928_v27  ;;  %v3120_v56 = vunpack.c.l.b16 %v2972_v11  ;;  %v2970_v10 = vpack.c.bf16 %v2954_v55, %v2954_v55 }
 0x574   : > { %v3119_v42 = vunpack.c.l.b16 %v2971_v35  ;;  %v2973_v30 = vpack.c.bf16 %v2957_v5, %v2957_v5 }
 0x575   : > { %v3092_v31 = vunpack.c.l.b16 %v2970_v10 }
 0x576   : > { %v3121_v18 = vpack.c.b16 %v3120_v56, %v3119_v42  ;;  %v3147_v13 = vunpack.c.l.b16 %v2973_v30 }
 0x577   : > { %v4748_v4 = vpop.eup %4747  ;;  %v3093_v8 = vpack.c.b16 %v3092_v31, %v3091_v1 }
 0x578   : > { %v4750_v22 = vpop.eup %4749  ;;  %v2959_v21 = vmul.f32 %v4748_v4, %v6319_v43  ;;  %4367 = vmatmul.msk.bf16.vlgmr.msrb.gmra.mxu3 %vm2784_vm3, %v3121_v18 }
 0x579   : > { %v4752_v38 = vpop.eup %4751  ;;  %v2958_v54 = vmul.f32 %v4750_v22, %v6311_v24  ;;  %4366 = vmatmul.msk.bf16.vlgmr.msrb.gmra.mxu2 %vm2784_vm3, %v3093_v8 }
 0x57a   : > { %v2975_v41 = vpack.c.bf16 %v2959_v21, %v2959_v21  ;;  %v2960_v28 = vmul.f32 %v4752_v38, %v6333_v12 }
 0x57b   : > { %v2974_v60 = vpack.c.bf16 %v2958_v54, %v2958_v54 }
 0x57c   : > { %v3175_v44 = vunpack.c.l.b16 %v2975_v41  ;;  %v2976_v48 = vpack.c.bf16 %v2960_v28, %v2960_v28 }
 0x57d   : > { %v3148_v9 = vunpack.c.l.b16 %v2974_v60 }
 0x57e   : > { %v3176_v2 = vunpack.c.l.b16 %v2976_v48 }
 0x57f   : > { %v3149_v45 = vpack.c.b16 %v3148_v9, %v3147_v13 }
 0x580   : > { %v3177_v25 = vpack.c.b16 %v3176_v2, %v3175_v44 }
 0x581   : > { %4368 = vmatmul.msk.bf16.vlgmr.msrb.gmra.mxu0 %vm2784_vm3, %v3149_v45 }
 0x582   : > { %4369 = vmatmul.msk.bf16.vlgmr.msrb.gmra.mxu1 %vm2784_vm3, %v3177_v25 }
 0x5dc   : > { %v3056_v24 = vpop.f32.mrf.mxu0 }
 0x5dd   : > { %v3201_v36 = vrot.slane %v3056_v24, 4 }
 0x5e3   : > { %v3000_v43 = vpop.f32.mrf.mxu2 }
 0x5e4   : > { %v3203_v16 = vrot.slane %v3000_v43, 4  ;;  %v3202_v17 = vsel %vm1079_vm0, %v3201_v36, %v3000_v43  ;;  %v3058_v37 = vpop.f32.mrf.mxu0 }
 0x5e5   : > { %v3208_v63 = vperm.slane %v3202_v17, %v5347_v14  ;;  %v3257_v34 = vrot.slane %v3058_v37, 4 }
 0x5e6   : > { %v3204_v12 = vsel %vm1079_vm0, %v3056_v24, %v3203_v16 }
 0x5e7   : > { %v3212_v53 = vperm.slane %v3204_v12, %v5347_v14  ;;  %v3227_v61 = vrot.slane %v3208_v63, 4 }
 0x5e9   : > { %v3239_v23 = vrot.slane %v3212_v53, 4 }
 0x5ea   : > { %v3028_v32 = vpop.f32.mrf.mxu3 }
 0x5eb   : > { %v3002_v51 = vpop.f32.mrf.mxu2  ;;  %v3215_v20 = vrot.slane %v3028_v32, 4 }
 0x5ec   : > { %v3084_v33 = vpop.f32.mrf.mxu1  ;;  %v3259_v46 = vrot.slane %v3002_v51, 4  ;;  %v3258_v62 = vsel %vm1079_vm0, %v3257_v34, %v3002_v51 }
 0x5ed   : > { %v3213_v40 = vrot.slane %v3084_v33, 4  ;;  %v3216_v39 = vsel %vm1079_vm0, %v3084_v33, %v3215_v20  ;;  %v3264_v11 = vperm.slane %v3258_v62, %v5347_v14 }
 0x5ee   : > { %v3224_v15 = vperm.slane %v3216_v39, %v5347_v14  ;;  %v3260_v57 = vsel %vm1079_vm0, %v3058_v37, %v3259_v46 }
 0x5ef   : > { %v3214_v58 = vsel %vm1079_vm0, %v3213_v40, %v3028_v32  ;;  %v3268_v55 = vperm.slane %v3260_v57, %v5347_v14  ;;  %v3283_v30 = vrot.slane %v3264_v11, 4 }
 0x5f0   : > { %v3220_v49 = vperm.slane %v3214_v58, %v5347_v14  ;;  %v3237_v26 = vrot.slane %v3224_v15, 4  ;;  %v3240_v47 = vsel %vm1079_vm0, %v3224_v15, %v3239_v23 }
 0x5f1   : > { %v3248_v29 = vperm.slane %v3240_v47, %v5356_v19  ;;  %v3295_v60 = vrot.slane %v3268_v55, 4 }
 0x5f2   : > { %v3030_v6 = vpop.f32.mrf.mxu3  ;;  %v3225_v59 = vrot.slane %v3220_v49, 4  ;;  %v3228_v52 = vsel %vm1079_vm0, %v3220_v49, %v3227_v61  ;;  %v3238_v50 = vsel %vm1079_vm0, %v3237_v26, %v3212_v53 }
 0x5f3   : > { %v3271_v7 = vrot.slane %v3030_v6, 4  ;;  %v3236_v27 = vperm.slane %v3228_v52, %v5356_v19  ;;  %v3244_v3 = vperm.slane %v3238_v50, %v5356_v19  ;;  %v3255_v0 = vrot.slane %v3248_v29, 4 }
 0x5f4   : > { %v3226_v35 = vsel %vm1079_vm0, %v3225_v59, %v3208_v63  ;;  %v3086_v56 = vpop.f32.mrf.mxu1 }
 0x5f5   : > { %v3232_v10 = vperm.slane %v3226_v35, %v5356_v19  ;;  %v3251_v5 = vrot.slane %v3236_v27, 4  ;;  %v3253_v42 = vrot.slane %v3244_v3, 4  ;;  %v3256_v1 = vsel %vm1079_vm0, 0.0, %v3255_v0 }
 0x5f6   : > { %v3436_v31 = vsel %vm1079_vm0, %v3255_v0, %v3244_v3  ;;  %v3441_v4 = vrot.slane %v3256_v1, 4  ;;  %v3269_v18 = vrot.slane %v3086_v56, 4  ;;  %v3272_v22 = vsel %vm1079_vm0, %v3086_v56, %v3271_v7 }
 0x5f7   : > { %v3249_v8 = vrot.slane %v3232_v10, 4  ;;  %v3252_v21 = vsel %vm1079_vm0, 0.0, %v3251_v5  ;;  %v3254_v38 = vsel %vm1079_vm0, 0.0, %v3253_v42  ;;  %v6465_v54 = vperm.slane %v3436_v31, %v5347_v14 }
 0x5f8   : > { %v3442_v41 = vsel %vm1079_vm0, %v3441_v4, %v3254_v38  ;;  %v3270_v28 = vsel %vm1079_vm0, %v3269_v18, %v3030_v6  ;;  %v3430_v44 = vrot.slane %v3252_v21, 4  ;;  %v3280_v13 = vperm.slane %v3272_v22, %v5347_v14 }
 0x5f9   : > { %v3276_v48 = vperm.slane %v3270_v28, %v5347_v14  ;;  %v3425_v9 = vsel %vm1079_vm0, %v3251_v5, %v3232_v10  ;;  %v6473_v2 = vperm.slane %v3442_v41, %v5347_v14  ;;  %v3461_v45 = vrot.slane %v6465_v54, 4 }
 0x5fa   : > { %v3250_v24 = vsel %vm1079_vm0, 0.0, %v3249_v8  ;;  %v3293_v36 = vrot.slane %v3280_v13, 4  ;;  %v3296_v12 = vsel %vm1079_vm0, %v3280_v13, %v3295_v60  ;;  %v6491_v47 = vperm.slane %v3425_v9, %v5347_v14 }
 0x5fb   : > { %v3140_v25 = vpop.f32.mrf.mxu3  ;;  %v3281_v43 = vrot.slane %v3276_v48, 4  ;;  %v3284_v16 = vsel %vm1079_vm0, %v3276_v48, %v3283_v30  ;;  %v3304_v53 = vperm.slane %v3296_v12, %v5356_v19  ;;  %v3431_v39 = vsel %vm1079_vm0, %v3430_v44, %v3250_v24 }
 0x5fc   : > { %v3112_v17 = vpop.f32.mrf.mxu2  ;;  %v3292_v32 = vperm.slane %v3284_v16, %v5356_v19  ;;  %v3327_v20 = vrot.slane %v3140_v25, 4  ;;  %v3294_v33 = vsel %vm1079_vm0, %v3293_v36, %v3268_v55  ;;  %v6496_v6 = vperm.slane %v3431_v39, %v5347_v14 }
 0x5fd   : > { %v3315_v51 = vrot.slane %v3112_v17, 4  ;;  %v3282_v37 = vsel %vm1079_vm0, %v3281_v43, %v3264_v11  ;;  %v3300_v15 = vperm.slane %v3294_v33, %v5356_v19  ;;  %v3311_v58 = vrot.slane %v3304_v53, 4 }
 0x5fe   : > { %v3168_v63 = vpop.f32.mrf.mxu0  ;;  %v6485_v23 = vperm.slane %v3282_v37, %v5356_v19  ;;  %v3307_v34 = vrot.slane %v3292_v32, 4 }
 0x5ff   : > { %v3313_v46 = vrot.slane %v3168_v63, 4  ;;  %v3196_v40 = vpop.f32.mrf.mxu1  ;;  %v3316_v49 = vsel %vm1079_vm0, %v3168_v63, %v3315_v51  ;;  %v3309_v62 = vrot.slane %v3300_v15, 4  ;;  %v3312_v57 = vsel %vm1079_vm0, 0.0, %v3311_v58 }
 0x600   : > { %v3325_v26 = vrot.slane %v3196_v40, 4  ;;  %v3328_v29 = vsel %vm1079_vm0, %v3196_v40, %v3327_v20  ;;  %v3305_v59 = vrot.slane %v6485_v23, 4  ;;  %v6500_v52 = vsel %vm1079_vm0, 0.0, %v3307_v34 }
 0x601   : > { %v3314_v61 = vsel %vm1079_vm0, %v3313_v46, %v3112_v17  ;;  %v3490_v50 = vsel %vm1079_vm0, %v3311_v58, %v3300_v15  ;;  %v3495_v7 = vrot.slane %v3312_v57, 4  ;;  %v3310_v27 = vsel %vm1079_vm0, 0.0, %v3309_v62 }
 0x602   : > { %v6505_v3 = vperm.slane %v3490_v50, %v5347_v14  ;;  %v3320_v0 = vperm.slane %v3314_v61, %v5347_v14  ;;  %v3324_v11 = vperm.slane %v3316_v49, %v5347_v14  ;;  %v3479_v35 = vsel %vm1079_vm0, %v3307_v34, %v6485_v23 }
 0x603   : > { %v3142_v55 = vpop.f32.mrf.mxu3  ;;  %v3496_v56 = vsel %vm1079_vm0, %v3495_v7, %v3310_v27  ;;  %v3326_v10 = vsel %vm1079_vm0, %v3325_v26, %v3140_v25  ;;  %v3336_v5 = vperm.slane %v3328_v29, %v5347_v14  ;;  %v3484_v1 = vrot.slane %v6500_v52, 4 }
 0x604   : > { %v3114_v42 = vpop.f32.mrf.mxu2  ;;  %v3339_v31 = vrot.slane %v3320_v0, 4  ;;  %v3351_v4 = vrot.slane %v3324_v11, 4  ;;  %v3383_v18 = vrot.slane %v3142_v55, 4  ;;  %v3332_v8 = vperm.slane %v3326_v10, %v5347_v14 }
 0x605   : > { %v3349_v21 = vrot.slane %v3336_v5, 4  ;;  %v3371_v38 = vrot.slane %v3114_v42, 4  ;;  %v6517_v28 = vperm.slane %v3496_v56, %v5347_v14  ;;  %v3515_v60 = vrot.slane %v6505_v3, 4 }
 0x606   : > { %v3170_v22 = vpop.f32.mrf.mxu0  ;;  %v3352_v44 = vsel %vm1079_vm0, %v3336_v5, %v3351_v4  ;;  %v3337_v13 = vrot.slane %v3332_v8, 4  ;;  %v3340_v9 = vsel %vm1079_vm0, %v3332_v8, %v3339_v31  ;;  %v3306_v61 = vsel %vm1079_vm0, 0.0, %v3305_v59 }
 0x607   : > { %v3369_v30 = vrot.slane %v3170_v22, 4  ;;  %v3198_v41 = vpop.f32.mrf.mxu1  ;;  %v3350_v25 = vsel %vm1079_vm0, %v3349_v21, %v3324_v11  ;;  %v3360_v24 = vperm.slane %v3352_v44, %v5356_v19  ;;  %v3348_v43 = vperm.slane %v3340_v9, %v5356_v19 }
 0x608   : > { %v3381_v48 = vrot.slane %v3198_v41, 4  ;;  %v3356_v16 = vperm.slane %v3350_v25, %v5356_v19  ;;  %v3372_v12 = vsel %vm1079_vm0, %v3170_v22, %v3371_v38  ;;  %v3338_v17 = vsel %vm1079_vm0, %v3337_v13, %v3320_v0 }
 0x609   : > { %v3370_v36 = vsel %vm1079_vm0, %v3369_v30, %v3114_v42  ;;  %v3367_v32 = vrot.slane %v3360_v24, 4  ;;  %v3380_v51 = vperm.slane %v3372_v12, %v5347_v14  ;;  %v6532_v20 = vperm.slane %v3338_v17, %v5356_v19 }
 0x60a   : > { %v3376_v53 = vperm.slane %v3370_v36, %v5347_v14  ;;  %v3363_v63 = vrot.slane %v3348_v43, 4  ;;  %v3365_v37 = vrot.slane %v3356_v16, 4  ;;  %v3382_v33 = vsel %vm1079_vm0, %v3381_v48, %v3142_v55 }
 0x60b   : > { %v3368_v46 = vsel %vm1079_vm0, 0.0, %v3367_v32  ;;  %v3544_v40 = vsel %vm1079_vm0, %v3367_v32, %v3356_v16  ;;  %v3384_v23 = vsel %vm1079_vm0, %v3198_v41, %v3383_v18  ;;  %v3361_v15 = vrot.slane %v6532_v20, 4 }
 0x60c   : > { %v3395_v39 = vrot.slane %v3376_v53, 4  ;;  %v6540_v34 = vsel %vm1079_vm0, 0.0, %v3363_v63  ;;  %v3407_v58 = vrot.slane %v3380_v51, 4  ;;  %v3366_v49 = vsel %vm1079_vm0, 0.0, %v3365_v37 }
 0x60d   : > { %v6546_v26 = vsel %vm1079_vm0, %v3363_v63, %v6532_v20  ;;  %v3549_v62 = vrot.slane %v3368_v46, 4  ;;  %v3388_v57 = vperm.slane %v3382_v33, %v5347_v14  ;;  %v6550_v29 = vperm.slane %v3544_v40, %v5347_v14 }
 0x60e   : > { %v3392_v50 = vperm.slane %v3384_v23, %v5347_v14  ;;  %v3449_v7 = vrot.slane %v6491_v47, 4  ;;  %v3462_v59 = vsel %vm1079_vm0, %v6473_v2, %v3461_v45  ;;  %v3538_v27 = vrot.slane %v6540_v34, 4 }
 0x60f   : > { %v3393_v0 = vrot.slane %v3388_v57, 4  ;;  %v3396_v11 = vsel %vm1079_vm0, %v3388_v57, %v3395_v39  ;;  %v3483_v55 = vperm.slane %v3479_v35, %v5347_v14  ;;  %v3550_v56 = vsel %vm1079_vm0, %v3549_v62, %v3366_v49 }
 0x610   : > { %v3404_v10 = vperm.slane %v3396_v11, %v5356_v19  ;;  %v3405_v5 = vrot.slane %v3392_v50, 4  ;;  %v3408_v42 = vsel %vm1079_vm0, %v3392_v50, %v3407_v58  ;;  %v3450_v45 = vsel %vm1079_vm0, %v6496_v6, %v3449_v7 }
 0x611   : > { %v3394_v31 = vsel %vm1079_vm0, %v3393_v0, %v3376_v53  ;;  %v3416_v4 = vperm.slane %v3408_v42, %v5356_v19  ;;  %v3470_v18 = vperm.slane %v3462_v59, %v5356_v19  ;;  %v3569_v22 = vrot.slane %v6550_v29, 4 }
 0x612   : > { %v3400_v35 = vperm.slane %v3394_v31, %v5356_v19  ;;  %v3406_v8 = vsel %vm1079_vm0, %v3405_v5, %v3380_v51  ;;  %v3419_v21 = vrot.slane %v3404_v10, 4  ;;  %v6573_v38 = vperm.slane %v3550_v56, %v5347_v14 }
 0x613   : > { %v3412_v30 = vperm.slane %v3406_v8, %v5356_v19  ;;  %v3423_v41 = vrot.slane %v3416_v4, 4  ;;  %v3485_v44 = vsel %vm1079_vm0, %v3484_v1, %v3306_v61  ;;  %v3458_v9 = vperm.slane %v3450_v45, %v5356_v19 }
 0x614   : > { %v3417_v48 = vrot.slane %v3400_v35, 4  ;;  %v3420_v13 = vsel %vm1079_vm0, 0.0, %v3419_v21  ;;  %v3475_v25 = vrot.slane %v3470_v18, 4  ;;  %v3489_v36 = vperm.slane %v3485_v44, %v5347_v14 }
 0x615   : > { %v3421_v24 = vrot.slane %v3412_v30, 4  ;;  %v3424_v43 = vsel %vm1079_vm0, 0.0, %v3423_v41  ;;  %v3598_v16 = vsel %vm1079_vm0, %v3423_v41, %v3412_v30  ;;  %v3587_v12 = vsel %vm1079_vm0, %v3419_v21, %v3400_v35 }
 0x616   : > { %v3592_v17 = vrot.slane %v3420_v13, 4  ;;  %v6586_v52 = vperm.slane %v3598_v16, %v5347_v14  ;;  %v3603_v1 = vrot.slane %v3424_v43, 4  ;;  %v3418_v32 = vsel %vm1079_vm0, 0.0, %v3417_v48 }
 0x617   : > { %v3422_v53 = vsel %vm1079_vm0, 0.0, %v3421_v24  ;;  %v3503_v51 = vrot.slane %v3483_v55, 4  ;;  %v3516_v63 = vsel %vm1079_vm0, %v6517_v28, %v3515_v60  ;;  %v3477_v46 = vrot.slane %v3458_v9, 4 }
 0x618   : > { %v3604_v37 = vsel %vm1079_vm0, %v3603_v1, %v3422_v53  ;;  %v3524_v33 = vperm.slane %v3516_v63, %v5356_v19  ;;  %v3447_v40 = vrot.slane %v6496_v6, 4  ;;  %v3623_v39 = vrot.slane %v6586_v52, 4 }
 0x619   : > { %v3476_v23 = vsel %vm1079_vm0, %v3475_v25, %v3458_v9  ;;  %v3504_v58 = vsel %vm1079_vm0, %v3489_v36, %v3503_v51  ;;  %v3459_v61 = vrot.slane %v6473_v2, 4  ;;  %v3501_v57 = vrot.slane %v3489_v36, 4 }
 0x61a   : > { %v3512_v49 = vperm.slane %v3504_v58, %v5356_v19  ;;  %v3529_v62 = vrot.slane %v3524_v33, 4  ;;  %v3448_v60 = vsel %vm1079_vm0, %v3447_v40, %v6491_v47  ;;  %v3608_v50 = vperm.slane %v3604_v37, %v5347_v14 }
 0x61b   : > { %v6606_v7 = vperm.slane %v3448_v60, %v5356_v19  ;;  %v3460_v6 = vsel %vm1079_vm0, %v3459_v61, %v6465_v54  ;;  %v3513_v59 = vrot.slane %v6517_v28, 4  ;;  %v3478_v2 = vsel %vm1079_vm0, %v3470_v18, %v3477_v46 }
 0x61c   : > { %v3530_v0 = vsel %vm1079_vm0, %v3529_v62, %v3512_v49  ;;  %v3531_v11 = vrot.slane %v3512_v49, 4  ;;  %v3502_v56 = vsel %vm1079_vm0, %v3501_v57, %v3483_v55  ;;  %v3466_v54 = vperm.slane %v3460_v6, %v5356_v19 }
 0x61d   : > { %v4647_v10 = vpack.i.bf16 %v3530_v0, %v3476_v23  ;;  %v3473_v47 = vrot.slane %v6606_v7, 4  ;;  %v3508_v5 = vperm.slane %v3502_v56, %v5356_v19  ;;  %v3514_v42 = vsel %vm1079_vm0, %v3513_v59, %v6505_v3 }
 0x61e   : > { %v3532_v31 = vsel %vm1079_vm0, %v3524_v33, %v3531_v11  ;;  %v3362_v28 = vsel %vm1079_vm0, 0.0, %v3361_v15  ;;  %v3537_v4 = vperm.slane %v6546_v26, %v5347_v14  ;;  %v3520_v45 = vperm.slane %v3514_v42, %v5356_v19 }
 0x61f   : > { %4648 = vrot.lane.b32.xlu1 %v4647_v10, %s4972_s30  ;;  %v4652_v55 = vpack.i.bf16 %v3532_v31, %v3478_v2  ;;  %v3527_v18 = vrot.slane %v3508_v5, 4  ;;  %v3539_v3 = vsel %vm1079_vm0, %v3538_v27, %v3362_v28  ;;  %v3474_v35 = vsel %vm1079_vm0, %v3466_v54, %v3473_v47  ;;  %v4426_v10 = vld [vmem:[%s5205_s2 + $0x8] sm:$0xff]  ;;  %v4425_v47 = vld [vmem:[%s5205_s2] sm:$0xff] }
 0x620   : > { %v3543_v20 = vperm.slane %v3539_v3, %v5347_v14  ;;  %v3557_v8 = vrot.slane %v3537_v4, 4  ;;  %v3570_v15 = vsel %vm1079_vm0, %v6573_v38, %v3569_v22  ;;  %v3591_v30 = vperm.slane %v3587_v12, %v5347_v14  ;;  %3736 = vmatpush.bf16.msra.mxu2 %v4426_v10 }
 0x621   : > { %4653 = vrot.lane.b32.xlu2 %v4652_v55, %s4973_s0  ;;  %v3528_v26 = vsel %vm1079_vm0, %v3520_v45, %v3527_v18  ;;  %v3578_v21 = vperm.slane %v3570_v15, %v5356_v19  ;;  %v3593_v34 = vsel %vm1079_vm0, %v3592_v17, %v3418_v32  ;;  %v3624_v48 = vsel %vm1079_vm0, %v3608_v50, %v3623_v39 }
 0x622   : > { %v4642_v27 = vpack.i.bf16 %v3528_v26, %v3474_v35  ;;  %v3558_v41 = vsel %vm1079_vm0, %v3543_v20, %v3557_v8  ;;  %v3597_v44 = vperm.slane %v3593_v34, %v5347_v14  ;;  %v3611_v9 = vrot.slane %v3591_v30, 4 }
 0x623   : > { %v3566_v22 = vperm.slane %v3558_v41, %v5356_v19  ;;  %v3583_v13 = vrot.slane %v3578_v21, 4  ;;  %v3632_v25 = vperm.slane %v3624_v48, %v5356_v19  ;;  %v3555_v24 = vrot.slane %v3543_v20, 4 }
 0x624   : > { %4643 = vrot.lane.b32.xlu0 %v4642_v27, %s4974_s14  ;;  %v3567_v43 = vrot.slane %v6573_v38, 4  ;;  %v3609_v16 = vrot.slane %v3597_v44, 4  ;;  %v3621_v36 = vrot.slane %v3608_v50, 4  ;;  %v3471_v12 = vrot.slane %v3466_v54, 4  ;;  %3737 = vmatpush.bf16.msra.mxu2 %v4425_v47 }
 0x625   : > { %v3525_v17 = vrot.slane %v3520_v45, 4  ;;  %v3612_v14 = vsel %vm1079_vm0, %v3597_v44, %v3611_v9  ;;  %v3637_v1 = vrot.slane %v3632_v25, 4  ;;  %v3556_v53 = vsel %vm1079_vm0, %v3555_v24, %v3537_v4 }
 0x626   : > { %v3620_v32 = vperm.slane %v3612_v14, %v5356_v19  ;;  %v3568_v51 = vsel %vm1079_vm0, %v3567_v43, %v6550_v29  ;;  %v3610_v63 = vsel %vm1079_vm0, %v3609_v16, %v3591_v30  ;;  %v3562_v37 = vperm.slane %v3556_v53, %v5356_v19  ;;  %v4674_v14 = vld [vmem:[%s6960_s1] ss:$0 sm:$0xff] }
 0x627   : > { %v3574_v38 = vperm.slane %v3568_v51, %v5356_v19  ;;  %v3616_v33 = vperm.slane %v3610_v63, %v5356_v19  ;;  %v3622_v46 = vsel %vm1079_vm0, %v3621_v36, %v6586_v52  ;;  %v3584_v40 = vsel %vm1079_vm0, %v3583_v13, %v3566_v22  ;;  %v4769_v53 = vld [vmem:[#allocation2] sm:$0xff] }
 0x628   : > { %v3638_v39 = vsel %vm1079_vm0, %v3637_v1, %v3620_v32  ;;  %v3628_v23 = vperm.slane %v3622_v46, %v5356_v19  ;;  %v3581_v29 = vrot.slane %v3562_v37, 4  ;;  %v3472_v60 = vsel %vm1079_vm0, %v3471_v12, %v6606_v7 }
 0x629   : > { %v4657_v58 = vpack.i.bf16 %v3638_v39, %v3584_v40  ;;  %v3579_v61 = vrot.slane %v3574_v38, 4  ;;  %v3635_v49 = vrot.slane %v3616_v33, 4  ;;  %v3526_v57 = vsel %vm1079_vm0, %v3525_v17, %v3508_v5 }
 0x62a   : > { %v3633_v62 = vrot.slane %v3628_v23, 4  ;;  %v3582_v52 = vsel %vm1079_vm0, %v3574_v38, %v3581_v29  ;;  %v3639_v0 = vrot.slane %v3620_v32, 4  ;;  %v3585_v2 = vrot.slane %v3566_v22, 4 }
 0x62b   : > { %4658 = vrot.lane.b32.xlu1 %v4657_v58, %s4972_s30  ;;  %v3636_v50 = vsel %vm1079_vm0, %v3628_v23, %v3635_v49  ;;  %v3580_v19 = vsel %vm1079_vm0, %v3579_v61, %v3562_v37  ;;  %v4771_v58 = vld [vmem:[#allocation2 + $0x10] sm:$0xff] }
 0x62c   : > { %v4662_v6 = vpack.i.bf16 %v3636_v50, %v3582_v52  ;;  %v3634_v59 = vsel %vm1079_vm0, %v3633_v62, %v3616_v33  ;;  %v3640_v7 = vsel %vm1079_vm0, %v3632_v25, %v3639_v0  ;;  %v3586_v11 = vsel %vm1079_vm0, %v3578_v21, %v3585_v2  ;;  %v4770_v33 = vld [vmem:[#allocation2 + $0x8] sm:$0xff] }
 0x62d   : > { %v4667_v56 = vpack.i.bf16 %v3640_v7, %v3586_v11 }
 0x62e   : > { %4663 = vrot.lane.b32.xlu0 %v4662_v6, %s4974_s14 }
 0x636   : > { %4668 = vrot.lane.b32.xlu0 %v4667_v56, %s4973_s0 }
 0x67b   : > { %v4654_v42 = vpop.permute.xlu2 %4653 }
 0x67c   : > { %v4656_v45 = vunpack.i.h.bf16 %v4654_v42  ;;  %v4655_v18 = vunpack.i.l.bf16 %v4654_v42 }
 0x691   : > { %v4649_v5 = vpop.permute.xlu1 %4648 }
 0x692   : > { %v4651_v4 = vunpack.i.h.bf16 %v4649_v5  ;;  %v4650_v55 = vunpack.i.l.bf16 %v4649_v5 }
 0x696   : > { %v4644_v31 = vpop.permute.xlu0 %4643 }
 0x697   : > { %v4646_v54 = vunpack.i.h.bf16 %v4644_v31  ;;  %v4645_v28 = vunpack.i.l.bf16 %v4644_v31 }
 0x699   : > { %v3689_v3 = vsel %vm2553_vm1, %v3472_v60, %v4645_v28  ;;  %v3690_v35 = vsel %vm2553_vm1, %v3526_v57, %v4646_v54  ;;  %v4772_v60 = vld [vmem:[#allocation2 + $0x18] sm:$0xff] }
 0x69a   : > { %v3693_v20 = vsel %vm2784_vm3, %v3689_v3, %v4650_v55  ;;  %v3694_v8 = vsel %vm2784_vm3, %v3690_v35, %v4651_v4 }
 0x69b   : > { %v3698_v15 = vsel %vm3697_vm4, %v3693_v20, %v4655_v18  ;;  %v3699_v26 = vsel %vm3697_vm4, %v3694_v8, %v4656_v45 }
 0x69c   : > { %v3702_v21 = vpack.c.bf16 %v3699_v26, %v3698_v15  ;;  %v4428_v15 = vld [vmem:[%s6962_s6 + $0x8] sm:$0xff] }
 0x69d   : > { %v4659_v41 = vpop.permute.xlu1 %4658  ;;  %3891 = vmatpush.bf16.msra.mxu3 %v4428_v15 }
 0x69e   : > { %4378 = vmatmul.msk.bf16.vlgmr.msra.gmra.mxu2 %vm885_vm2, %v3702_v21  ;;  %v4661_v22 = vunpack.i.h.bf16 %v4659_v41  ;;  %v4660_v13 = vunpack.i.l.bf16 %v4659_v41 }
 0x6a0   : > { %v4664_v30 = vpop.permute.xlu0 %4663 }
 0x6a1   : > { %v4666_v34 = vunpack.i.h.bf16 %v4664_v30  ;;  %v4665_v27 = vunpack.i.l.bf16 %v4664_v30 }
 0x6a3   : > { %v3691_v44 = vsel %vm2553_vm1, %v3580_v19, %v4665_v27  ;;  %v3692_v48 = vsel %vm2553_vm1, %v3634_v59, %v4666_v34  ;;  %v6961_v19 = vld [vmem:[#allocation19_spill] sm:$0xff]  ;;  %vm3946_vm1 = vcmask 523264  }
 0x6a4   : > { %v3695_v43 = vsel %vm2784_vm3, %v3691_v44, %v4660_v13  ;;  %v3696_v16 = vsel %vm2784_vm3, %v3692_v48, %v4661_v22  ;;  %v4427_v44 = vld [vmem:[%s6963_s26] sm:$0xff] }
 0x6a5   : > { %3892 = vmatpush.bf16.msra.mxu3 %v4427_v44 }
 0x6a8   : > { %v4669_v9 = vpop.permute.xlu0 %4668 }
 0x6a9   : > { %v4671_v25 = vunpack.i.h.bf16 %v4669_v9  ;;  %v4670_v24 = vunpack.i.l.bf16 %v4669_v9 }
 0x6ab   : > { %v3700_v36 = vsel %vm3697_vm4, %v3695_v43, %v4670_v24  ;;  %v3701_v12 = vsel %vm3697_vm4, %v3696_v16, %v4671_v25 }
 0x6ac   : > { %v3703_v17 = vpack.c.bf16 %v3701_v12, %v3700_v36 }
 0x6ae   : > { %4379 = vmatmul.msk.bf16.gmra.mxu2 %vm885_vm2, %v3703_v17 }
 0x721   : > { %v3739_v1 = vpop.f32.mrf.mxu2 }
 0x722   : > { %v3740_v32 = vadd.f32 %v4674_v14, %v3739_v1 }
 0x724   : > { %v6693_v51 = vadd.f32 %v4769_v53, %v3740_v32 }
 0x726   : > { %v3755_v63 = vsel %vm885_vm2, %v6693_v51, 0.0 }
 0x727   : > { %3756 = vadd.xlane.f32.xlu2 %v3755_v63  ;;  %v4675_v63 = vld [vmem:[%s773_s18] ss:$0 sm:$0xff] }
 0x729   : > { %v3741_v37 = vpop.f32.mrf.mxu2 }
 0x72a   : > { %v3742_v38 = vadd.f32 %v4674_v14, %v3741_v37 }
 0x72c   : > { %v6697_v46 = vadd.f32 %v4770_v33, %v3742_v38 }
 0x72e   : > { %v3758_v40 = vsel %vm885_vm2, %v6697_v46, 0.0 }
 0x72f   : > { %3759 = vadd.xlane.f32.xlu1 %v3758_v40 }
 0x731   : > { %v3744_v39 = vpop.f32.mrf.mxu2 }
 0x732   : > { %v3745_v23 = vadd.f32 %v4674_v14, %v3744_v39 }
 0x734   : > { %v6701_v61 = vadd.f32 %v4771_v58, %v3745_v23  ;;  %v4676_v58 = vld [vmem:[%s776_s28] ss:$0 sm:$0xff] }
 0x736   : > { %v3761_v29 = vsel %vm885_vm2, %v6701_v61, 0.0 }
 0x737   : > { %3762 = vadd.xlane.f32.xlu0 %v3761_v29 }
 0x739   : > { %v3746_v49 = vpop.f32.mrf.mxu2 }
 0x73a   : > { %v3747_v62 = vadd.f32 %v4674_v14, %v3746_v49 }
 0x73c   : > { %v6705_v57 = vadd.f32 %v4772_v60, %v3747_v62 }
 0x73e   : > { %v3764_v52 = vsel %vm885_vm2, %v6705_v57, 0.0 }
 0x73f   : > { %3765 = vadd.xlane.f32.xlu2 %v3764_v52 }
 0x79a   : > { %v3757_v50 = vpop.xlane.xlu2 %3756 }
 0x79b   : > { %v3767_v6 = vmul.f32 %v3757_v50, %v6961_v19 }
 0x79d   : > { %v3771_v59 = vsub.f32 %v6693_v51, %v3767_v6 }
 0x79f   : > { %v3775_v0 = vmul.f32 %v3771_v59, %v3771_v59 }
 0x7a1   : > { %v3779_v2 = vsel %vm885_vm2, %v3775_v0, 0.0 }
 0x7a2   : > { %3780 = vadd.xlane.f32.xlu1 %v3779_v2  ;;  %v3760_v7 = vpop.xlane.xlu1 %3759 }
 0x7a3   : > { %v3768_v11 = vmul.f32 %v3760_v7, %v6961_v19 }
 0x7a5   : > { %v6714_v56 = vsub.f32 %v6697_v46, %v3768_v11 }
 0x7a7   : > { %v3776_v10 = vmul.f32 %v6714_v56, %v6714_v56 }
 0x7a9   : > { %v3782_v47 = vsel %vm885_vm2, %v3776_v10, 0.0 }
 0x7aa   : > { %3783 = vadd.xlane.f32.xlu0 %v3782_v47  ;;  %v3763_v5 = vpop.xlane.xlu0 %3762 }
 0x7ab   : > { %v3769_v42 = vmul.f32 %v3763_v5, %v6961_v19 }
 0x7ad   : > { %v6721_v31 = vsub.f32 %v6701_v61, %v3769_v42 }
 0x7af   : > { %v3777_v54 = vmul.f32 %v6721_v31, %v6721_v31 }
 0x7b1   : > { %v3785_v28 = vsel %vm885_vm2, %v3777_v54, 0.0 }
 0x7b2   : > { %v3766_v4 = vpop.xlane.xlu2 %3765  ;;  %3786 = vadd.xlane.f32.xlu2 %v3785_v28 }
 0x7b3   : > { %v3770_v55 = vmul.f32 %v3766_v4, %v6961_v19 }
 0x7b5   : > { %v6728_v45 = vsub.f32 %v6705_v57, %v3770_v55 }
 0x7b7   : > { %v3778_v18 = vmul.f32 %v6728_v45, %v6728_v45 }
 0x7b9   : > { %v3788_v3 = vsel %vm885_vm2, %v3778_v18, 0.0 }
 0x7ba   : > { %3789 = vadd.xlane.f32.xlu1 %v3788_v3 }
 0x815   : > { %v3781_v35 = vpop.xlane.xlu1 %3780 }
 0x816   : > { %v3791_v20 = vmul.f32 %v3781_v35, %v6961_v19  ;;  %v4432_v35 = vld [vmem:[%s5223_s25 + $0x18] sm:$0xff] }
 0x817   : > { %3957 = vmatpush.bf16.msra.mxu0 %v4432_v35 }
 0x818   : > { %v3795_v8 = vadd.f32 1e-05, %v3791_v20  ;;  %v4431_v20 = vld [vmem:[%s5223_s25 + $0x10] sm:$0xff] }
 0x81a   : > { %4753 = vrsqrt.f32 %v3795_v8  ;;  %vm3805_vm6 = vweird.f32 %v3795_v8 }
 0x81b   : > { %3958 = vmatpush.bf16.msra.mxu0 %v4431_v20 }
 0x81d   : > { %v3784_v26 = vpop.xlane.xlu0 %3783 }
 0x81e   : > { %v3792_v21 = vmul.f32 %v3784_v26, %v6961_v19 }
 0x820   : > { %v4754_v30 = vpop.eup %4753  ;;  %v3796_v34 = vadd.f32 1e-05, %v3792_v21 }
 0x821   : > { %v3800_v27 = vmul.f32 %v4754_v30, %v3795_v8  ;;  %vm3806_vm5 = vweird.f32 %v4754_v30  ;;  %v4429_v8 = vld [vmem:[%s5223_s25] sm:$0xff] }
 0x822   : > { %4755 = vrsqrt.f32 %v3796_v34  ;;  %vm3807_vm7 = vmor %vm3805_vm6, %vm3806_vm5  ;;  %vm3815_vm9 = vweird.f32 %v3796_v34 }
 0x823   : > { %v3801_v41 = vmul.f32 %v4754_v30, %v3800_v27 }
 0x825   : > { %v3802_v48 = vmul.f32 0.5, %v3801_v41  ;;  %v3787_v22 = vpop.xlane.xlu2 %3786 }
 0x826   : > { %v3793_v13 = vmul.f32 %v3787_v22, %v6961_v19 }
 0x827   : > { %v3803_v9 = vsub.f32 1.5, %v3802_v48 }
 0x828   : > { %v4756_v25 = vpop.eup %4755  ;;  %v3797_v24 = vadd.f32 1e-05, %v3793_v13 }
 0x829   : > { %v3804_v43 = vmul.f32 %v4754_v30, %v3803_v9  ;;  %v3810_v16 = vmul.f32 %v4756_v25, %v3796_v34  ;;  %vm3816_vm8 = vweird.f32 %v4756_v25 }
 0x82a   : > { %4757 = vrsqrt.f32 %v3797_v24  ;;  %vm3817_vm10 = vmor %vm3815_vm9, %vm3816_vm8  ;;  %vm3825_vm12 = vweird.f32 %v3797_v24 }
 0x82b   : > { %v3811_v36 = vmul.f32 %v4756_v25, %v3810_v16  ;;  %v3808_v12 = vsel %vm3807_vm7, %v4754_v30, %v3804_v43  ;;  %v4678_v43 = vld [vmem:[%s5225_s19] ss:$0 sm:$0xff] }
 0x82c   : > { %v3839_v37 = vmul.f32 %v3808_v12, %v3771_v59 }
 0x82d   : > { %v3812_v17 = vmul.f32 0.5, %v3811_v36  ;;  %v3790_v14 = vpop.xlane.xlu1 %3789 }
 0x82e   : > { %v3794_v1 = vmul.f32 %v3790_v14, %v6961_v19  ;;  %v3846_v29 = vmul.f32 %v4675_v63, %v3839_v37 }
 0x82f   : > { %v3813_v32 = vsub.f32 1.5, %v3812_v17 }
 0x830   : > { %v4758_v53 = vpop.eup %4757  ;;  %v3798_v38 = vadd.f32 1e-05, %v3794_v1  ;;  %v3853_v19 = vadd.f32 %v4676_v58, %v3846_v29 }
 0x831   : > { %v3814_v33 = vmul.f32 %v4756_v25, %v3813_v32  ;;  %v3820_v40 = vmul.f32 %v4758_v53, %v3797_v24  ;;  %vm3826_vm11 = vweird.f32 %v4758_v53 }
 0x832   : > { %4759 = vrsqrt.f32 %v3798_v38  ;;  %vm3827_vm13 = vmor %vm3825_vm12, %vm3826_vm11  ;;  %vm3835_vm15 = vweird.f32 %v3798_v38 }
 0x833   : > { %v3818_v39 = vsel %vm3817_vm10, %v4756_v25, %v3814_v33  ;;  %v3821_v23 = vmul.f32 %v4758_v53, %v3820_v40 }
 0x834   : > { %v3840_v49 = vmul.f32 %v3818_v39, %v6714_v56 }
 0x835   : > { %v3822_v62 = vmul.f32 0.5, %v3821_v23 }
 0x836   : > { %v3847_v60 = vmul.f32 %v4675_v63, %v3840_v49 }
 0x837   : > { %v3823_v52 = vsub.f32 1.5, %v3822_v62 }
 0x838   : > { %v4760_v50 = vpop.eup %4759  ;;  %v3854_v6 = vadd.f32 %v4676_v58, %v3847_v60 }
 0x839   : > { %v3824_v59 = vmul.f32 %v4758_v53, %v3823_v52  ;;  %v3830_v0 = vmul.f32 %v4760_v50, %v3798_v38  ;;  %vm3836_vm14 = vweird.f32 %v4760_v50 }
 0x83a   : > { %v3857_v2 = vpack.c.bf16 %v3854_v6, %v3853_v19  ;;  %vm3837_vm0 = vmor %vm3835_vm15, %vm3836_vm14 }
 0x83b   : > { %v3831_v7 = vmul.f32 %v4760_v50, %v3830_v0  ;;  %v3828_v11 = vsel %vm3827_vm13, %v4758_v53, %v3824_v59 }
 0x83c   : > { %4388 = vmatmul.msk.bf16.vlgmr.msra.gmra.mxu3 %vm885_vm2, %v3857_v2  ;;  %v3841_v56 = vmul.f32 %v3828_v11, %v6721_v31  ;;  %v4430_v31 = vld [vmem:[%s5223_s25 + $0x8] sm:$0xff] }
 0x83d   : > { %v3832_v10 = vmul.f32 0.5, %v3831_v7  ;;  %3959 = vmatpush.bf16.msra.mxu0 %v4430_v31 }
 0x83e   : > { %v3848_v28 = vmul.f32 %v4675_v63, %v3841_v56 }
 0x83f   : > { %v3833_v47 = vsub.f32 1.5, %v3832_v10 }
 0x840   : > { %v3855_v55 = vadd.f32 %v4676_v58, %v3848_v28 }
 0x841   : > { %v3834_v5 = vmul.f32 %v4760_v50, %v3833_v47  ;;  %3960 = vmatpush.bf16.msra.mxu0 %v4429_v8 }
 0x843   : > { %v3838_v42 = vsel %vm3837_vm0, %v4760_v50, %v3834_v5 }
 0x844   : > { %v3842_v54 = vmul.f32 %v3838_v42, %v6728_v45  ;;  %v4677_v45 = vld [vmem:[%s779_s23] ss:$0 sm:$0xff] }
 0x846   : > { %v3849_v4 = vmul.f32 %v4675_v63, %v3842_v54 }
 0x848   : > { %v3856_v18 = vadd.f32 %v4676_v58, %v3849_v4 }
 0x84a   : > { %v3858_v3 = vpack.c.bf16 %v3856_v18, %v3855_v55 }
 0x84c   : > { %4389 = vmatmul.msk.bf16.gmra.mxu3 %vm885_vm2, %v3858_v3 }
 0x8bf   : > { %v3894_v15 = vpop.f32.mrf.mxu3 }
 0x8c0   : > { %v3895_v26 = vadd.f32 %v4677_v45, %v3894_v15 }
 0x8c2   : > { %4761 = vtanh.f32 %v3895_v26 }
 0x8c7   : > { %v3896_v21 = vpop.f32.mrf.mxu3 }
 0x8c8   : > { %v3897_v30 = vadd.f32 %v4677_v45, %v3896_v21  ;;  %v4762_v34 = vpop.eup %4761 }
 0x8ca   : > { %4763 = vtanh.f32 %v3897_v30 }
 0x8cf   : > { %v3899_v27 = vpop.f32.mrf.mxu3 }
 0x8d0   : > { %v4764_v41 = vpop.eup %4763  ;;  %v3900_v48 = vadd.f32 %v4677_v45, %v3899_v27 }
 0x8d1   : > { %v3908_v44 = vpack.c.bf16 %v4764_v41, %v4762_v34 }
 0x8d2   : > { %4765 = vtanh.f32 %v3900_v48 }
 0x8d3   : > { %4406 = vmatmul.msk.bf16.vlgmr.msra.gmra.mxu0 %vm3946_vm1, %v3908_v44 }
 0x8d7   : > { %v3901_v22 = vpop.f32.mrf.mxu3 }
 0x8d8   : > { %v3902_v13 = vadd.f32 %v4677_v45, %v3901_v22  ;;  %v4766_v9 = vpop.eup %4765 }
 0x8da   : > { %4767 = vtanh.f32 %v3902_v13 }
 0x8e0   : > { %v4768_v25 = vpop.eup %4767 }
 0x8e1   : > { %v3909_v24 = vpack.c.bf16 %v4768_v25, %v4766_v9 }
 0x8e3   : > { %4407 = vmatmul.msk.bf16.gmra.mxu0 %vm3946_vm1, %v3909_v24 }
 0x950   : > { %v3962_v16 = vpop.f32.mrf.mxu0 }
 0x951   : > { %v3963_v36 = vadd.f32 %v4678_v43, %v3962_v16 }
 0x953   : > { %v3972_v12 = vadd.f32 %v3963_v36, %v6693_v51 }
 0x955   : > { %3976 = vst.msk [vmem:[#allocation2] sm:$0xff] %vm885_vm2, %v3972_v12 }
 0x958   : > { %v3964_v17 = vpop.f32.mrf.mxu0 }
 0x959   : > { %v3965_v14 = vadd.f32 %v4678_v43, %v3964_v17 }
 0x95b   : > { %v3973_v1 = vadd.f32 %v3965_v14, %v6697_v46 }
 0x95d   : > { %3977 = vst.msk [vmem:[#allocation2 + $0x8] sm:$0xff] %vm885_vm2, %v3973_v1 }
 0x960   : > { %v3967_v32 = vpop.f32.mrf.mxu0 }
 0x961   : > { %v3968_v53 = vadd.f32 %v4678_v43, %v3967_v32 }
 0x963   : > { %v3974_v63 = vadd.f32 %v3968_v53, %v6701_v61 }
 0x965   : > { %3978 = vst.msk [vmem:[#allocation2 + $0x10] sm:$0xff] %vm885_vm2, %v3974_v63 }
 0x968   : > { %v3969_v37 = vpop.f32.mrf.mxu0 }
 0x969   : > { %v3970_v38 = vadd.f32 %v4678_v43, %v3969_v37  ;;  %3983 = sbr.rel (%p4408_p3) target bundleno = 2692 (0xa84), region = 108 }
 0x96b   : > { %v3975_v33 = vadd.f32 %v3970_v38, %v6705_v57 }
 0x96d   : > { %3979 = vst.msk [vmem:[#allocation2 + $0x18] sm:$0xff] %vm885_vm2, %v3975_v33 }
 0x96e   : > { %v3992_v51 = vsel %vm885_vm2, %v3974_v63, 0.0  ;;  %v3986_v46 = vsel %vm885_vm2, %v3972_v12, 0.0  ;;  %v3995_v40 = vsel %vm885_vm2, %v3975_v33, 0.0  ;;  %v3989_v61 = vsel %vm885_vm2, %v3973_v1, 0.0  ;;  %v6964_v57 = vld [vmem:[#allocation19_spill] sm:$0xff] }
 0x96f   : > { %3993 = vadd.xlane.f32.xlu1 %v3992_v51  ;;  %3987 = vadd.xlane.f32.xlu0 %v3986_v46  ;;  %v4773_v43 = vld [vmem:[%s6965_s29] ss:$0 sm:$0xff] }
 0x977   : > { %3996 = vadd.xlane.f32.xlu1 %v3995_v40  ;;  %3990 = vadd.xlane.f32.xlu0 %v3989_v61 }
 0x9e2   : > { %v3994_v39 = vpop.xlane.xlu1 %3993  ;;  %v3988_v23 = vpop.xlane.xlu0 %3987 }
 0x9e3   : > { %v4000_v58 = vmul.f32 %v3994_v39, %v6964_v57  ;;  %v3998_v29 = vmul.f32 %v3988_v23, %v6964_v57 }
 0x9e5   : > { %v6781_v49 = vsub.f32 %v3974_v63, %v4000_v58  ;;  %v4002_v62 = vsub.f32 %v3972_v12, %v3998_v29 }
 0x9e7   : > { %v4008_v60 = vmul.f32 %v6781_v49, %v6781_v49  ;;  %v4006_v52 = vmul.f32 %v4002_v62, %v4002_v62 }
 0x9e9   : > { %v4016_v50 = vsel %vm885_vm2, %v4008_v60, 0.0  ;;  %v4010_v19 = vsel %vm885_vm2, %v4006_v52, 0.0 }
 0x9ea   : > { %v3997_v6 = vpop.xlane.xlu1 %3996  ;;  %4017 = vadd.xlane.f32.xlu0 %v4016_v50  ;;  %4011 = vadd.xlane.f32.xlu2 %v4010_v19  ;;  %v3991_v59 = vpop.xlane.xlu0 %3990 }
 0x9eb   : > { %v4001_v0 = vmul.f32 %v3997_v6, %v6964_v57  ;;  %v3999_v2 = vmul.f32 %v3991_v59, %v6964_v57 }
 0x9ed   : > { %v6789_v7 = vsub.f32 %v3975_v33, %v4001_v0  ;;  %v6791_v11 = vsub.f32 %v3973_v1, %v3999_v2  ;;  %v4774_v1 = vld [vmem:[%s6966_s22] ss:$0 sm:$0xff] }
 0x9ef   : > { %v4009_v10 = vmul.f32 %v6789_v7, %v6789_v7  ;;  %v4007_v47 = vmul.f32 %v6791_v11, %v6791_v11 }
 0x9f1   : > { %v4019_v56 = vsel %vm885_vm2, %v4009_v10, 0.0  ;;  %v4013_v5 = vsel %vm885_vm2, %v4007_v47, 0.0 }
 0x9f2   : > { %4020 = vadd.xlane.f32.xlu1 %v4019_v56  ;;  %4014 = vadd.xlane.f32.xlu2 %v4013_v5 }
 0xa5d   : > { %v4012_v42 = vpop.xlane.xlu2 %4011  ;;  %v4018_v54 = vpop.xlane.xlu0 %4017 }
 0xa5e   : > { %v4022_v28 = vmul.f32 %v4012_v42, %v6964_v57  ;;  %v4024_v4 = vmul.f32 %v4018_v54, %v6964_v57 }
 0xa60   : > { %v4026_v55 = vadd.f32 1e-05, %v4022_v28  ;;  %v4028_v18 = vadd.f32 1e-05, %v4024_v4 }
 0xa62   : > { %4775 = vrsqrt.f32 %v4026_v55  ;;  %vm4036_vm5 = vweird.f32 %v4026_v55  ;;  %vm4056_vm7 = vweird.f32 %v4028_v18 }
 0xa63   : > { %4777 = vrsqrt.f32 %v4028_v18 }
 0xa65   : > { %v4021_v3 = vpop.xlane.xlu1 %4020  ;;  %v4015_v35 = vpop.xlane.xlu2 %4014 }
 0xa66   : > { %v4025_v20 = vmul.f32 %v4021_v3, %v6964_v57  ;;  %v4023_v31 = vmul.f32 %v4015_v35, %v6964_v57 }
 0xa68   : > { %v4776_v8 = vpop.eup %4775  ;;  %v4029_v15 = vadd.f32 1e-05, %v4025_v20  ;;  %v4027_v45 = vadd.f32 1e-05, %v4023_v31 }
 0xa69   : > { %v4778_v26 = vpop.eup %4777  ;;  %v4031_v21 = vmul.f32 %v4776_v8, %v4026_v55  ;;  %vm4037_vm3 = vweird.f32 %v4776_v8 }
 0xa6a   : > { %v4051_v30 = vmul.f32 %v4778_v26, %v4028_v18  ;;  %4779 = vrsqrt.f32 %v4029_v15  ;;  %vm4057_vm4 = vweird.f32 %v4778_v26  ;;  %vm4038_vm6 = vmor %vm4036_vm5, %vm4037_vm3  ;;  %vm4066_vm11 = vweird.f32 %v4029_v15 }
 0xa6b   : > { %v4032_v34 = vmul.f32 %v4776_v8, %v4031_v21  ;;  %4781 = vrsqrt.f32 %v4027_v45  ;;  %vm4058_vm8 = vmor %vm4056_vm7, %vm4057_vm4  ;;  %vm4046_vm13 = vweird.f32 %v4027_v45 }
 0xa6c   : > { %v4052_v27 = vmul.f32 %v4778_v26, %v4051_v30 }
 0xa6d   : > { %v4033_v41 = vmul.f32 0.5, %v4032_v34 }
 0xa6e   : > { %v4053_v44 = vmul.f32 0.5, %v4052_v27 }
 0xa6f   : > { %v4034_v48 = vsub.f32 1.5, %v4033_v41 }
 0xa70   : > { %v4780_v22 = vpop.eup %4779  ;;  %v4054_v13 = vsub.f32 1.5, %v4053_v44 }
 0xa71   : > { %v4782_v9 = vpop.eup %4781  ;;  %v4035_v25 = vmul.f32 %v4776_v8, %v4034_v48  ;;  %v4061_v24 = vmul.f32 %v4780_v22, %v4029_v15  ;;  %vm4067_vm9 = vweird.f32 %v4780_v22 }
 0xa72   : > { %v4055_v16 = vmul.f32 %v4778_v26, %v4054_v13  ;;  %v4041_v36 = vmul.f32 %v4782_v9, %v4027_v45  ;;  %vm4047_vm10 = vweird.f32 %v4782_v9  ;;  %vm4068_vm12 = vmor %vm4066_vm11, %vm4067_vm9 }
 0xa73   : > { %v4039_v12 = vsel %vm4038_vm6, %v4776_v8, %v4035_v25  ;;  %v4062_v17 = vmul.f32 %v4780_v22, %v4061_v24  ;;  %vm4048_vm14 = vmor %vm4046_vm13, %vm4047_vm10 }
 0xa74   : > { %v4070_v14 = vmul.f32 %v4039_v12, %v4002_v62  ;;  %v4059_v32 = vsel %vm4058_vm8, %v4778_v26, %v4055_v16  ;;  %v4042_v53 = vmul.f32 %v4782_v9, %v4041_v36 }
 0xa75   : > { %v4072_v63 = vmul.f32 %v4059_v32, %v6781_v49  ;;  %v4063_v37 = vmul.f32 0.5, %v4062_v17 }
 0xa76   : > { %v4077_v38 = vmul.f32 %v4773_v43, %v4070_v14  ;;  %v4043_v33 = vmul.f32 0.5, %v4042_v53 }
 0xa77   : > { %v4079_v51 = vmul.f32 %v4773_v43, %v4072_v63  ;;  %v4064_v46 = vsub.f32 1.5, %v4063_v37 }
 0xa78   : > { %v4084_v40 = vadd.f32 %v4774_v1, %v4077_v38  ;;  %v4044_v61 = vsub.f32 1.5, %v4043_v33 }
 0xa79   : > { %v4086_v39 = vadd.f32 %v4774_v1, %v4079_v51  ;;  %v4065_v23 = vmul.f32 %v4780_v22, %v4064_v46 }
 0xa7a   : > { %4088 = vst.msk [vmem:[#allocation9] sm:$0xff] %vm885_vm2, %v4084_v40  ;;  %v4045_v57 = vmul.f32 %v4782_v9, %v4044_v61 }
 0xa7b   : > { %4090 = vst.msk [vmem:[#allocation9 + $0x10] sm:$0xff] %vm885_vm2, %v4086_v39  ;;  %v4069_v58 = vsel %vm4068_vm12, %v4780_v22, %v4065_v23 }
 0xa7c   : > { %v4073_v29 = vmul.f32 %v4069_v58, %v6789_v7  ;;  %v4049_v49 = vsel %vm4048_vm14, %v4782_v9, %v4045_v57 }
 0xa7d   : > { %v4071_v62 = vmul.f32 %v4049_v49, %v6791_v11 }
 0xa7e   : > { %v4080_v60 = vmul.f32 %v4773_v43, %v4073_v29 }
 0xa7f   : > { %v4078_v52 = vmul.f32 %v4773_v43, %v4071_v62 }
 0xa80   : > { %v4087_v50 = vadd.f32 %v4774_v1, %v4080_v60 }
 0xa81   : > { %v4085_v19 = vadd.f32 %v4774_v1, %v4078_v52 }
 0xa82   : > { %4091 = vst.msk [vmem:[#allocation9 + $0x18] sm:$0xff] %vm885_vm2, %v4087_v50 }
 0xa83   : > { %4089 = vst.msk [vmem:[#allocation9 + $0x8] sm:$0xff] %vm885_vm2, %v4085_v19 }
 0xa84 PF: > { %p4465_p4 = scmp.eq.s32.totalorder %s5133_s16, 1  ;;  %s6967_s2 = sld [smem:[#allocation37_spill]] }
 0xa85   : > { %s4975_s1 = smov [#allocation9]   ;;  %s4976_s26 = smov 128  }
 0xa86   : > { %s4100_s6 = sshll.u32 %s4975_s1, 4  ;;  %s4101_s6 = int_to_ptr.vmem [resolvable:$true] %s4100_s6 }
 0xa8a   : > { %s4102_s24 = sshll.u32 %s6967_s2, 4  ;;  %s4103_s24 = int_to_ptr.hbm [resolvable:$true] %s4102_s24 }
 0xa8b   : > { %4448 = dma.vmem_to_hbm [thread:$0]  (%p4465_p4), %s4101_s6, 512, %s4103_s24, [#allocation5], %s4976_s26, %s4976_s26, %s4974_s14  }
 0xa8c   : > { %4934 = dma.done.wait (%p4465_p4), [#allocation5], 512  }
 0xa8d   : > { %4936 = vsyncadd (%p4465_p4), [#allocation5], 4294966784 }
 0xa8e PF: > { %s6968_s11 = sld [smem:[#allocation16_spill]] }
 0xa8f   : > { %s6969_s24 = sld [smem:[#allocation13_spill]] }
 0xa90   : > { %s6970_s25 = sld [smem:[#allocation14_spill]] }
 0xa91   : > { %s6971_s26 = sld [smem:[#allocation18_spill]] }
 0xa92   : > { %s6972_s27 = sld [smem:[#allocation15_spill]] }
 0xa93   : > { %s6973_s28 = sld [smem:[#allocation17_spill]] }
 0xa94   : > { %s32_s29 = sadd.s32 1, %s6968_s11  }
 0xa95   : > { %p29_p5 = scmp.ge.s32.totalorder %s32_s29, 4  }
 0xa97   :  { %31 = sbr.rel (!%p29_p5) target bundleno = 18 (0x12), region = 180 }
 0xa9c   :  { %4119 = vsyncpa [#allocation4], 1 }
 0xa9d   :  { %4121 = vsyncpa [#allocation4 + $0x1], 1 }
 0xa9e   :  { %4122 = vsyncpa [#allocation7], 1 }
 0xa9f   :  { %4124 = vsyncpa [#allocation7 + $0x1], 1 }
 0xaa0   :  { %4125 = vsyncpa [#allocation5], 1 }
 0xaa1   :  { %4127 = vsyncpa [#allocation5 + $0x1], 1 }

</bundles_post_ra>
